<compile_context>
chip_gen: v6e
topology: v6e:2x2x1
jax: 0.10.0
libtpu: 0.0.40
codegen_flags: <defaults>
</compile_context>

<pallas_src>
import jax
import jax.numpy as jnp
import numpy as np
from jax import lax
from jax.experimental import pallas as pl
from jax.experimental.pallas import tpu as pltpu


def _make_kernel(SH, W, Cin, Cout):
    H1 = SH + 2                 # conv1 rows per strip (incl. 1-row halo for conv2)
    SHh, Wh = SH // 2, W // 2
    LP = 8                      # sublane-aligned left column halo of pad2
    WP = W + 2 * LP
    f32, bf16 = jnp.float32, jnp.bfloat16
    taps = [(ky, kx) for ky in range(3) for kx in range(3)]

    def kernel(xs_ref, w1_ref, s1_ref, t1_ref, w2_ref, s2_ref, t2_ref,
               out_ref, idx_ref,
               im1, pad2, c2, cvs, cis):
        s = pl.program_id(1)

        # ---- ConvBlock 1: im2col from per-tap ref slices + one fat MXU matmul ----
        for t, (ky, kx) in enumerate(taps):            # K order = (ky, kx, cin)
            im1[:, t * Cin:(t + 1) * Cin] = (
                xs_ref[0, ky:ky + H1, kx:kx + W, :].reshape(H1 * W, Cin))
        acc1 = jnp.dot(im1[...], w1_ref[...], preferred_element_type=f32)
        h1 = jnp.maximum(acc1 * s1_ref[...] + t1_ref[...], 0.0)     # (H1*W, Cout) f32

        # ---- stage conv1 activation (bf16) into the column-padded halo buffer ----
        pad2[:, 0:LP, :] = jnp.zeros((H1, LP, Cout), bf16)          # aligned 8-wide
        pad2[:, LP + W:WP, :] = jnp.zeros((H1, LP, Cout), bf16)     # aligned 8-wide
        pad2[:, LP:LP + W, :] = h1.astype(bf16).reshape(H1, W, Cout)

        # Rows 0 / H1-1 are conv2's vertical *image* padding when the strip touches
        # the top/bottom border -> must be zero, not BN(conv(zero-padded input)).
        @pl.when(s == 0)
        def _():
            pad2[0:1, :, :] = jnp.zeros((1, WP, Cout), bf16)

        @pl.when(s == pl.num_programs(1) - 1)
        def _():
            pad2[H1 - 1:H1, :, :] = jnp.zeros((1, WP, Cout), bf16)

        # ---- ConvBlock 2: nine accumulated per-tap dots (no im2col slab) ---------
        for t, (ky, kx) in enumerate(taps):
            a = pad2[ky:ky + SH, LP - 1 + kx:LP - 1 + kx + W, :].reshape(SH * W, Cout)
            contrib = jnp.dot(a, w2_ref[t * Cout:(t + 1) * Cout, :],
                              preferred_element_type=f32).reshape(SH, W, Cout)
            if t == 0:
                c2[...] = contrib
            else:
                c2[...] += contrib
        c2[...] = jnp.maximum(c2[...] * s2_ref[...] + t2_ref[...], 0.0)

        # ---- MaxPool2d(2, 2, return_indices=True) --------------------------------
        # Pass 1: reduce column pairs; earlier column wins ties (torch-style).
        v0 = c2[:, pl.ds(0, Wh, stride=2), :]
        v1 = c2[:, pl.ds(1, Wh, stride=2), :]
        jj = lax.broadcasted_iota(jnp.int32, (SH, Wh, Cout), 1)
        take_c = v1 > v0
        cvs[...] = jnp.where(take_c, v1, v0)
        cis[...] = jnp.where(take_c, 2 * jj + 1, 2 * jj)
        # Pass 2: reduce row pairs (stride along the cheap major axis).
        r0 = cvs[pl.ds(0, SHh, stride=2), :, :]
        r1 = cvs[pl.ds(1, SHh, stride=2), :, :]
        c0 = cis[pl.ds(0, SHh, stride=2), :, :]
        c1 = cis[pl.ds(1, SHh, stride=2), :, :]
        ii = lax.broadcasted_iota(jnp.int32, (SHh, Wh, Cout), 0)
        take_r = r1 > r0
        out_ref[0] = jnp.where(take_r, r1, r0).astype(out_ref.dtype)   # bf16 writeback
        row = jnp.where(take_r, 2 * ii + 1, 2 * ii) + s * SH           # global pre-pool row
        col = jnp.where(take_r, c1, c0)
        idx_ref[0] = row * W + col                                     # flat H*W index

    return kernel


def _pick_strip_h(H, W, Cin, Cout, budget_bytes=8 << 20):
    """Largest even strip height dividing H whose per-strip VMEM footprint
    (scratch + double-buffered in/out blocks) stays under `budget_bytes`.
    TODO(synk): halve the budget when targeting v7x (64 MiB VMEM vs 128 MiB)."""
    best = 2
    for sh in range(2, H + 1, 2):
        if H % sh:
            continue
        h1 = sh + 2
        est = (h1 * W * 9 * Cin * 2                      # conv1 im2col slab (bf16)
               + h1 * (W + 16) * Cout * 2                # padded conv1 act (bf16)
               + sh * W * Cout * 4                       # conv2 acc / act (f32)
               + 2 * sh * (W // 2) * Cout * 4            # pool temporaries
               + 2 * (sh + 4) * (W + 2) * Cin * 2        # double-buffered input block
               + 2 * (sh // 2) * (W // 2) * Cout * 6)    # double-buffered outputs
        if est <= budget_bytes:
            best = sh
    return best


def encoder_block_segnet(x_nchw, params, strip_h=None):
    """Pallas TPU implementation of EncoderBlockSegnet.forward (eval-mode BN).

    Returns (pooled, indices), both NCHW; pooled is f32 (bf16 on the wire),
    indices are int32 flat H*W offsets (torch convention).
    """
    w1, s1, t1, w2, s2, t2 = params
    x = jnp.transpose(x_nchw, (0, 2, 3, 1))              # NCHW -> NHWC
    N, H, W, Cin = x.shape
    Cout = w1.shape[-1]
    assert H % 2 == 0 and W % 2 == 0, "even spatial dims required (2x2/2 pool)"
    SH = strip_h if strip_h is not None else _pick_strip_h(H, W, Cin, Cout)
    assert SH % 2 == 0 and H % SH == 0, "strip height must be even and divide H"
    S = H // SH
    Hh, Wh, SHh = H // 2, W // 2, SH // 2
    H1 = SH + 2

    # bf16 input with a 2-row / 1-col zero halo; overlapping halo strips are
    # materialized in HBM so each strip (incl. halo) arrives through the pipelined
    # BlockSpec DMA (duplication overhead = 4/SH rows).
    xp = jnp.pad(x.astype(jnp.bfloat16), ((0, 0), (2, 2), (1, 1), (0, 0)))
    row_ix = (jnp.arange(S) * SH)[:, None] + jnp.arange(SH + 4)[None, :]
    strips = jnp.take(xp, row_ix, axis=1).reshape(N * S, SH + 4, W + 2, Cin)

    # Flatten 3x3 taps into the contraction dim: (ky, kx, cin) -> K.
    w1f = w1.astype(jnp.bfloat16).reshape(9 * Cin, Cout)
    w2f = w2.astype(jnp.bfloat16).reshape(9 * Cout, Cout)

    kernel = _make_kernel(SH, W, Cin, Cout)

    grid_spec = pltpu.PrefetchScalarGridSpec(
        num_scalar_prefetch=0,
        grid=(N, S),                                    # batch parallel, strip inner
        in_specs=[
            pl.BlockSpec((1, SH + 4, W + 2, Cin), lambda n, s: (n * S + s, 0, 0, 0)),
            pl.BlockSpec((9 * Cin, Cout), lambda n, s: (0, 0)),
            pl.BlockSpec((1, Cout), lambda n, s: (0, 0)),
            pl.BlockSpec((1, Cout), lambda n, s: (0, 0)),
            pl.BlockSpec((9 * Cout, Cout), lambda n, s: (0, 0)),
            pl.BlockSpec((1, Cout), lambda n, s: (0, 0)),
            pl.BlockSpec((1, Cout), lambda n, s: (0, 0)),
        ],
        out_specs=[
            pl.BlockSpec((1, SHh, Wh, Cout), lambda n, s: (n * S + s, 0, 0, 0)),
            pl.BlockSpec((1, SHh, Wh, Cout), lambda n, s: (n * S + s, 0, 0, 0)),
        ],
        scratch_shapes=[
            pltpu.VMEM((H1 * W, 9 * Cin), jnp.bfloat16),    # conv1 im2col slab
            pltpu.VMEM((H1, W + 16, Cout), jnp.bfloat16),   # col-padded conv1 act
            pltpu.VMEM((SH, W, Cout), jnp.float32),         # conv2 acc / activation
            pltpu.VMEM((SH, Wh, Cout), jnp.float32),        # column-reduced max
            pltpu.VMEM((SH, Wh, Cout), jnp.int32),          # column-reduced argcol
        ],
    )

    out, idx = pl.pallas_call(
        kernel,
        out_shape=(jax.ShapeDtypeStruct((N * S, SHh, Wh, Cout), jnp.bfloat16),
                   jax.ShapeDtypeStruct((N * S, SHh, Wh, Cout), jnp.int32)),
        grid_spec=grid_spec,
        compiler_params=pltpu.CompilerParams(
            dimension_semantics=("parallel", "arbitrary"),
            vmem_limit_bytes=48 * 1024 * 1024),
    )(strips, w1f, s1, t1, w2f, s2, t2)

    out = out.reshape(N, Hh, Wh, Cout).astype(jnp.float32)   # (n, s, r) -> global row
    idx = idx.reshape(N, Hh, Wh, Cout)
    return (jnp.transpose(out, (0, 3, 1, 2)),                # NHWC -> NCHW
            jnp.transpose(idx, (0, 3, 1, 2)))


# ----------------------------- parameters ------------------------------------
def init_params(key, Cin, Cout, eps=1e-5):
    """Deterministic synthetic Conv+BN params, BN folded into scale/shift."""
    ks = jax.random.split(key, 12)

    def conv_bn(kw, kb, kg, kbe, km, kv, cin):
        w = 0.2 * jax.random.normal(kw, (3, 3, cin, Cout), jnp.float32)   # HWIO
        b = 0.1 * jax.random.normal(kb, (Cout,), jnp.float32)             # conv bias
        gamma = 1.0 + 0.1 * jax.random.normal(kg, (Cout,), jnp.float32)
        beta = 0.1 * jax.random.normal(kbe, (Cout,), jnp.float32)
        mean = 0.05 * jax.random.normal(km, (Cout,), jnp.float32)
        var = 1.0 + 0.2 * jax.random.uniform(kv, (Cout,), jnp.float32)
        scale = gamma / jnp.sqrt(var + eps)
        shift = beta + scale * (b - mean)
        return w, scale.reshape(1, Cout), shift.reshape(1, Cout)

    w1, s1, t1 = conv_bn(*ks[0:6], Cin)
    w2, s2, t2 = conv_bn(*ks[6:12], Cout)
    return (w1, s1, t1, w2, s2, t2)


# ----------------------------- pure-JAX reference -----------------------------
def reference(x_nchw, params):
    """Reference matching the kernel's bf16-input / f32-accumulate math path."""
    w1, s1, t1, w2, s2, t2 = params
    x = jnp.transpose(x_nchw, (0, 2, 3, 1)).astype(jnp.float32)

    def conv_bn_relu(h, w, s, t):
        y = lax.conv_general_dilated(
            h.astype(jnp.bfloat16), w.astype(jnp.bfloat16),
            window_strides=(1, 1), padding=((1, 1), (1, 1)),
            dimension_numbers=('NHWC', 'HWIO', 'NHWC'),
            preferred_element_type=jnp.float32)
        return jnp.maximum(y * s + t, 0.0)

    h = conv_bn_relu(conv_bn_relu(x, w1, s1, t1), w2, s2, t2)
    N, H, W, C = h.shape
    Hh, Wh = H // 2, W // 2
    h5 = h.reshape(N, Hh, 2, Wh, 2, C)
    ii = lax.broadcasted_iota(jnp.int32, (N, Hh, Wh, C), 1)
    jj = lax.broadcasted_iota(jnp.int32, (N, Hh, Wh, C), 2)
    best_v = jnp.full((N, Hh, Wh, C), -jnp.inf, jnp.float32)
    best_i = jnp.zeros((N, Hh, Wh, C), jnp.int32)
    for di in range(2):            # flat (row-major) window order, first max wins
        for dj in range(2):
            v = h5[:, :, di, :, dj, :]
            cand = (2 * ii + di) * W + (2 * jj + dj)
            take = v > best_v
            best_i = jnp.where(take, cand, best_i)
            best_v = jnp.maximum(best_v, v)
    return (jnp.transpose(best_v, (0, 3, 1, 2)),
            jnp.transpose(best_i, (0, 3, 1, 2)),
            jnp.transpose(h, (0, 3, 1, 2)))          # pre-pool feature map (NCHW)


if __name__ == "__main__":
    N, Cin, Cout, H, W = 2, 4, 8, 16, 16
    Hh, Wh = H // 2, W // 2
    key = jax.random.PRNGKey(0)
    k_x, k_p = jax.random.split(key)
    x = jax.random.normal(k_x, (N, Cin, H, W), jnp.float32)
    params = init_params(k_p, Cin, Cout)

    # strip_h=4 -> 4 strips per image: exercises the halo recompute at both image
    # borders and across interior strip boundaries.
    out, idx = encoder_block_segnet(x, params, strip_h=4)
    out = jax.block_until_ready(out)
    idx = jax.block_until_ready(idx)

    assert out.shape == (N, Cout, Hh, Wh)
    assert idx.shape == (N, Cout, Hh, Wh)

    ref_out, ref_idx, ref_h = reference(x, params)
    out_np = np.asarray(out)
    idx_np = np.asarray(idx)
    ref_out_np = np.asarray(ref_out)
    ref_idx_np = np.asarray(ref_idx)
    ref_h_np = np.asarray(ref_h)                         # (N, Cout, H, W)

    # 1) pooled values match (bf16-input / f32-accumulate / bf16-writeback tolerance).
    np.testing.assert_allclose(out_np, ref_out_np, rtol=5e-2, atol=5e-2)

    # 2) every index lies in its own 2x2 window and points at a maximal element.
    r, c = idx_np // W, idx_np % W
    ii = np.arange(Hh)[None, None, :, None]
    jj = np.arange(Wh)[None, None, None, :]
    assert np.all((r // 2 == ii) & (c // 2 == jj)), "pool index outside its window"
    gathered = np.take_along_axis(
        ref_h_np.reshape(N, Cout, H * W),
        idx_np.reshape(N, Cout, Hh * Wh).astype(np.int64), axis=-1,
    ).reshape(N, Cout, Hh, Wh)
    np.testing.assert_allclose(gathered, ref_out_np, rtol=5e-2, atol=5e-2)

    # 3) wherever the reference argmax is numerically unambiguous, indices must
    #    match the reference (first-occurrence tie-break) exactly.
    win = ref_h_np.reshape(N, Cout, Hh, 2, Wh, 2).transpose(0, 1, 2, 4, 3, 5)
    win = win.reshape(N, Cout, Hh, Wh, 4)
    top2 = np.sort(win, axis=-1)[..., -2:]
    clear = (top2[..., 1] - top2[..., 0]) > 0.2
    assert np.array_equal(idx_np[clear], ref_idx_np[clear]), "argmax index mismatch"

    print("KERNEL_OK")
</pallas_src>

<mosaic_0001>
module attributes {stable_mosaic.version = 11 : i64} {
  func.func @kernel(%arg0: i32, %arg1: i32, %arg2: memref<1x8x18x4xbf16, #tpu.memory_space<vmem>>, %arg3: memref<36x8xbf16, #tpu.memory_space<vmem>>, %arg4: memref<1x8xf32, #tpu.memory_space<vmem>>, %arg5: memref<1x8xf32, #tpu.memory_space<vmem>>, %arg6: memref<72x8xbf16, #tpu.memory_space<vmem>>, %arg7: memref<1x8xf32, #tpu.memory_space<vmem>>, %arg8: memref<1x8xf32, #tpu.memory_space<vmem>>, %arg9: memref<1x2x8x8xbf16, #tpu.memory_space<vmem>>, %arg10: memref<1x2x8x8xi32, #tpu.memory_space<vmem>>, %arg11: memref<96x36xbf16, #tpu.memory_space<vmem>>, %arg12: memref<6x32x8xbf16, #tpu.memory_space<vmem>>, %arg13: memref<4x16x8xf32, #tpu.memory_space<vmem>>, %arg14: memref<4x8x8xf32, #tpu.memory_space<vmem>>, %arg15: memref<4x8x8xi32, #tpu.memory_space<vmem>>) attributes {dimension_semantics = [#tpu.dimension_semantics<parallel>, #tpu.dimension_semantics<arbitrary>], iteration_bounds = array<i64: 2, 4>, scalar_prefetch = 0 : i64, scratch_operands = 5 : i64, tpu.core_type = #tpu.core_type<tc>, window_params = [{transform_indices = @transform_0, window_bounds = array<i64: 1, 8, 18, 4>}, {pipeline_mode = #tpu.pipeline_mode<synchronous>, transform_indices = @transform_1, window_bounds = array<i64: 36, 8>}, {pipeline_mode = #tpu.pipeline_mode<synchronous>, transform_indices = @transform_2, window_bounds = array<i64: 1, 8>}, {pipeline_mode = #tpu.pipeline_mode<synchronous>, transform_indices = @transform_3, window_bounds = array<i64: 1, 8>}, {pipeline_mode = #tpu.pipeline_mode<synchronous>, transform_indices = @transform_4, window_bounds = array<i64: 72, 8>}, {pipeline_mode = #tpu.pipeline_mode<synchronous>, transform_indices = @transform_5, window_bounds = array<i64: 1, 8>}, {pipeline_mode = #tpu.pipeline_mode<synchronous>, transform_indices = @transform_6, window_bounds = array<i64: 1, 8>}, {transform_indices = @transform_7, window_bounds = array<i64: 1, 2, 8, 8>}, {transform_indices = @transform_8, window_bounds = array<i64: 1, 2, 8, 8>}]} {
    %c0 = arith.constant 0 : index
    %c0_0 = arith.constant 0 : index
    %c0_1 = arith.constant 0 : index
    %c0_2 = arith.constant 0 : index
    %0 = vector.load %arg2[%c0, %c0_0, %c0_1, %c0_2] : memref<1x8x18x4xbf16, #tpu.memory_space<vmem>>, vector<1x6x16x4xbf16>
    %1 = vector.shape_cast %0 : vector<1x6x16x4xbf16> to vector<6x16x4xbf16>
    %2 = vector.shape_cast %1 : vector<6x16x4xbf16> to vector<96x4xbf16>
    %c0_3 = arith.constant 0 : index
    %c0_4 = arith.constant 0 : index
    %3 = vector.load %arg11[%c0_3, %c0_4] : memref<96x36xbf16, #tpu.memory_space<vmem>>, vector<96x4xbf16>
    tpu.vector_store %arg11[%c0_3, %c0_4], %2 {strides = array<i32>} : memref<96x36xbf16, #tpu.memory_space<vmem>>, vector<96x4xbf16>,
    %c0_5 = arith.constant 0 : index
    %c0_6 = arith.constant 0 : index
    %c1 = arith.constant 1 : index
    %c0_7 = arith.constant 0 : index
    %4 = vector.load %arg2[%c0_5, %c0_6, %c1, %c0_7] : memref<1x8x18x4xbf16, #tpu.memory_space<vmem>>, vector<1x6x16x4xbf16>
    %5 = vector.shape_cast %4 : vector<1x6x16x4xbf16> to vector<6x16x4xbf16>
    %6 = vector.shape_cast %5 : vector<6x16x4xbf16> to vector<96x4xbf16>
    %c0_8 = arith.constant 0 : index
    %c4 = arith.constant 4 : index
    %7 = vector.load %arg11[%c0_8, %c4] : memref<96x36xbf16, #tpu.memory_space<vmem>>, vector<96x4xbf16>
    tpu.vector_store %arg11[%c0_8, %c4], %6 {strides = array<i32>} : memref<96x36xbf16, #tpu.memory_space<vmem>>, vector<96x4xbf16>,
    %c0_9 = arith.constant 0 : index
    %c0_10 = arith.constant 0 : index
    %c2 = arith.constant 2 : index
    %c0_11 = arith.constant 0 : index
    %8 = vector.load %arg2[%c0_9, %c0_10, %c2, %c0_11] : memref<1x8x18x4xbf16, #tpu.memory_space<vmem>>, vector<1x6x16x4xbf16>
    %9 = vector.shape_cast %8 : vector<1x6x16x4xbf16> to vector<6x16x4xbf16>
    %10 = vector.shape_cast %9 : vector<6x16x4xbf16> to vector<96x4xbf16>
    %c0_12 = arith.constant 0 : index
    %c8 = arith.constant 8 : index
    %11 = vector.load %arg11[%c0_12, %c8] : memref<96x36xbf16, #tpu.memory_space<vmem>>, vector<96x4xbf16>
    tpu.vector_store %arg11[%c0_12, %c8], %10 {strides = array<i32>} : memref<96x36xbf16, #tpu.memory_space<vmem>>, vector<96x4xbf16>,
    %c0_13 = arith.constant 0 : index
    %c1_14 = arith.constant 1 : index
    %c0_15 = arith.constant 0 : index
    %c0_16 = arith.constant 0 : index
    %12 = vector.load %arg2[%c0_13, %c1_14, %c0_15, %c0_16] : memref<1x8x18x4xbf16, #tpu.memory_space<vmem>>, vector<1x6x16x4xbf16>
    %13 = vector.shape_cast %12 : vector<1x6x16x4xbf16> to vector<6x16x4xbf16>
    %14 = vector.shape_cast %13 : vector<6x16x4xbf16> to vector<96x4xbf16>
    %c0_17 = arith.constant 0 : index
    %c12 = arith.constant 12 : index
    %15 = vector.load %arg11[%c0_17, %c12] : memref<96x36xbf16, #tpu.memory_space<vmem>>, vector<96x4xbf16>
    tpu.vector_store %arg11[%c0_17, %c12], %14 {strides = array<i32>} : memref<96x36xbf16, #tpu.memory_space<vmem>>, vector<96x4xbf16>,
    %c0_18 = arith.constant 0 : index
    %c1_19 = arith.constant 1 : index
    %c1_20 = arith.constant 1 : index
    %c0_21 = arith.constant 0 : index
    %16 = vector.load %arg2[%c0_18, %c1_19, %c1_20, %c0_21] : memref<1x8x18x4xbf16, #tpu.memory_space<vmem>>, vector<1x6x16x4xbf16>
    %17 = vector.shape_cast %16 : vector<1x6x16x4xbf16> to vector<6x16x4xbf16>
    %18 = vector.shape_cast %17 : vector<6x16x4xbf16> to vector<96x4xbf16>
    %c0_22 = arith.constant 0 : index
    %c16 = arith.constant 16 : index
    %19 = vector.load %arg11[%c0_22, %c16] : memref<96x36xbf16, #tpu.memory_space<vmem>>, vector<96x4xbf16>
    tpu.vector_store %arg11[%c0_22, %c16], %18 {strides = array<i32>} : memref<96x36xbf16, #tpu.memory_space<vmem>>, vector<96x4xbf16>,
    %c0_23 = arith.constant 0 : index
    %c1_24 = arith.constant 1 : index
    %c2_25 = arith.constant 2 : index
    %c0_26 = arith.constant 0 : index
    %20 = vector.load %arg2[%c0_23, %c1_24, %c2_25, %c0_26] : memref<1x8x18x4xbf16, #tpu.memory_space<vmem>>, vector<1x6x16x4xbf16>
    %21 = vector.shape_cast %20 : vector<1x6x16x4xbf16> to vector<6x16x4xbf16>
    %22 = vector.shape_cast %21 : vector<6x16x4xbf16> to vector<96x4xbf16>
    %c0_27 = arith.constant 0 : index
    %c20 = arith.constant 20 : index
    %23 = vector.load %arg11[%c0_27, %c20] : memref<96x36xbf16, #tpu.memory_space<vmem>>, vector<96x4xbf16>
    tpu.vector_store %arg11[%c0_27, %c20], %22 {strides = array<i32>} : memref<96x36xbf16, #tpu.memory_space<vmem>>, vector<96x4xbf16>,
    %c0_28 = arith.constant 0 : index
    %c2_29 = arith.constant 2 : index
    %c0_30 = arith.constant 0 : index
    %c0_31 = arith.constant 0 : index
    %24 = vector.load %arg2[%c0_28, %c2_29, %c0_30, %c0_31] : memref<1x8x18x4xbf16, #tpu.memory_space<vmem>>, vector<1x6x16x4xbf16>
    %25 = vector.shape_cast %24 : vector<1x6x16x4xbf16> to vector<6x16x4xbf16>
    %26 = vector.shape_cast %25 : vector<6x16x4xbf16> to vector<96x4xbf16>
    %c0_32 = arith.constant 0 : index
    %c24 = arith.constant 24 : index
    %27 = vector.load %arg11[%c0_32, %c24] : memref<96x36xbf16, #tpu.memory_space<vmem>>, vector<96x4xbf16>
    tpu.vector_store %arg11[%c0_32, %c24], %26 {strides = array<i32>} : memref<96x36xbf16, #tpu.memory_space<vmem>>, vector<96x4xbf16>,
    %c0_33 = arith.constant 0 : index
    %c2_34 = arith.constant 2 : index
    %c1_35 = arith.constant 1 : index
    %c0_36 = arith.constant 0 : index
    %28 = vector.load %arg2[%c0_33, %c2_34, %c1_35, %c0_36] : memref<1x8x18x4xbf16, #tpu.memory_space<vmem>>, vector<1x6x16x4xbf16>
    %29 = vector.shape_cast %28 : vector<1x6x16x4xbf16> to vector<6x16x4xbf16>
    %30 = vector.shape_cast %29 : vector<6x16x4xbf16> to vector<96x4xbf16>
    %c0_37 = arith.constant 0 : index
    %c28 = arith.constant 28 : index
    %31 = vector.load %arg11[%c0_37, %c28] : memref<96x36xbf16, #tpu.memory_space<vmem>>, vector<96x4xbf16>
    tpu.vector_store %arg11[%c0_37, %c28], %30 {strides = array<i32>} : memref<96x36xbf16, #tpu.memory_space<vmem>>, vector<96x4xbf16>,
    %c0_38 = arith.constant 0 : index
    %c2_39 = arith.constant 2 : index
    %c2_40 = arith.constant 2 : index
    %c0_41 = arith.constant 0 : index
    %32 = vector.load %arg2[%c0_38, %c2_39, %c2_40, %c0_41] : memref<1x8x18x4xbf16, #tpu.memory_space<vmem>>, vector<1x6x16x4xbf16>
    %33 = vector.shape_cast %32 : vector<1x6x16x4xbf16> to vector<6x16x4xbf16>
    %34 = vector.shape_cast %33 : vector<6x16x4xbf16> to vector<96x4xbf16>
    %c0_42 = arith.constant 0 : index
    %c32 = arith.constant 32 : index
    %35 = vector.load %arg11[%c0_42, %c32] : memref<96x36xbf16, #tpu.memory_space<vmem>>, vector<96x4xbf16>
    tpu.vector_store %arg11[%c0_42, %c32], %34 {strides = array<i32>} : memref<96x36xbf16, #tpu.memory_space<vmem>>, vector<96x4xbf16>,
    %c0_43 = arith.constant 0 : index
    %c0_44 = arith.constant 0 : index
    %36 = vector.load %arg11[%c0_43, %c0_44] : memref<96x36xbf16, #tpu.memory_space<vmem>>, vector<96x36xbf16>
    %c0_45 = arith.constant 0 : index
    %c0_46 = arith.constant 0 : index
    %37 = vector.load %arg3[%c0_45, %c0_46] : memref<36x8xbf16, #tpu.memory_space<vmem>>, vector<36x8xbf16>
    %cst = arith.constant dense<0.000000e+00> : vector<96x8xf32>
    %38 = tpu.matmul %36, %37, %cst {dimension_numbers = #tpu.dot_dimension_numbers<[1], [0], [0], [1], [0, 0, 1, 1], [], []>} : vector<96x36xbf16>, vector<36x8xbf16>, vector<96x8xf32> -> vector<96x8xf32>
    %c0_47 = arith.constant 0 : index
    %c0_48 = arith.constant 0 : index
    %39 = vector.load %arg4[%c0_47, %c0_48] : memref<1x8xf32, #tpu.memory_space<vmem>>, vector<1x8xf32>
    %40 = vector.broadcast %39 : vector<1x8xf32> to vector<96x8xf32>
    %41 = arith.mulf %38, %40 : vector<96x8xf32>
    %c0_49 = arith.constant 0 : index
    %c0_50 = arith.constant 0 : index
    %42 = vector.load %arg5[%c0_49, %c0_50] : memref<1x8xf32, #tpu.memory_space<vmem>>, vector<1x8xf32>
    %43 = vector.broadcast %42 : vector<1x8xf32> to vector<96x8xf32>
    %44 = arith.addf %41, %43 : vector<96x8xf32>
    %cst_51 = arith.constant 0.000000e+00 : f32
    %45 = vector.broadcast %cst_51 : f32 to vector<96x8xf32>
    %46 = arith.maximumf %44, %45 : vector<96x8xf32>
    %cst_52 = arith.constant 0.000000e+00 : bf16
    %47 = vector.broadcast %cst_52 : bf16 to vector<6x8x8xbf16>
    %c0_53 = arith.constant 0 : index
    %c0_54 = arith.constant 0 : index
    %c0_55 = arith.constant 0 : index
    %48 = vector.load %arg12[%c0_53, %c0_54, %c0_55] : memref<6x32x8xbf16, #tpu.memory_space<vmem>>, vector<6x8x8xbf16>
    tpu.vector_store %arg12[%c0_53, %c0_54, %c0_55], %47 {strides = array<i32>} : memref<6x32x8xbf16, #tpu.memory_space<vmem>>, vector<6x8x8xbf16>,
    %cst_56 = arith.constant 0.000000e+00 : bf16
    %49 = vector.broadcast %cst_56 : bf16 to vector<6x8x8xbf16>
    %c0_57 = arith.constant 0 : index
    %c24_58 = arith.constant 24 : index
    %c0_59 = arith.constant 0 : index
    %50 = vector.load %arg12[%c0_57, %c24_58, %c0_59] : memref<6x32x8xbf16, #tpu.memory_space<vmem>>, vector<6x8x8xbf16>
    tpu.vector_store %arg12[%c0_57, %c24_58, %c0_59], %49 {strides = array<i32>} : memref<6x32x8xbf16, #tpu.memory_space<vmem>>, vector<6x8x8xbf16>,
    %51 = arith.truncf %46 : vector<96x8xf32> to vector<96x8xbf16>
    %52 = vector.shape_cast %51 : vector<96x8xbf16> to vector<6x16x8xbf16>
    %c0_60 = arith.constant 0 : index
    %c8_61 = arith.constant 8 : index
    %c0_62 = arith.constant 0 : index
    %53 = vector.load %arg12[%c0_60, %c8_61, %c0_62] : memref<6x32x8xbf16, #tpu.memory_space<vmem>>, vector<6x16x8xbf16>
    tpu.vector_store %arg12[%c0_60, %c8_61, %c0_62], %52 {strides = array<i32>} : memref<6x32x8xbf16, #tpu.memory_space<vmem>>, vector<6x16x8xbf16>,
    %c0_i32 = arith.constant 0 : i32
    %54 = arith.cmpi eq, %arg1, %c0_i32 : i32
    %55 = arith.extui %54 : i1 to i32
    %c0_i32_63 = arith.constant 0 : i32
    %56 = arith.cmpi ne, %55, %c0_i32_63 : i32
    scf.if %56 {
      %cst_211 = arith.constant 0.000000e+00 : bf16
      %184 = vector.broadcast %cst_211 : bf16 to vector<1x32x8xbf16>
      %c0_212 = arith.constant 0 : index
      %c0_213 = arith.constant 0 : index
      %c0_214 = arith.constant 0 : index
      %185 = vector.load %arg12[%c0_212, %c0_213, %c0_214] : memref<6x32x8xbf16, #tpu.memory_space<vmem>>, vector<1x32x8xbf16>
      tpu.vector_store %arg12[%c0_212, %c0_213, %c0_214], %184 {strides = array<i32>} : memref<6x32x8xbf16, #tpu.memory_space<vmem>>, vector<1x32x8xbf16>,
    } else {
    }
    %c3_i32 = arith.constant 3 : i32
    %57 = arith.cmpi eq, %arg1, %c3_i32 : i32
    %58 = arith.extui %57 : i1 to i32
    %c0_i32_64 = arith.constant 0 : i32
    %59 = arith.cmpi ne, %58, %c0_i32_64 : i32
    scf.if %59 {
      %cst_211 = arith.constant 0.000000e+00 : bf16
      %184 = vector.broadcast %cst_211 : bf16 to vector<1x32x8xbf16>
      %c5 = arith.constant 5 : index
      %c0_212 = arith.constant 0 : index
      %c0_213 = arith.constant 0 : index
      %185 = vector.load %arg12[%c5, %c0_212, %c0_213] : memref<6x32x8xbf16, #tpu.memory_space<vmem>>, vector<1x32x8xbf16>
      tpu.vector_store %arg12[%c5, %c0_212, %c0_213], %184 {strides = array<i32>} : memref<6x32x8xbf16, #tpu.memory_space<vmem>>, vector<1x32x8xbf16>,
    } else {
    }
    %c0_65 = arith.constant 0 : index
    %c7 = arith.constant 7 : index
    %c0_66 = arith.constant 0 : index
    %60 = vector.load %arg12[%c0_65, %c7, %c0_66] : memref<6x32x8xbf16, #tpu.memory_space<vmem>>, vector<4x16x8xbf16>
    %61 = vector.shape_cast %60 : vector<4x16x8xbf16> to vector<64x8xbf16>
    %c0_67 = arith.constant 0 : index
    %c0_68 = arith.constant 0 : index
    %62 = vector.load %arg6[%c0_67, %c0_68] : memref<72x8xbf16, #tpu.memory_space<vmem>>, vector<8x8xbf16>
    %cst_69 = arith.constant dense<0.000000e+00> : vector<64x8xf32>
    %63 = tpu.matmul %61, %62, %cst_69 {dimension_numbers = #tpu.dot_dimension_numbers<[1], [0], [0], [1], [0, 0, 1, 1], [], []>} : vector<64x8xbf16>, vector<8x8xbf16>, vector<64x8xf32> -> vector<64x8xf32>
    %64 = vector.shape_cast %63 : vector<64x8xf32> to vector<4x16x8xf32>
    %c0_70 = arith.constant 0 : index
    %c0_71 = arith.constant 0 : index
    %c0_72 = arith.constant 0 : index
    %65 = vector.load %arg13[%c0_70, %c0_71, %c0_72] : memref<4x16x8xf32, #tpu.memory_space<vmem>>, vector<4x16x8xf32>
    tpu.vector_store %arg13[%c0_70, %c0_71, %c0_72], %64 {strides = array<i32>} : memref<4x16x8xf32, #tpu.memory_space<vmem>>, vector<4x16x8xf32>,
    %c0_73 = arith.constant 0 : index
    %c8_74 = arith.constant 8 : index
    %c0_75 = arith.constant 0 : index
    %66 = vector.load %arg12[%c0_73, %c8_74, %c0_75] : memref<6x32x8xbf16, #tpu.memory_space<vmem>>, vector<4x16x8xbf16>
    %67 = vector.shape_cast %66 : vector<4x16x8xbf16> to vector<64x8xbf16>
    %c8_76 = arith.constant 8 : index
    %c0_77 = arith.constant 0 : index
    %68 = vector.load %arg6[%c8_76, %c0_77] : memref<72x8xbf16, #tpu.memory_space<vmem>>, vector<8x8xbf16>
    %cst_78 = arith.constant dense<0.000000e+00> : vector<64x8xf32>
    %69 = tpu.matmul %67, %68, %cst_78 {dimension_numbers = #tpu.dot_dimension_numbers<[1], [0], [0], [1], [0, 0, 1, 1], [], []>} : vector<64x8xbf16>, vector<8x8xbf16>, vector<64x8xf32> -> vector<64x8xf32>
    %70 = vector.shape_cast %69 : vector<64x8xf32> to vector<4x16x8xf32>
    %c0_79 = arith.constant 0 : index
    %c0_80 = arith.constant 0 : index
    %c0_81 = arith.constant 0 : index
    %71 = vector.load %arg13[%c0_79, %c0_80, %c0_81] : memref<4x16x8xf32, #tpu.memory_space<vmem>>, vector<4x16x8xf32>
    %72 = arith.addf %71, %70 : vector<4x16x8xf32>
    %c0_82 = arith.constant 0 : index
    %c0_83 = arith.constant 0 : index
    %c0_84 = arith.constant 0 : index
    %73 = vector.load %arg13[%c0_82, %c0_83, %c0_84] : memref<4x16x8xf32, #tpu.memory_space<vmem>>, vector<4x16x8xf32>
    tpu.vector_store %arg13[%c0_82, %c0_83, %c0_84], %72 {strides = array<i32>} : memref<4x16x8xf32, #tpu.memory_space<vmem>>, vector<4x16x8xf32>,
    %c0_85 = arith.constant 0 : index
    %c9 = arith.constant 9 : index
    %c0_86 = arith.constant 0 : index
    %74 = vector.load %arg12[%c0_85, %c9, %c0_86] : memref<6x32x8xbf16, #tpu.memory_space<vmem>>, vector<4x16x8xbf16>
    %75 = vector.shape_cast %74 : vector<4x16x8xbf16> to vector<64x8xbf16>
    %c16_87 = arith.constant 16 : index
    %c0_88 = arith.constant 0 : index
    %76 = vector.load %arg6[%c16_87, %c0_88] : memref<72x8xbf16, #tpu.memory_space<vmem>>, vector<8x8xbf16>
    %cst_89 = arith.constant dense<0.000000e+00> : vector<64x8xf32>
    %77 = tpu.matmul %75, %76, %cst_89 {dimension_numbers = #tpu.dot_dimension_numbers<[1], [0], [0], [1], [0, 0, 1, 1], [], []>} : vector<64x8xbf16>, vector<8x8xbf16>, vector<64x8xf32> -> vector<64x8xf32>
    %78 = vector.shape_cast %77 : vector<64x8xf32> to vector<4x16x8xf32>
    %c0_90 = arith.constant 0 : index
    %c0_91 = arith.constant 0 : index
    %c0_92 = arith.constant 0 : index
    %79 = vector.load %arg13[%c0_90, %c0_91, %c0_92] : memref<4x16x8xf32, #tpu.memory_space<vmem>>, vector<4x16x8xf32>
    %80 = arith.addf %79, %78 : vector<4x16x8xf32>
    %c0_93 = arith.constant 0 : index
    %c0_94 = arith.constant 0 : index
    %c0_95 = arith.constant 0 : index
    %81 = vector.load %arg13[%c0_93, %c0_94, %c0_95] : memref<4x16x8xf32, #tpu.memory_space<vmem>>, vector<4x16x8xf32>
    tpu.vector_store %arg13[%c0_93, %c0_94, %c0_95], %80 {strides = array<i32>} : memref<4x16x8xf32, #tpu.memory_space<vmem>>, vector<4x16x8xf32>,
    %c1_96 = arith.constant 1 : index
    %c7_97 = arith.constant 7 : index
    %c0_98 = arith.constant 0 : index
    %82 = vector.load %arg12[%c1_96, %c7_97, %c0_98] : memref<6x32x8xbf16, #tpu.memory_space<vmem>>, vector<4x16x8xbf16>
    %83 = vector.shape_cast %82 : vector<4x16x8xbf16> to vector<64x8xbf16>
    %c24_99 = arith.constant 24 : index
    %c0_100 = arith.constant 0 : index
    %84 = vector.load %arg6[%c24_99, %c0_100] : memref<72x8xbf16, #tpu.memory_space<vmem>>, vector<8x8xbf16>
    %cst_101 = arith.constant dense<0.000000e+00> : vector<64x8xf32>
    %85 = tpu.matmul %83, %84, %cst_101 {dimension_numbers = #tpu.dot_dimension_numbers<[1], [0], [0], [1], [0, 0, 1, 1], [], []>} : vector<64x8xbf16>, vector<8x8xbf16>, vector<64x8xf32> -> vector<64x8xf32>
    %86 = vector.shape_cast %85 : vector<64x8xf32> to vector<4x16x8xf32>
    %c0_102 = arith.constant 0 : index
    %c0_103 = arith.constant 0 : index
    %c0_104 = arith.constant 0 : index
    %87 = vector.load %arg13[%c0_102, %c0_103, %c0_104] : memref<4x16x8xf32, #tpu.memory_space<vmem>>, vector<4x16x8xf32>
    %88 = arith.addf %87, %86 : vector<4x16x8xf32>
    %c0_105 = arith.constant 0 : index
    %c0_106 = arith.constant 0 : index
    %c0_107 = arith.constant 0 : index
    %89 = vector.load %arg13[%c0_105, %c0_106, %c0_107] : memref<4x16x8xf32, #tpu.memory_space<vmem>>, vector<4x16x8xf32>
    tpu.vector_store %arg13[%c0_105, %c0_106, %c0_107], %88 {strides = array<i32>} : memref<4x16x8xf32, #tpu.memory_space<vmem>>, vector<4x16x8xf32>,
    %c1_108 = arith.constant 1 : index
    %c8_109 = arith.constant 8 : index
    %c0_110 = arith.constant 0 : index
    %90 = vector.load %arg12[%c1_108, %c8_109, %c0_110] : memref<6x32x8xbf16, #tpu.memory_space<vmem>>, vector<4x16x8xbf16>
    %91 = vector.shape_cast %90 : vector<4x16x8xbf16> to vector<64x8xbf16>
    %c32_111 = arith.constant 32 : index
    %c0_112 = arith.constant 0 : index
    %92 = vector.load %arg6[%c32_111, %c0_112] : memref<72x8xbf16, #tpu.memory_space<vmem>>, vector<8x8xbf16>
    %cst_113 = arith.constant dense<0.000000e+00> : vector<64x8xf32>
    %93 = tpu.matmul %91, %92, %cst_113 {dimension_numbers = #tpu.dot_dimension_numbers<[1], [0], [0], [1], [0, 0, 1, 1], [], []>} : vector<64x8xbf16>, vector<8x8xbf16>, vector<64x8xf32> -> vector<64x8xf32>
    %94 = vector.shape_cast %93 : vector<64x8xf32> to vector<4x16x8xf32>
    %c0_114 = arith.constant 0 : index
    %c0_115 = arith.constant 0 : index
    %c0_116 = arith.constant 0 : index
    %95 = vector.load %arg13[%c0_114, %c0_115, %c0_116] : memref<4x16x8xf32, #tpu.memory_space<vmem>>, vector<4x16x8xf32>
    %96 = arith.addf %95, %94 : vector<4x16x8xf32>
    %c0_117 = arith.constant 0 : index
    %c0_118 = arith.constant 0 : index
    %c0_119 = arith.constant 0 : index
    %97 = vector.load %arg13[%c0_117, %c0_118, %c0_119] : memref<4x16x8xf32, #tpu.memory_space<vmem>>, vector<4x16x8xf32>
    tpu.vector_store %arg13[%c0_117, %c0_118, %c0_119], %96 {strides = array<i32>} : memref<4x16x8xf32, #tpu.memory_space<vmem>>, vector<4x16x8xf32>,
    %c1_120 = arith.constant 1 : index
    %c9_121 = arith.constant 9 : index
    %c0_122 = arith.constant 0 : index
    %98 = vector.load %arg12[%c1_120, %c9_121, %c0_122] : memref<6x32x8xbf16, #tpu.memory_space<vmem>>, vector<4x16x8xbf16>
    %99 = vector.shape_cast %98 : vector<4x16x8xbf16> to vector<64x8xbf16>
    %c40 = arith.constant 40 : index
    %c0_123 = arith.constant 0 : index
    %100 = vector.load %arg6[%c40, %c0_123] : memref<72x8xbf16, #tpu.memory_space<vmem>>, vector<8x8xbf16>
    %cst_124 = arith.constant dense<0.000000e+00> : vector<64x8xf32>
    %101 = tpu.matmul %99, %100, %cst_124 {dimension_numbers = #tpu.dot_dimension_numbers<[1], [0], [0], [1], [0, 0, 1, 1], [], []>} : vector<64x8xbf16>, vector<8x8xbf16>, vector<64x8xf32> -> vector<64x8xf32>
    %102 = vector.shape_cast %101 : vector<64x8xf32> to vector<4x16x8xf32>
    %c0_125 = arith.constant 0 : index
    %c0_126 = arith.constant 0 : index
    %c0_127 = arith.constant 0 : index
    %103 = vector.load %arg13[%c0_125, %c0_126, %c0_127] : memref<4x16x8xf32, #tpu.memory_space<vmem>>, vector<4x16x8xf32>
    %104 = arith.addf %103, %102 : vector<4x16x8xf32>
    %c0_128 = arith.constant 0 : index
    %c0_129 = arith.constant 0 : index
    %c0_130 = arith.constant 0 : index
    %105 = vector.load %arg13[%c0_128, %c0_129, %c0_130] : memref<4x16x8xf32, #tpu.memory_space<vmem>>, vector<4x16x8xf32>
    tpu.vector_store %arg13[%c0_128, %c0_129, %c0_130], %104 {strides = array<i32>} : memref<4x16x8xf32, #tpu.memory_space<vmem>>, vector<4x16x8xf32>,
    %c2_131 = arith.constant 2 : index
    %c7_132 = arith.constant 7 : index
    %c0_133 = arith.constant 0 : index
    %106 = vector.load %arg12[%c2_131, %c7_132, %c0_133] : memref<6x32x8xbf16, #tpu.memory_space<vmem>>, vector<4x16x8xbf16>
    %107 = vector.shape_cast %106 : vector<4x16x8xbf16> to vector<64x8xbf16>
    %c48 = arith.constant 48 : index
    %c0_134 = arith.constant 0 : index
    %108 = vector.load %arg6[%c48, %c0_134] : memref<72x8xbf16, #tpu.memory_space<vmem>>, vector<8x8xbf16>
    %cst_135 = arith.constant dense<0.000000e+00> : vector<64x8xf32>
    %109 = tpu.matmul %107, %108, %cst_135 {dimension_numbers = #tpu.dot_dimension_numbers<[1], [0], [0], [1], [0, 0, 1, 1], [], []>} : vector<64x8xbf16>, vector<8x8xbf16>, vector<64x8xf32> -> vector<64x8xf32>
    %110 = vector.shape_cast %109 : vector<64x8xf32> to vector<4x16x8xf32>
    %c0_136 = arith.constant 0 : index
    %c0_137 = arith.constant 0 : index
    %c0_138 = arith.constant 0 : index
    %111 = vector.load %arg13[%c0_136, %c0_137, %c0_138] : memref<4x16x8xf32, #tpu.memory_space<vmem>>, vector<4x16x8xf32>
    %112 = arith.addf %111, %110 : vector<4x16x8xf32>
    %c0_139 = arith.constant 0 : index
    %c0_140 = arith.constant 0 : index
    %c0_141 = arith.constant 0 : index
    %113 = vector.load %arg13[%c0_139, %c0_140, %c0_141] : memref<4x16x8xf32, #tpu.memory_space<vmem>>, vector<4x16x8xf32>
    tpu.vector_store %arg13[%c0_139, %c0_140, %c0_141], %112 {strides = array<i32>} : memref<4x16x8xf32, #tpu.memory_space<vmem>>, vector<4x16x8xf32>,
    %c2_142 = arith.constant 2 : index
    %c8_143 = arith.constant 8 : index
    %c0_144 = arith.constant 0 : index
    %114 = vector.load %arg12[%c2_142, %c8_143, %c0_144] : memref<6x32x8xbf16, #tpu.memory_space<vmem>>, vector<4x16x8xbf16>
    %115 = vector.shape_cast %114 : vector<4x16x8xbf16> to vector<64x8xbf16>
    %c56 = arith.constant 56 : index
    %c0_145 = arith.constant 0 : index
    %116 = vector.load %arg6[%c56, %c0_145] : memref<72x8xbf16, #tpu.memory_space<vmem>>, vector<8x8xbf16>
    %cst_146 = arith.constant dense<0.000000e+00> : vector<64x8xf32>
    %117 = tpu.matmul %115, %116, %cst_146 {dimension_numbers = #tpu.dot_dimension_numbers<[1], [0], [0], [1], [0, 0, 1, 1], [], []>} : vector<64x8xbf16>, vector<8x8xbf16>, vector<64x8xf32> -> vector<64x8xf32>
    %118 = vector.shape_cast %117 : vector<64x8xf32> to vector<4x16x8xf32>
    %c0_147 = arith.constant 0 : index
    %c0_148 = arith.constant 0 : index
    %c0_149 = arith.constant 0 : index
    %119 = vector.load %arg13[%c0_147, %c0_148, %c0_149] : memref<4x16x8xf32, #tpu.memory_space<vmem>>, vector<4x16x8xf32>
    %120 = arith.addf %119, %118 : vector<4x16x8xf32>
    %c0_150 = arith.constant 0 : index
    %c0_151 = arith.constant 0 : index
    %c0_152 = arith.constant 0 : index
    %121 = vector.load %arg13[%c0_150, %c0_151, %c0_152] : memref<4x16x8xf32, #tpu.memory_space<vmem>>, vector<4x16x8xf32>
    tpu.vector_store %arg13[%c0_150, %c0_151, %c0_152], %120 {strides = array<i32>} : memref<4x16x8xf32, #tpu.memory_space<vmem>>, vector<4x16x8xf32>,
    %c2_153 = arith.constant 2 : index
    %c9_154 = arith.constant 9 : index
    %c0_155 = arith.constant 0 : index
    %122 = vector.load %arg12[%c2_153, %c9_154, %c0_155] : memref<6x32x8xbf16, #tpu.memory_space<vmem>>, vector<4x16x8xbf16>
    %123 = vector.shape_cast %122 : vector<4x16x8xbf16> to vector<64x8xbf16>
    %c64 = arith.constant 64 : index
    %c0_156 = arith.constant 0 : index
    %124 = vector.load %arg6[%c64, %c0_156] : memref<72x8xbf16, #tpu.memory_space<vmem>>, vector<8x8xbf16>
    %cst_157 = arith.constant dense<0.000000e+00> : vector<64x8xf32>
    %125 = tpu.matmul %123, %124, %cst_157 {dimension_numbers = #tpu.dot_dimension_numbers<[1], [0], [0], [1], [0, 0, 1, 1], [], []>} : vector<64x8xbf16>, vector<8x8xbf16>, vector<64x8xf32> -> vector<64x8xf32>
    %126 = vector.shape_cast %125 : vector<64x8xf32> to vector<4x16x8xf32>
    %c0_158 = arith.constant 0 : index
    %c0_159 = arith.constant 0 : index
    %c0_160 = arith.constant 0 : index
    %127 = vector.load %arg13[%c0_158, %c0_159, %c0_160] : memref<4x16x8xf32, #tpu.memory_space<vmem>>, vector<4x16x8xf32>
    %128 = arith.addf %127, %126 : vector<4x16x8xf32>
    %c0_161 = arith.constant 0 : index
    %c0_162 = arith.constant 0 : index
    %c0_163 = arith.constant 0 : index
    %129 = vector.load %arg13[%c0_161, %c0_162, %c0_163] : memref<4x16x8xf32, #tpu.memory_space<vmem>>, vector<4x16x8xf32>
    tpu.vector_store %arg13[%c0_161, %c0_162, %c0_163], %128 {strides = array<i32>} : memref<4x16x8xf32, #tpu.memory_space<vmem>>, vector<4x16x8xf32>,
    %c0_164 = arith.constant 0 : index
    %c0_165 = arith.constant 0 : index
    %c0_166 = arith.constant 0 : index
    %130 = vector.load %arg13[%c0_164, %c0_165, %c0_166] : memref<4x16x8xf32, #tpu.memory_space<vmem>>, vector<4x16x8xf32>
    %c0_167 = arith.constant 0 : index
    %c0_168 = arith.constant 0 : index
    %131 = vector.load %arg7[%c0_167, %c0_168] : memref<1x8xf32, #tpu.memory_space<vmem>>, vector<1x8xf32>
    %132 = vector.shape_cast %131 : vector<1x8xf32> to vector<1x1x8xf32>
    %133 = vector.broadcast %132 : vector<1x1x8xf32> to vector<4x16x8xf32>
    %134 = arith.mulf %130, %133 : vector<4x16x8xf32>
    %c0_169 = arith.constant 0 : index
    %c0_170 = arith.constant 0 : index
    %135 = vector.load %arg8[%c0_169, %c0_170] : memref<1x8xf32, #tpu.memory_space<vmem>>, vector<1x8xf32>
    %136 = vector.shape_cast %135 : vector<1x8xf32> to vector<1x1x8xf32>
    %137 = vector.broadcast %136 : vector<1x1x8xf32> to vector<4x16x8xf32>
    %138 = arith.addf %134, %137 : vector<4x16x8xf32>
    %cst_171 = arith.constant 0.000000e+00 : f32
    %139 = vector.broadcast %cst_171 : f32 to vector<4x16x8xf32>
    %140 = arith.maximumf %138, %139 : vector<4x16x8xf32>
    %c0_172 = arith.constant 0 : index
    %c0_173 = arith.constant 0 : index
    %c0_174 = arith.constant 0 : index
    %141 = vector.load %arg13[%c0_172, %c0_173, %c0_174] : memref<4x16x8xf32, #tpu.memory_space<vmem>>, vector<4x16x8xf32>
    tpu.vector_store %arg13[%c0_172, %c0_173, %c0_174], %140 {strides = array<i32>} : memref<4x16x8xf32, #tpu.memory_space<vmem>>, vector<4x16x8xf32>,
    %c0_175 = arith.constant 0 : index
    %c0_176 = arith.constant 0 : index
    %c0_177 = arith.constant 0 : index
    %142 = tpu.strided_load %arg13[%c0_175, %c0_176, %c0_177] {strides = array<i32: 1, 2, 1>} : memref<4x16x8xf32, #tpu.memory_space<vmem>>, vector<4x8x8xf32>
    %c0_178 = arith.constant 0 : index
    %c1_179 = arith.constant 1 : index
    %c0_180 = arith.constant 0 : index
    %143 = tpu.strided_load %arg13[%c0_178, %c1_179, %c0_180] {strides = array<i32: 1, 2, 1>} : memref<4x16x8xf32, #tpu.memory_space<vmem>>, vector<4x8x8xf32>
    %144 = tpu.iota {dimensions = array<i32: 1>} : vector<4x8x8xi32>
    %145 = arith.cmpf ogt, %143, %142 : vector<4x8x8xf32>
    %146 = arith.select %145, %143, %142 : vector<4x8x8xi1>, vector<4x8x8xf32>
    %c0_181 = arith.constant 0 : index
    %c0_182 = arith.constant 0 : index
    %c0_183 = arith.constant 0 : index
    %147 = vector.load %arg14[%c0_181, %c0_182, %c0_183] : memref<4x8x8xf32, #tpu.memory_space<vmem>>, vector<4x8x8xf32>
    tpu.vector_store %arg14[%c0_181, %c0_182, %c0_183], %146 {strides = array<i32>} : memref<4x8x8xf32, #tpu.memory_space<vmem>>, vector<4x8x8xf32>,
    %c2_i32 = arith.constant 2 : i32
    %148 = vector.broadcast %c2_i32 : i32 to vector<4x8x8xi32>
    %149 = arith.muli %148, %144 : vector<4x8x8xi32>
    %c1_i32 = arith.constant 1 : i32
    %150 = vector.broadcast %c1_i32 : i32 to vector<4x8x8xi32>
    %151 = arith.addi %149, %150 : vector<4x8x8xi32>
    %c2_i32_184 = arith.constant 2 : i32
    %152 = vector.broadcast %c2_i32_184 : i32 to vector<4x8x8xi32>
    %153 = arith.muli %152, %144 : vector<4x8x8xi32>
    %154 = arith.select %145, %151, %153 : vector<4x8x8xi1>, vector<4x8x8xi32>
    %c0_185 = arith.constant 0 : index
    %c0_186 = arith.constant 0 : index
    %c0_187 = arith.constant 0 : index
    %155 = vector.load %arg15[%c0_185, %c0_186, %c0_187] : memref<4x8x8xi32, #tpu.memory_space<vmem>>, vector<4x8x8xi32>
    tpu.vector_store %arg15[%c0_185, %c0_186, %c0_187], %154 {strides = array<i32>} : memref<4x8x8xi32, #tpu.memory_space<vmem>>, vector<4x8x8xi32>,
    %c0_188 = arith.constant 0 : index
    %c0_189 = arith.constant 0 : index
    %c0_190 = arith.constant 0 : index
    %156 = tpu.strided_load %arg14[%c0_188, %c0_189, %c0_190] {strides = array<i32: 2, 1, 1>} : memref<4x8x8xf32, #tpu.memory_space<vmem>>, vector<2x8x8xf32>
    %c1_191 = arith.constant 1 : index
    %c0_192 = arith.constant 0 : index
    %c0_193 = arith.constant 0 : index
    %157 = tpu.strided_load %arg14[%c1_191, %c0_192, %c0_193] {strides = array<i32: 2, 1, 1>} : memref<4x8x8xf32, #tpu.memory_space<vmem>>, vector<2x8x8xf32>
    %c0_194 = arith.constant 0 : index
    %c0_195 = arith.constant 0 : index
    %c0_196 = arith.constant 0 : index
    %158 = tpu.strided_load %arg15[%c0_194, %c0_195, %c0_196] {strides = array<i32: 2, 1, 1>} : memref<4x8x8xi32, #tpu.memory_space<vmem>>, vector<2x8x8xi32>
    %c1_197 = arith.constant 1 : index
    %c0_198 = arith.constant 0 : index
    %c0_199 = arith.constant 0 : index
    %159 = tpu.strided_load %arg15[%c1_197, %c0_198, %c0_199] {strides = array<i32: 2, 1, 1>} : memref<4x8x8xi32, #tpu.memory_space<vmem>>, vector<2x8x8xi32>
    %160 = tpu.iota {dimensions = array<i32: 0>} : vector<2x8x8xi32>
    %161 = arith.cmpf ogt, %157, %156 : vector<2x8x8xf32>
    %162 = arith.select %161, %157, %156 : vector<2x8x8xi1>, vector<2x8x8xf32>
    %163 = arith.truncf %162 : vector<2x8x8xf32> to vector<2x8x8xbf16>
    %c0_200 = arith.constant 0 : index
    %c0_201 = arith.constant 0 : index
    %c0_202 = arith.constant 0 : index
    %c0_203 = arith.constant 0 : index
    %164 = vector.load %arg9[%c0_200, %c0_201, %c0_202, %c0_203] : memref<1x2x8x8xbf16, #tpu.memory_space<vmem>>, vector<1x2x8x8xbf16>
    %165 = vector.shape_cast %164 : vector<1x2x8x8xbf16> to vector<2x8x8xbf16>
    %166 = vector.shape_cast %163 : vector<2x8x8xbf16> to vector<1x2x8x8xbf16>
    tpu.vector_store %arg9[%c0_200, %c0_201, %c0_202, %c0_203], %166 {strides = array<i32>} : memref<1x2x8x8xbf16, #tpu.memory_space<vmem>>, vector<1x2x8x8xbf16>,
    %c2_i32_204 = arith.constant 2 : i32
    %167 = vector.broadcast %c2_i32_204 : i32 to vector<2x8x8xi32>
    %168 = arith.muli %167, %160 : vector<2x8x8xi32>
    %c1_i32_205 = arith.constant 1 : i32
    %169 = vector.broadcast %c1_i32_205 : i32 to vector<2x8x8xi32>
    %170 = arith.addi %168, %169 : vector<2x8x8xi32>
    %c2_i32_206 = arith.constant 2 : i32
    %171 = vector.broadcast %c2_i32_206 : i32 to vector<2x8x8xi32>
    %172 = arith.muli %171, %160 : vector<2x8x8xi32>
    %173 = arith.select %161, %170, %172 : vector<2x8x8xi1>, vector<2x8x8xi32>
    %c4_i32 = arith.constant 4 : i32
    %174 = arith.muli %arg1, %c4_i32 : i32
    %175 = vector.broadcast %174 : i32 to vector<2x8x8xi32>
    %176 = arith.addi %173, %175 : vector<2x8x8xi32>
    %177 = arith.select %161, %159, %158 : vector<2x8x8xi1>, vector<2x8x8xi32>
    %c16_i32 = arith.constant 16 : i32
    %178 = vector.broadcast %c16_i32 : i32 to vector<2x8x8xi32>
    %179 = arith.muli %176, %178 : vector<2x8x8xi32>
    %180 = arith.addi %179, %177 : vector<2x8x8xi32>
    %c0_207 = arith.constant 0 : index
    %c0_208 = arith.constant 0 : index
    %c0_209 = arith.constant 0 : index
    %c0_210 = arith.constant 0 : index
    %181 = vector.load %arg10[%c0_207, %c0_208, %c0_209, %c0_210] : memref<1x2x8x8xi32, #tpu.memory_space<vmem>>, vector<1x2x8x8xi32>
    %182 = vector.shape_cast %181 : vector<1x2x8x8xi32> to vector<2x8x8xi32>
    %183 = vector.shape_cast %180 : vector<2x8x8xi32> to vector<1x2x8x8xi32>
    tpu.vector_store %arg10[%c0_207, %c0_208, %c0_209, %c0_210], %183 {strides = array<i32>} : memref<1x2x8x8xi32, #tpu.memory_space<vmem>>, vector<1x2x8x8xi32>,
    return
  }
  func.func @transform_0(%arg0: i32, %arg1: i32) -> (i32, i32, i32, i32) {
    %c4_i32 = arith.constant 4 : i32
    %0 = arith.muli %arg0, %c4_i32 : i32
    %1 = arith.addi %0, %arg1 : i32
    %c0_i32 = arith.constant 0 : i32
    %c0_i32_0 = arith.constant 0 : i32
    %c0_i32_1 = arith.constant 0 : i32
    %c0_i32_2 = arith.constant 0 : i32
    return %1, %c0_i32, %c0_i32_0, %c0_i32_1 : i32, i32, i32, i32
  }
  func.func @transform_1(%arg0: i32, %arg1: i32) -> (i32, i32) {
    %c0_i32 = arith.constant 0 : i32
    %c0_i32_0 = arith.constant 0 : i32
    %c0_i32_1 = arith.constant 0 : i32
    return %c0_i32, %c0_i32_0 : i32, i32
  }
  func.func @transform_2(%arg0: i32, %arg1: i32) -> (i32, i32) {
    %c0_i32 = arith.constant 0 : i32
    %c0_i32_0 = arith.constant 0 : i32
    %c0_i32_1 = arith.constant 0 : i32
    return %c0_i32, %c0_i32_0 : i32, i32
  }
  func.func @transform_3(%arg0: i32, %arg1: i32) -> (i32, i32) {
    %c0_i32 = arith.constant 0 : i32
    %c0_i32_0 = arith.constant 0 : i32
    %c0_i32_1 = arith.constant 0 : i32
    return %c0_i32, %c0_i32_0 : i32, i32
  }
  func.func @transform_4(%arg0: i32, %arg1: i32) -> (i32, i32) {
    %c0_i32 = arith.constant 0 : i32
    %c0_i32_0 = arith.constant 0 : i32
    %c0_i32_1 = arith.constant 0 : i32
    return %c0_i32, %c0_i32_0 : i32, i32
  }
  func.func @transform_5(%arg0: i32, %arg1: i32) -> (i32, i32) {
    %c0_i32 = arith.constant 0 : i32
    %c0_i32_0 = arith.constant 0 : i32
    %c0_i32_1 = arith.constant 0 : i32
    return %c0_i32, %c0_i32_0 : i32, i32
  }
  func.func @transform_6(%arg0: i32, %arg1: i32) -> (i32, i32) {
    %c0_i32 = arith.constant 0 : i32
    %c0_i32_0 = arith.constant 0 : i32
    %c0_i32_1 = arith.constant 0 : i32
    return %c0_i32, %c0_i32_0 : i32, i32
  }
  func.func @transform_7(%arg0: i32, %arg1: i32) -> (i32, i32, i32, i32) {
    %c4_i32 = arith.constant 4 : i32
    %0 = arith.muli %arg0, %c4_i32 : i32
    %1 = arith.addi %0, %arg1 : i32
    %c0_i32 = arith.constant 0 : i32
    %c0_i32_0 = arith.constant 0 : i32
    %c0_i32_1 = arith.constant 0 : i32
    %c0_i32_2 = arith.constant 0 : i32
    return %1, %c0_i32, %c0_i32_0, %c0_i32_1 : i32, i32, i32, i32
  }
  func.func @transform_8(%arg0: i32, %arg1: i32) -> (i32, i32, i32, i32) {
    %c4_i32 = arith.constant 4 : i32
    %0 = arith.muli %arg0, %c4_i32 : i32
    %1 = arith.addi %0, %arg1 : i32
    %c0_i32 = arith.constant 0 : i32
    %c0_i32_0 = arith.constant 0 : i32
    %c0_i32_1 = arith.constant 0 : i32
    %c0_i32_2 = arith.constant 0 : i32
    return %1, %c0_i32, %c0_i32_0, %c0_i32_1 : i32, i32, i32, i32
  }
}

</mosaic_0001>

<bundles_post_ra>
// kernel: tpu_custom_call.1
= control target key start
LH: loop header
LB: loop body
LE: loop exit
PB: predicated region body
PF: predicated region fallthrough
CT: control target
= control target key end

     0   :  { %s5690_s0 = inlined_call_operand.vmem [shape: bf16[8,8,18,4], index: 0, kind: input, shape index: {}]   ;;  %s5691_s1 = inlined_call_operand.vmem [shape: bf16[36,8], index: 1, kind: input, shape index: {}]   ;;  %s5692_s2 = inlined_call_operand.vmem [shape: f32[1,8], index: 2, kind: input, shape index: {}]   ;;  %s5693_s3 = inlined_call_operand.vmem [shape: f32[1,8], index: 3, kind: input, shape index: {}]   ;;  %s5694_s4 = inlined_call_operand.vmem [shape: bf16[72,8], index: 4, kind: input, shape index: {}]   ;;  %s5695_s5 = inlined_call_operand.vmem [shape: f32[1,8], index: 5, kind: input, shape index: {}]   ;;  %s5696_s6 = inlined_call_operand.vmem [shape: f32[1,8], index: 6, kind: input, shape index: {}]   ;;  %s5697_s7 = inlined_call_operand.hbm [shape: bf16[8,2,8,8], index: 7, kind: output, shape index: {0}]   ;;  %s5698_s8 = inlined_call_operand.hbm [shape: s32[8,2,8,8], index: 8, kind: output, shape index: {1}]  }
   0x1   :  { %5708 = sst [smem:[#allocation14_spill]] %s5690_s0 }
   0x2   :  { %5709 = sst [smem:[#allocation15_spill]] %s5691_s1 }
   0x3   :  { %5710 = sst [smem:[#allocation16_spill]] %s5692_s2 }
   0x4   :  { %14 = vsyncpa [#allocation8], 0 }
   0x5   :  { %16 = vsyncpa [#allocation8 + $0x1], 0 }
   0x6   :  { %17 = vsyncpa [#allocation10], 0 }
   0x7   :  { %19 = vsyncpa [#allocation10 + $0x1], 0  ;;  %s4585_s27 = smov 0   ;;  %s4587_s28 = smov 0  }
   0x8   :  { %s4589_s29 = smov 0   ;;  %s4591_s30 = smov 0  }
   0x9   :  { %s4593_s9 = smov 0   ;;  %s4595_s10 = smov 0  }
   0xa   :  { %s4597_s11 = smov 0   ;;  %s4599_s12 = smov 0  }
   0xb LB: > { %s3842_s13 = sadd.s32 4294967295, %s4522_s12   ;;  %s34_s14 = sadd.s32 1, %s4514_s10  ;;  %s4522_s12 = sphi %s4599_s12, %s25_s12   ;;  %s4518_s11 = sphi %s4597_s11, %s5739_s11   ;;  %s4514_s10 = sphi %s4595_s10, %s5738_s10   ;;  %s4510_s9 = sphi %s4593_s9, %s5737_s9   ;;  %s4506_s30 = sphi %s4591_s30, %s5736_s30   ;;  %s4502_s29 = sphi %s4589_s29, %s5735_s29   ;;  %s4498_s28 = sphi %s4587_s28, %s5734_s28   ;;  %s4494_s27 = sphi %s4585_s27, %s5733_s27  }
   0xc   : > { %s37_s15 = sadd.s32 1, %s4518_s11  ;;  %p35_p0 = scmp.ge.s32.totalorder %s34_s14, 4 }
   0xd   : > { %s3846_s16 = sshll.u32 %s4518_s11, 2  ;;  %s3843_s17 = sadd.s32 4294967294, %s4522_s12  }
   0xe   : > { %s198_s18 = sadd.s32 %s4514_s10, %s3846_s16  ;;  %s5741_s14 = smov (%p35_p0, %s34_s14), 0 }
   0xf   : > { %s5743_s15 = smov (!%p35_p0, %s37_s15), %s4518_s11  ;;  %p214_p1 = scmp.ne.s32.totalorder %s4502_s29, %s4498_s28 }
  0x10   : > { %p215_p2 = scmp.eq.s32.totalorder %s3842_s13, 7  ;;  %p39_p3 = scmp.ge.s32.totalorder %s5743_s15, 2 }
  0x11   : > { %p220_p4 = scmp.ne.s32.totalorder %s4498_s28, %s4494_s27  ;;  %p221_p6 = scmp.eq.s32.totalorder %s3843_s17, 7 }
  0x12   : > { %p4638_p5 = por %p215_p2, %p214_p1  ;;  %s5745_s15 = smov (%p39_p3, %s5743_s15), 0 }
  0x13   : > { %5712 = sst [smem:[#allocation13_spill]] %s5745_s15  ;;  %p4644_p7 = por %p221_p6, %p220_p4 }
  0x14   : > { %p3852_p8 = scmp.ge.s32.totalorder %s4522_s12, 1  ;;  %s3847_s21 = sshll.u32 %s5745_s15, 2 }
  0x15   : > { %p299_p9 = scmp.lt.s32.totalorder %s4522_s12, 9  ;;  %s200_s22 = sadd.s32 %s3847_s21, %s5741_s14 }
  0x16   : > { %s204_s23 = sadd.s32 1, %s4502_s29  ;;  %s201_s24 = ssub.s32 %s198_s18, %s200_s22 }
  0x17   : > { %p300_p10 = pnand %p3852_p8, %p299_p9  ;;  %p202_p11 = scmp.eq.s32.totalorder %s201_s24, 0 }
  0x18   : > { %s3855_s26 = sshll.u32 (!%p300_p10), %s4510_s9, 2  ;;  %s5714_s0 = sld [smem:[#allocation14_spill]] (!%p300_p10) }
  0x19   : > { %s4654_s25 = scalar_select %p202_p11, %s4502_s29, %s204_s23  }
  0x1a   : > { %303 = sbr.rel (%p300_p10) target bundleno = 960 (0x3c0), region = 48  ;;  %s4658_s13 = sadd.s32 (!%p300_p10), %s4506_s30, %s3855_s26 }
  0x1b   : > { %p342_p12 = scmp.lt.s32.totalorder (!%p300_p10), %s4658_s13, 7  ;;  %s5702_s9 = smov (!%p300_p10), 12  }
  0x1c   : > { %s5704_s15 = smov (!%p300_p10), 8   ;;  %s5706_s22 = smov (!%p300_p10), 4  }
  0x1d   : > { %s4527_s23 = smov (!%p300_p10), 16   ;;  %s4528_s24 = smov (!%p300_p10), 20  }
  0x1e   : > { %s4529_s26 = smov (!%p300_p10), 24   ;;  %s4531_s21 = smov (!%p300_p10), 32  }
  0x1f   : > { %s343_s16 = scalar_select %p342_p12, %s4658_s13, 7  ;;  %vm629_vm0 = vcmask 1042432   ;;  %vm630_vm1 = vcmask 1046532   ;;  %vm397_vm2 = vsmask.f32 3328  ;;  %vm366_vm6 = vcmask 27648  }
  0x20   : > { %vm398_vm3 = vsmask.f32 7440  ;;  %vm4673_vm4 = vmor %vm629_vm0, %vm630_vm1  ;;  %s5719_s1 = sld [smem:[#allocation15_spill]]  ;;  %vm1628_vm7 = vcmask 1041408   ;;  %vm580_vm8 = vcmask 60448   ;;  %vm710_vm9 = vcmask 93248  }
  0x21   : > { %s4288_s17 = smul.u32 96, %s343_s16  ;;  %vm4700_vm5 = vmor %vm397_vm2, %vm398_vm3  ;;  %s5700_s16 = smov 28   ;;  %vm784_vm10 = vcmask 126048   ;;  %vm995_vm11 = vcmask 158848   ;;  %vm1122_vm12 = vcmask 191648   ;;  %vm1196_vm13 = vcmask 224448  }
  0x22   : > { %vm1407_vm14 = vcmask 257248   ;;  %vm1534_vm15 = vcmask 290048   ;;  %vm1609_vm0 = vcmask 293888   ;;  %vm1763_vm1 = vcmask 60416   ;;  %s5724_s2 = sld [smem:[#allocation16_spill]]  ;;  %p4000_p13 = scmp.ne.s32.totalorder %s4506_s30, 0 }
  0x23   : > { %s4665_s18 = scalar_lea.vmem %s5714_s0, %s4288_s17  ;;  %s4788_s17 = sand.u32 1, %s4498_s28  }
  0x24   : > { %v3863_v0 = vld [vmem:[%s4665_s18 + $0xc] sm:$0xf]  ;;  %v3864_v1 = vld [vmem:[%s4665_s18 + $0x10] sm:$0xf]  ;;  %v593_v2 = vld [vmem:[%s4665_s18] sm:$0xe] }
  0x25   : > { %748 = vrot.lane.b32.xlu0 %v3863_v0, %s5702_s9  ;;  %750 = vrot.lane.b32.xlu1 %v3864_v1, %s5702_s9  ;;  %v594_v3 = vld [vmem:[%s4665_s18 + $0x4] sm:$0xf]  ;;  %v3857_v5 = vrot.slane %v593_v2, 9  ;;  %v595_v6 = vld [vmem:[%s4665_s18 + $0x8] sm:$0x1] }
  0x26   : > { %v634_v7 = vrot.slane %v594_v3, 5  ;;  %v637_v8 = vrot.slane %v595_v6, 5  ;;  %v596_v9 = vld [vmem:[%s4665_s18 + $0xc] sm:$0xe]  ;;  %v597_v10 = vld [vmem:[%s4665_s18 + $0x10] sm:$0xf] }
  0x27   : > { %v3858_v11 = vrot.slane %v596_v9, 9  ;;  %v641_v12 = vrot.slane %v597_v10, 5  ;;  %v598_v13 = vld [vmem:[%s4665_s18 + $0x14] sm:$0x1]  ;;  %v379_v14 = vld [vmem:[%s4665_s18] sm:$0xf] }
  0x28   : > { %v635_v15 = vsel %vm4673_vm4, %v3857_v5, %v634_v7  ;;  %v636_v16 = vrot.slane %v634_v7, 4  ;;  %v644_v17 = vrot.slane %v598_v13, 5  ;;  %v380_v18 = vld [vmem:[%s4665_s18 + $0x4] sm:$0xf]  ;;  %v401_v19 = vshrl.u32 %v379_v14, 16 }
  0x29   : > { %674 = vrot.lane.b32.xlu0 %v635_v15, %s5704_s15  ;;  %v642_v20 = vsel %vm4673_vm4, %v3858_v11, %v641_v12  ;;  %v643_v21 = vrot.slane %v641_v12, 4  ;;  %v404_v22 = vshll.u32 %v379_v14, 16  ;;  %v410_v23 = vshll.u32 %v380_v18, 16  ;;  %v382_v24 = vld [vmem:[%s4665_s18 + $0xc] sm:$0xf] }
  0x2a   : > { %v638_v25 = vsel %vm4673_vm4, %v636_v16, %v637_v8  ;;  %v403_v26 = vrot.slane %v401_v19, 4  ;;  %v414_v27 = vshrl.u32 %v380_v18, 16  ;;  %v383_v28 = vld [vmem:[%s4665_s18 + $0x10] sm:$0xf]  ;;  %v425_v29 = vshrl.u32 %v382_v24, 16 }
  0x2b   : > { %676 = vrot.lane.b32.xlu1 %v638_v25, %s5704_s15  ;;  %v645_v30 = vsel %vm4673_vm4, %v643_v21, %v644_v17  ;;  %v406_v31 = vrot.slane %v404_v22, 5  ;;  %v412_v32 = vrot.slane %v410_v23, 5  ;;  %v428_v33 = vshll.u32 %v382_v24, 16  ;;  %v381_v34 = vld [vmem:[%s4665_s18 + $0x8] sm:$0x1] }
  0x2c   : > { %v427_v35 = vrot.slane %v425_v29, 4  ;;  %v434_v36 = vshll.u32 %v383_v28, 16  ;;  %v438_v37 = vshrl.u32 %v383_v28, 16  ;;  %v416_v38 = vrot.slane %v414_v27, 4  ;;  %v384_v39 = vld [vmem:[%s4665_s18 + $0x14] sm:$0x1] }
  0x2d   : > { %678 = vrot.lane.b32.xlu0 %v642_v20, %s5704_s15  ;;  %v407_v40 = vor.u32 %v406_v31, %v403_v26  ;;  %v430_v41 = vrot.slane %v428_v33, 5  ;;  %v420_v42 = vshll.u32 %v381_v34, 16  ;;  %v444_v43 = vshll.u32 %v384_v39, 16  ;;  %v3876_v48 = vld [vmem:[%s4665_s18 + $0x10] sm:$0xf] }
  0x2e   : > { %v436_v45 = vrot.slane %v434_v36, 5  ;;  %v417_v46 = vor.u32 %v416_v38, %v412_v32  ;;  %v440_v47 = vrot.slane %v438_v37, 4  ;;  %v825_v55 = vshll.u32 %v3876_v48, 16  ;;  %v3875_v57 = vld [vmem:[%s4665_s18 + $0xc] sm:$0xf] }
  0x2f   : > { %680 = vrot.lane.b32.xlu1 %v645_v30, %s5704_s15  ;;  %v408_v49 = vrot.slane %v407_v40, 4  ;;  %v431_v50 = vor.u32 %v430_v41, %v427_v35  ;;  %v422_v51 = vrot.slane %v420_v42, 5  ;;  %v446_v52 = vrot.slane %v444_v43, 5  ;;  %v3877_v60 = vld [vmem:[%s4665_s18 + $0x14] sm:$0x1] }
  0x30   : > { %v418_v53 = vrot.slane %v417_v46, 4  ;;  %v441_v54 = vor.u32 %v440_v47, %v436_v45  ;;  %v829_v56 = vshrl.u32 %v3876_v48, 16  ;;  %v816_v61 = vshrl.u32 %v3875_v57, 16  ;;  %v3879_v62 = vld [vmem:[%s4665_s18 + $0x1c] sm:$0xf] }
  0x31   : > { %v413_v58 = vsel %vm4700_vm5, %v408_v49, %v412_v32  ;;  %v432_v59 = vrot.slane %v431_v50, 4  ;;  %v827_v0 = vrot.slane %v825_v55, 5  ;;  %v819_v6 = vshll.u32 %v3875_v57, 16  ;;  %v3878_v7 = vld [vmem:[%s4665_s18 + $0x18] sm:$0xf] }
  0x32   : > { %544 = vrot.lane.b32.xlu0 %v413_v58, %s5706_s22  ;;  %v442_v63 = vrot.slane %v441_v54, 4  ;;  %v831_v1 = vrot.slane %v829_v56, 4  ;;  %v423_v3 = vsel %vm4700_vm5, %v418_v53, %v422_v51  ;;  %v818_v5 = vrot.slane %v816_v61, 4  ;;  %v3880_v14 = vld [vmem:[%s4665_s18 + $0x20] sm:$0x1] }
  0x33   : > { %v437_v2 = vsel %vm4700_vm5, %v432_v59, %v436_v45  ;;  %v835_v9 = vshll.u32 %v3877_v60, 16  ;;  %v849_v10 = vshll.u32 %v3879_v62, 16  ;;  %v853_v11 = vshrl.u32 %v3879_v62, 16  ;;  %v3865_v19 = vld [vmem:[%s4665_s18 + $0x18] sm:$0xf] }
  0x34   : > { %548 = vrot.lane.b32.xlu1 %v437_v2, %s5706_s22  ;;  %v447_v8 = vsel %vm4700_vm5, %v442_v63, %v446_v52  ;;  %v832_v12 = vor.u32 %v831_v1, %v827_v0  ;;  %v821_v13 = vrot.slane %v819_v6, 5  ;;  %v840_v15 = vshrl.u32 %v3878_v7, 16  ;;  %v3866_v25 = vld [vmem:[%s4665_s18 + $0x1c] sm:$0xf]  ;;  %v3894_v30 = vld [vmem:[%s4665_s18 + $0x10] sm:$0xf] }
  0x35   : > { %v843_v16 = vshll.u32 %v3878_v7, 16  ;;  %v851_v17 = vrot.slane %v849_v10, 5  ;;  %v855_v18 = vrot.slane %v853_v11, 4  ;;  %v837_v23 = vrot.slane %v835_v9, 5  ;;  %v3893_v33 = vld [vmem:[%s4665_s18 + $0xc] sm:$0xe] }
  0x36   : > { %546 = vrot.lane.b32.xlu0 %v423_v3, %s5706_s22  ;;  %v822_v20 = vor.u32 %v821_v13, %v818_v5  ;;  %v842_v21 = vrot.slane %v840_v15, 4  ;;  %v859_v24 = vshll.u32 %v3880_v14, 16  ;;  %v833_v26 = vrot.slane %v832_v12, 4  ;;  %v3897_v38 = vld [vmem:[%s4665_s18 + $0x1c] sm:$0xf] }
  0x37   : > { %v845_v22 = vrot.slane %v843_v16, 5  ;;  %v856_v28 = vor.u32 %v855_v18, %v851_v17  ;;  %v1046_v37 = vrot.slane %v3894_v30, 5  ;;  %v3895_v39 = vld [vmem:[%s4665_s18 + $0x14] sm:$0x1]  ;;  %v3911_v41 = vrot.slane %v3893_v33, 9 }
  0x38   : > { %550 = vrot.lane.b32.xlu1 %v447_v8, %s5706_s22  ;;  %v823_v27 = vrot.slane %v822_v20, 4  ;;  %v838_v34 = vsel %vm4700_vm5, %v833_v26, %v837_v23  ;;  %v861_v36 = vrot.slane %v859_v24, 5  ;;  %v3896_v42 = vld [vmem:[%s4665_s18 + $0x18] sm:$0xe]  ;;  %v1053_v43 = vrot.slane %v3897_v38, 5 }
  0x39   : > { %v846_v29 = vor.u32 %v845_v22, %v842_v21  ;;  %v857_v35 = vrot.slane %v856_v28, 4  ;;  %v3929_v45 = vld [vmem:[%s4665_s18 + $0x18] sm:$0xf]  ;;  %v1048_v47 = vrot.slane %v1046_v37, 4  ;;  %v1049_v48 = vrot.slane %v3895_v39, 5 }
  0x3a   : > { %752 = vrot.lane.b32.xlu0 %v3865_v19, %s5702_s9  ;;  %v828_v31 = vsel %vm4700_vm5, %v823_v27, %v827_v0  ;;  %v3898_v49 = vld [vmem:[%s4665_s18 + $0x20] sm:$0x1]  ;;  %v3912_v50 = vrot.slane %v3896_v42, 9  ;;  %v3930_v51 = vld [vmem:[%s4665_s18 + $0x1c] sm:$0xf]  ;;  %v1047_v52 = vsel %vm4673_vm4, %v3911_v41, %v1046_v37  ;;  %v1228_v53 = vshrl.u32 %v3929_v45, 16 }
  0x3b   : > { %v847_v32 = vrot.slane %v846_v29, 4  ;;  %v862_v46 = vsel %vm4700_vm5, %v857_v35, %v861_v36  ;;  %v1231_v54 = vshll.u32 %v3929_v45, 16  ;;  %v1055_v55 = vrot.slane %v1053_v43, 4  ;;  %v3932_v57 = vld [vmem:[%s4665_s18 + $0x24] sm:$0xf] }
  0x3c   : > { %754 = vrot.lane.b32.xlu1 %v3866_v25, %s5702_s9  ;;  %v1056_v56 = vrot.slane %v3898_v49, 5  ;;  %v1050_v58 = vsel %vm4673_vm4, %v1048_v47, %v1049_v48  ;;  %v1237_v59 = vshll.u32 %v3930_v51, 16  ;;  %v1241_v60 = vshrl.u32 %v3930_v51, 16  ;;  %v3933_v62 = vld [vmem:[%s4665_s18 + $0x28] sm:$0xf] }
  0x3d   : > { %v852_v40 = vsel %vm4700_vm5, %v847_v32, %v851_v17  ;;  %v1054_v61 = vsel %vm4673_vm4, %v3912_v50, %v1053_v43  ;;  %v1230_v63 = vrot.slane %v1228_v53, 4  ;;  %v1233_v0 = vrot.slane %v1231_v54, 5  ;;  %v3931_v5 = vld [vmem:[%s4665_s18 + $0x20] sm:$0x1]  ;;  %v3917_v10 = vld [vmem:[%s4665_s18 + $0x18] sm:$0xf] }
  0x3e   : > { %959 = vrot.lane.b32.xlu0 %v828_v31, %s4527_s23  ;;  %v1252_v1 = vshrl.u32 %v3932_v57, 16  ;;  %v1255_v2 = vshll.u32 %v3932_v57, 16  ;;  %v1057_v3 = vsel %vm4673_vm4, %v1055_v55, %v1056_v56  ;;  %v1239_v6 = vrot.slane %v1237_v59, 5  ;;  %v385_v15 = vld [vmem:[%s4665_s18 + $0x18] sm:$0xf] }
  0x3f   : > { %v1243_v7 = vrot.slane %v1241_v60, 4  ;;  %v1261_v8 = vshll.u32 %v3933_v62, 16  ;;  %v1265_v9 = vshrl.u32 %v3933_v62, 16  ;;  %v1234_v11 = vor.u32 %v1233_v0, %v1230_v63  ;;  %v3918_v16 = vld [vmem:[%s4665_s18 + $0x1c] sm:$0xf] }
  0x40   : > { %961 = vrot.lane.b32.xlu1 %v838_v34, %s4527_s23  ;;  %v1254_v12 = vrot.slane %v1252_v1, 4  ;;  %v1257_v13 = vrot.slane %v1255_v2, 5  ;;  %v1247_v14 = vshll.u32 %v3931_v5, 16  ;;  %v3934_v18 = vld [vmem:[%s4665_s18 + $0x2c] sm:$0x1]  ;;  %v449_v25 = vshrl.u32 %v385_v15, 16 }
  0x41   : > { %v1244_v17 = vor.u32 %v1243_v7, %v1239_v6  ;;  %v1263_v19 = vrot.slane %v1261_v8, 5  ;;  %v1267_v20 = vrot.slane %v1265_v9, 4  ;;  %v386_v21 = vld [vmem:[%s4665_s18 + $0x1c] sm:$0xf]  ;;  %v3919_v22 = vld [vmem:[%s4665_s18 + $0x24] sm:$0xf] }
  0x42   : > { %963 = vrot.lane.b32.xlu0 %v852_v40, %s4527_s23  ;;  %v1235_v23 = vrot.slane %v1234_v11, 4  ;;  %v1258_v24 = vor.u32 %v1257_v13, %v1254_v12  ;;  %v452_v26 = vshll.u32 %v385_v15, 16  ;;  %v3920_v27 = vld [vmem:[%s4665_s18 + $0x28] sm:$0xf]  ;;  %v1249_v28 = vrot.slane %v1247_v14, 5 }
  0x43   : > { %v1271_v29 = vshll.u32 %v3934_v18, 16  ;;  %v1245_v30 = vrot.slane %v1244_v17, 4  ;;  %v1268_v31 = vor.u32 %v1267_v20, %v1263_v19  ;;  %v3948_v32 = vld [vmem:[%s4665_s18 + $0x1c] sm:$0xf]  ;;  %v458_v33 = vshll.u32 %v386_v21, 16 }
  0x44   : > { %965 = vrot.lane.b32.xlu1 %v862_v46, %s4527_s23  ;;  %v462_v34 = vshrl.u32 %v386_v21, 16  ;;  %v1240_v35 = vsel %vm4700_vm5, %v1235_v23, %v1239_v6  ;;  %v1259_v36 = vrot.slane %v1258_v24, 4  ;;  %v3947_v37 = vld [vmem:[%s4665_s18 + $0x18] sm:$0xe]  ;;  %v451_v38 = vrot.slane %v449_v25, 4 }
  0x45   : > { %v454_v39 = vrot.slane %v452_v26, 5  ;;  %v1273_v40 = vrot.slane %v1271_v29, 5  ;;  %v3949_v41 = vld [vmem:[%s4665_s18 + $0x20] sm:$0x1]  ;;  %v1458_v42 = vrot.slane %v3948_v32, 5  ;;  %v1250_v45 = vsel %vm4700_vm5, %v1245_v30, %v1249_v28 }
  0x46   : > { %1086 = vrot.lane.b32.xlu0 %v1047_v52, %s4528_s24  ;;  %v388_v43 = vld [vmem:[%s4665_s18 + $0x24] sm:$0xf]  ;;  %v1269_v46 = vrot.slane %v1268_v31, 4  ;;  %v387_v47 = vld [vmem:[%s4665_s18 + $0x20] sm:$0x1]  ;;  %v460_v48 = vrot.slane %v458_v33, 5  ;;  %v1264_v52 = vsel %vm4700_vm5, %v1259_v36, %v1263_v19 }
  0x47   : > { %v464_v49 = vrot.slane %v462_v34, 4  ;;  %v3965_v50 = vrot.slane %v3947_v37, 9  ;;  %v389_v51 = vld [vmem:[%s4665_s18 + $0x28] sm:$0xf]  ;;  %v455_v53 = vor.u32 %v454_v39, %v451_v38  ;;  %v473_v54 = vshrl.u32 %v388_v43, 16 }
  0x48   : > { %1088 = vrot.lane.b32.xlu1 %v1050_v58, %s4528_s24  ;;  %v476_v55 = vshll.u32 %v388_v43, 16  ;;  %v1460_v56 = vrot.slane %v1458_v42, 4  ;;  %v1461_v57 = vrot.slane %v3949_v41, 5  ;;  %v468_v58 = vshll.u32 %v387_v47, 16  ;;  %v3951_v63 = vld [vmem:[%s4665_s18 + $0x28] sm:$0xf] }
  0x49   : > { %v1274_v59 = vsel %vm4700_vm5, %v1269_v46, %v1273_v40  ;;  %v465_v60 = vor.u32 %v464_v49, %v460_v48  ;;  %v486_v62 = vshrl.u32 %v389_v51, 16  ;;  %v1459_v0 = vsel %vm4673_vm4, %v3965_v50, %v1458_v42  ;;  %v3950_v7 = vld [vmem:[%s4665_s18 + $0x24] sm:$0xe]  ;;  %v3952_v9 = vld [vmem:[%s4665_s18 + $0x2c] sm:$0x1] }
  0x4a   : > { %1090 = vrot.lane.b32.xlu0 %v1054_v61, %s4528_s24  ;;  %v482_v61 = vshll.u32 %v389_v51, 16  ;;  %v456_v1 = vrot.slane %v455_v53, 4  ;;  %v475_v2 = vrot.slane %v473_v54, 4  ;;  %v1462_v5 = vsel %vm4673_vm4, %v1460_v56, %v1461_v57  ;;  %v390_v13 = vld [vmem:[%s4665_s18 + $0x2c] sm:$0x1] }
  0x4b   : > { %v470_v6 = vrot.slane %v468_v58, 5  ;;  %v466_v8 = vrot.slane %v465_v60, 4  ;;  %v488_v12 = vrot.slane %v486_v62, 4  ;;  %v3966_v15 = vrot.slane %v3950_v7, 9  ;;  %v599_v25 = vld [vmem:[%s4665_s18 + $0x18] sm:$0xe] }
  0x4c   : > { %1092 = vrot.lane.b32.xlu1 %v1057_v3, %s4528_s24  ;;  %v478_v3 = vrot.slane %v476_v55, 5  ;;  %v484_v11 = vrot.slane %v482_v61, 5  ;;  %v461_v14 = vsel %vm4700_vm5, %v456_v1, %v460_v48  ;;  %v1468_v17 = vrot.slane %v3952_v9, 5  ;;  %v603_v30 = vld [vmem:[%s4665_s18 + $0x28] sm:$0xf] }
  0x4d   : > { %v471_v18 = vsel %vm4700_vm5, %v466_v8, %v470_v6  ;;  %v492_v21 = vshll.u32 %v390_v13, 16  ;;  %v601_v31 = vld [vmem:[%s4665_s18 + $0x20] sm:$0x1]  ;;  %v602_v32 = vld [vmem:[%s4665_s18 + $0x24] sm:$0xe]  ;;  %v3859_v34 = vrot.slane %v599_v25, 9 }
  0x4e   : > { %1160 = vrot.lane.b32.xlu0 %v3917_v10, %s4529_s26  ;;  %v1465_v10 = vrot.slane %v3951_v63, 5  ;;  %v489_v20 = vor.u32 %v488_v12, %v484_v11  ;;  %v356_v36 = vld [vmem:[%s4665_s18 + $0xc] sm:$0xf]  ;;  %v655_v37 = vrot.slane %v603_v30, 5  ;;  %v3881_v38 = vld [vmem:[%s4665_s18 + $0x24] sm:$0xf] }
  0x4f   : > { %v494_v28 = vrot.slane %v492_v21, 5  ;;  %369 = vst.msk [vmem:[#allocation2 + $0x8] sm:$0xf] %vm366_vm6, %v356_v36  ;;  %v651_v41 = vrot.slane %v601_v31, 5  ;;  %v604_v42 = vld [vmem:[%s4665_s18 + $0x2c] sm:$0x1] }
  0x50   : > { %1162 = vrot.lane.b32.xlu1 %v3918_v16, %s4529_s26  ;;  %v479_v16 = vor.u32 %v478_v3, %v475_v2  ;;  %v1467_v19 = vrot.slane %v1465_v10, 4  ;;  %v1466_v23 = vsel %vm4673_vm4, %v3966_v15, %v1465_v10  ;;  %v3860_v43 = vrot.slane %v602_v32, 9  ;;  %v355_v49 = vld [vmem:[%s4665_s18 + $0x4] sm:$0xf]  ;;  %v357_v53 = vld [vmem:[%s4665_s18 + $0x10] sm:$0xf] }
  0x51   : > { %v864_v47 = vshrl.u32 %v3881_v38, 16  ;;  %v867_v48 = vshll.u32 %v3881_v38, 16  ;;  %v657_v50 = vrot.slane %v655_v37, 4  ;;  %v658_v51 = vrot.slane %v604_v42, 5  ;;  %368 = vst.msk [vmem:[#allocation2 + $0x4] sm:$0xf] %vm366_vm6, %v355_v49 }
  0x52   : > { %1164 = vrot.lane.b32.xlu0 %v3919_v22, %s4529_s26  ;;  %v600_v22 = vld [vmem:[%s4665_s18 + $0x1c] sm:$0xf]  ;;  %v480_v24 = vrot.slane %v479_v16, 4  ;;  %v1469_v26 = vsel %vm4673_vm4, %v1467_v19, %v1468_v17  ;;  %370 = vst.msk [vmem:[#allocation2 + $0xc] sm:$0xf] %vm366_vm6, %v357_v53  ;;  %v656_v57 = vsel %vm4673_vm4, %v3860_v43, %v655_v37 }
  0x53   : > { %v648_v29 = vrot.slane %v600_v22, 5  ;;  %v3885_v58 = vld [vmem:[%s4665_s18 + $0x34] sm:$0xf]  ;;  %v869_v60 = vrot.slane %v867_v48, 5  ;;  %v659_v63 = vsel %vm4673_vm4, %v657_v50, %v658_v51  ;;  %v3867_v6 = vld [vmem:[%s4665_s18 + $0x24] sm:$0xf] }
  0x54   : > { %1166 = vrot.lane.b32.xlu1 %v3920_v27, %s4529_s26  ;;  %v490_v27 = vrot.slane %v489_v20, 4  ;;  %v485_v33 = vsel %vm4700_vm5, %v480_v24, %v484_v11  ;;  %v897_v2 = vshll.u32 %v3885_v58, 16  ;;  %v901_v3 = vshrl.u32 %v3885_v58, 16  ;;  %v3868_v10 = vld [vmem:[%s4665_s18 + $0x28] sm:$0xf] }
  0x55   : > { %v650_v40 = vrot.slane %v648_v29, 4  ;;  %v649_v46 = vsel %vm4673_vm4, %v3859_v34, %v648_v29  ;;  %v3886_v15 = vld [vmem:[%s4665_s18 + $0x38] sm:$0x1]  ;;  %v3869_v16 = vld [vmem:[%s4665_s18 + $0x30] sm:$0xf] }
  0x56   : > { %1371 = vrot.lane.b32.xlu0 %v1240_v35, %s5700_s16  ;;  %v354_v35 = vld [vmem:[%s4665_s18] sm:$0xf]  ;;  %v495_v39 = vsel %vm4700_vm5, %v490_v27, %v494_v28  ;;  %v899_v13 = vrot.slane %v897_v2, 5  ;;  %v3870_v19 = vld [vmem:[%s4665_s18 + $0x34] sm:$0xf] }
  0x57   : > { %367 = vst.msk [vmem:[#allocation2] sm:$0xf] %vm366_vm6, %v354_v35  ;;  %v652_v54 = vsel %vm4673_vm4, %v650_v40, %v651_v41  ;;  %v3900_v24 = vld [vmem:[%s4665_s18 + $0x28] sm:$0xf]  ;;  %v3899_v27 = vld [vmem:[%s4665_s18 + $0x24] sm:$0xe] }
  0x58   : > { %1373 = vrot.lane.b32.xlu1 %v1250_v45, %s5700_s16  ;;  %v3882_v45 = vld [vmem:[%s4665_s18 + $0x28] sm:$0xf]  ;;  %v1060_v31 = vrot.slane %v3900_v24, 5  ;;  %v3903_v32 = vld [vmem:[%s4665_s18 + $0x34] sm:$0xf]  ;;  %v3913_v35 = vrot.slane %v3899_v27, 9 }
  0x59   : > { %v873_v55 = vshll.u32 %v3882_v45, 16  ;;  %v877_v56 = vshrl.u32 %v3882_v45, 16  ;;  %v3902_v36 = vld [vmem:[%s4665_s18 + $0x30] sm:$0xe]  ;;  %v3904_v37 = vld [vmem:[%s4665_s18 + $0x38] sm:$0x1] }
  0x5a   : > { %1375 = vrot.lane.b32.xlu0 %v1264_v52, %s5700_s16  ;;  %v3884_v52 = vld [vmem:[%s4665_s18 + $0x30] sm:$0xf]  ;;  %v1067_v38 = vrot.slane %v3903_v32, 5  ;;  %v1062_v41 = vrot.slane %v1060_v31, 4  ;;  %v359_v43 = vld [vmem:[%s4665_s18 + $0x1c] sm:$0xf]  ;;  %v1061_v48 = vsel %vm4673_vm4, %v3913_v35, %v1060_v31 }
  0x5b   : > { %v888_v61 = vshrl.u32 %v3884_v52, 16  ;;  %v891_v62 = vshll.u32 %v3884_v52, 16  ;;  %v879_v1 = vrot.slane %v877_v56, 4  ;;  %v3914_v45 = vrot.slane %v3902_v36, 9  ;;  %372 = vst.msk [vmem:[#allocation2 + $0x14] sm:$0xf] %vm366_vm6, %v359_v43 }
  0x5c   : > { %1377 = vrot.lane.b32.xlu1 %v1274_v59, %s5700_s16  ;;  %v866_v59 = vrot.slane %v864_v47, 4  ;;  %v358_v47 = vld [vmem:[%s4665_s18 + $0x18] sm:$0xf]  ;;  %v1070_v49 = vrot.slane %v3904_v37, 5  ;;  %v3938_v52 = vld [vmem:[%s4665_s18 + $0x3c] sm:$0xf] }
  0x5d   : > { %v890_v8 = vrot.slane %v888_v61, 4  ;;  %v893_v9 = vrot.slane %v891_v62, 5  ;;  %371 = vst.msk [vmem:[#allocation2 + $0x10] sm:$0xf] %vm366_vm6, %v358_v47  ;;  %v1069_v53 = vrot.slane %v1067_v38, 4  ;;  %s5721_s16 = smov 4  }
  0x5e   : > { %1498 = vrot.lane.b32.xlu0 %v1459_v0, %s4531_s21  ;;  %v875_v0 = vrot.slane %v873_v55, 5  ;;  %v870_v7 = vor.u32 %v869_v60, %v866_v59  ;;  %v4380_v55 = vld [vmem:[%s5719_s1 + $0x8] sm:$0xff]   ;;  %v1068_v59 = vsel %vm4673_vm4, %v3914_v45, %v1067_v38  ;;  %v3939_v60 = vld [vmem:[%s4665_s18 + $0x40] sm:$0xf]  ;;  %v3954_v37 = vld [vmem:[%s4665_s18 + $0x34] sm:$0xf] }
  0x5f   : > { %v361_v2 = vld [vmem:[%s4665_s18 + $0x28] sm:$0xf]  ;;  %v3924_v32 = vld [vmem:[%s4665_s18 + $0x40] sm:$0xf]  ;;  %v393_v45 = vld [vmem:[%s4665_s18 + $0x38] sm:$0x1] }
  0x60   : > { %1500 = vrot.lane.b32.xlu1 %v1462_v5, %s4531_s21  ;;  %v3883_v5 = vld [vmem:[%s4665_s18 + $0x2c] sm:$0x1]  ;;  %v880_v11 = vor.u32 %v879_v1, %v875_v0  ;;  %v871_v17 = vrot.slane %v870_v7, 4  ;;  %v1303_v1 = vshll.u32 %v3938_v52, 16  ;;  %374 = vst.msk [vmem:[#allocation2 + $0x1c] sm:$0xf] %vm366_vm6, %v361_v2 }
  0x61   : > { %v883_v12 = vshll.u32 %v3883_v5, 16  ;;  %v360_v5 = vld [vmem:[%s4665_s18 + $0x24] sm:$0xf] }
  0x62   : > { %552 = vrot.lane.b32.xlu0 %v461_v14, %s5706_s22  ;;  %v903_v14 = vrot.slane %v901_v3, 4  ;;  %v881_v20 = vrot.slane %v880_v11, 4  ;;  %v876_v25 = vsel %vm4700_vm5, %v871_v17, %v875_v0  ;;  %v1300_v0 = vshrl.u32 %v3938_v52, 16  ;;  %373 = vst.msk [vmem:[#allocation2 + $0x18] sm:$0xf] %vm366_vm6, %v360_v5 }
  0x63   : > { %v885_v21 = vrot.slane %v883_v12, 5  ;;  %v1071_v3 = vsel %vm4673_vm4, %v1069_v53, %v1070_v49  ;;  %v3937_v11 = vld [vmem:[%s4665_s18 + $0x38] sm:$0x1]  ;;  %v3921_v12 = vld [vmem:[%s4665_s18 + $0x30] sm:$0xf] }
  0x64   : > { %554 = vrot.lane.b32.xlu1 %v471_v18, %s5706_s22  ;;  %v894_v18 = vor.u32 %v893_v9, %v890_v8  ;;  %v904_v22 = vor.u32 %v903_v14, %v899_v13  ;;  %v1309_v9 = vshll.u32 %v3939_v60, 16  ;;  %v3940_v14 = vld [vmem:[%s4665_s18 + $0x44] sm:$0x1]  ;;  %v3922_v17 = vld [vmem:[%s4665_s18 + $0x34] sm:$0xf] }
  0x65   : > { %v886_v28 = vsel %vm4700_vm5, %v881_v20, %v885_v21  ;;  %v1295_v20 = vshll.u32 %v3937_v11, 16  ;;  %v1319_v24 = vshll.u32 %v3940_v14, 16  ;;  %v363_v52 = vld [vmem:[%s4665_s18 + $0x34] sm:$0xf]  ;;  %v362_v53 = vld [vmem:[%s4665_s18 + $0x30] sm:$0xf] }
  0x66   : > { %1502 = vrot.lane.b32.xlu0 %v1466_v23, %s4531_s21  ;;  %v907_v23 = vshll.u32 %v3886_v15, 16  ;;  %v905_v29 = vrot.slane %v904_v22, 4  ;;  %v1302_v15 = vrot.slane %v1300_v0, 4  ;;  %v1311_v21 = vrot.slane %v1309_v9, 5  ;;  %376 = vst.msk [vmem:[#allocation2 + $0x24] sm:$0xf] %vm366_vm6, %v363_v52 }
  0x67   : > { %v1321_v36 = vrot.slane %v1319_v24, 5  ;;  %375 = vst.msk [vmem:[#allocation2 + $0x20] sm:$0xf] %vm366_vm6, %v362_v53  ;;  %v516_v0 = vshll.u32 %v393_v45, 16  ;;  %v3887_v52 = vld [vmem:[%s4665_s18 + $0x3c] sm:$0xf] }
  0x68   : > { %1504 = vrot.lane.b32.xlu1 %v1469_v26, %s4531_s21  ;;  %v895_v26 = vrot.slane %v894_v18, 4  ;;  %v909_v30 = vrot.slane %v907_v23, 5  ;;  %v391_v18 = vld [vmem:[%s4665_s18 + $0x30] sm:$0xf]  ;;  %v392_v23 = vld [vmem:[%s4665_s18 + $0x34] sm:$0xf] }
  0x69   : > { %v510_v31 = vshrl.u32 %v392_v23, 16  ;;  %v518_v14 = vrot.slane %v516_v0, 5 }
  0x6a   : > { %556 = vrot.lane.b32.xlu0 %v485_v33, %s5706_s22  ;;  %v3901_v33 = vld [vmem:[%s4665_s18 + $0x2c] sm:$0x1]  ;;  %v900_v34 = vsel %vm4700_vm5, %v895_v26, %v899_v13  ;;  %v910_v40 = vsel %vm4700_vm5, %v905_v29, %v909_v30  ;;  %v500_v29 = vshll.u32 %v391_v18, 16  ;;  %v506_v30 = vshll.u32 %v392_v23, 16  ;;  %v396_v23 = vld [vmem:[%s4665_s18 + $0x44] sm:$0x1] }
  0x6b   : > { %v1063_v42 = vrot.slane %v3901_v33, 5  ;;  %v512_v47 = vrot.slane %v510_v31, 4 }
  0x6c   : > { %558 = vrot.lane.b32.xlu1 %v495_v39, %s5706_s22  ;;  %v3935_v39 = vld [vmem:[%s4665_s18 + $0x30] sm:$0xf]  ;;  %v502_v43 = vrot.slane %v500_v29, 5  ;;  %s5720_s22 = smov 28  }
  0x6d   : > { %v1276_v50 = vshrl.u32 %v3935_v39, 16  ;;  %v1279_v51 = vshll.u32 %v3935_v39, 16  ;;  %v1064_v56 = vsel %vm4673_vm4, %v1062_v41, %v1063_v42  ;;  %v3953_v41 = vld [vmem:[%s4665_s18 + $0x30] sm:$0xe] }
  0x6e   : > { %682 = vrot.lane.b32.xlu0 %v649_v46, %s5704_s15  ;;  %v3936_v46 = vld [vmem:[%s4665_s18 + $0x34] sm:$0xf] }
  0x6f   : > { %v1289_v58 = vshrl.u32 %v3936_v46, 16  ;;  %v1278_v62 = vrot.slane %v1276_v50, 4 }
  0x70   : > { %684 = vrot.lane.b32.xlu1 %v652_v54, %s5704_s15  ;;  %v4379_v54 = vld [vmem:[%s5719_s1 + $0x10] ss:$0 sps:$4 sm:$0x33]  }
  0x71   : > { %4277 = vmatprep.subr.msk.bf16.mxu0 %vm1628_vm7, %v4379_v54  ;;  %v1630_v61 = vsel %vm1628_vm7, %v4379_v54, 0  ;;  %v1291_v8 = vrot.slane %v1289_v58, 4  ;;  %v3967_v54 = vrot.slane %v3953_v41, 9 }
  0x72   : > { %686 = vrot.lane.b32.xlu0 %v656_v57, %s5704_s15  ;;  %v1285_v57 = vshll.u32 %v3936_v46, 16  ;;  %4168 = vmatpush3.bf16.msra.mxu0 %v1630_v61  ;;  %v508_v46 = vrot.slane %v506_v30, 5 }
  0x73   : > { %4169 = vmatprep.subr.bf16.mxu0 %v4380_v55 }
  0x74   : > { %688 = vrot.lane.b32.xlu1 %v659_v63, %s5704_s15  ;;  %v1281_v63 = vrot.slane %v1279_v51, 5  ;;  %v1287_v7 = vrot.slane %v1285_v57, 5  ;;  %v1472_v51 = vrot.slane %v3954_v37, 5  ;;  %s5723_s15 = smov 12  }
  0x76   : > { %756 = vrot.lane.b32.xlu0 %v3867_v6, %s5702_s9  ;;  %v4382_v6 = vld [vmem:[%s5719_s1] sm:$0xff]   ;;  %v1282_v13 = vor.u32 %v1281_v63, %v1278_v62  ;;  %4170 = vmatpush3.bf16.msra.mxu0 %v4380_v55  ;;  %v513_v63 = vor.u32 %v512_v47, %v508_v46  ;;  %v1474_v2 = vrot.slane %v1472_v51, 4 }
  0x77   : > { %4171 = vmatprep.subr.bf16.mxu0 %v4382_v6  ;;  %v395_v55 = vld [vmem:[%s4665_s18 + $0x40] sm:$0xf] }
  0x78   : > { %758 = vrot.lane.b32.xlu1 %v3868_v10, %s5702_s9  ;;  %v1313_v10 = vshrl.u32 %v3939_v60, 16  ;;  %v1283_v26 = vrot.slane %v1282_v13, 4  ;;  %v530_v5 = vshll.u32 %v395_v55, 16  ;;  %v514_v13 = vrot.slane %v513_v63, 4 }
  0x79   : > { %v915_v63 = vshll.u32 %v3887_v52, 16 }
  0x7a   : > { %760 = vrot.lane.b32.xlu0 %v3869_v16, %s5702_s9  ;;  %v1305_v16 = vrot.slane %v1303_v1, 5  ;;  %v1315_v22 = vrot.slane %v1313_v10, 4  ;;  %4172 = vmatpush3.bf16.msra.mxu0 %v4382_v6  ;;  %v1288_v38 = vsel %vm4700_vm5, %v1283_v26, %v1287_v7  ;;  %v534_v6 = vshrl.u32 %v395_v55, 16  ;;  %v3958_v10 = vld [vmem:[%s4665_s18 + $0x44] sm:$0x1] }
  0x7b   : > { %v519_v30 = vsel %vm4700_vm5, %v514_v13, %v518_v14 }
  0x7c   : > { %762 = vrot.lane.b32.xlu1 %v3870_v19, %s5702_s9  ;;  %v1292_v19 = vor.u32 %v1291_v8, %v1287_v7  ;;  %v1306_v27 = vor.u32 %v1305_v16, %v1302_v15  ;;  %v1316_v35 = vor.u32 %v1315_v22, %v1311_v21  ;;  %v1473_v8 = vsel %vm4673_vm4, %v3967_v54, %v1472_v51  ;;  %v3956_v16 = vld [vmem:[%s4665_s18 + $0x3c] sm:$0xe]  ;;  %s5722_s9 = smov 8  }
  0x7d   : > { %v364_v22 = vld [vmem:[%s4665_s18 + $0x3c] sm:$0xf]  ;;  %v3968_v26 = vrot.slane %v3956_v16, 9 }
  0x7e   : > { %967 = vrot.lane.b32.xlu0 %v876_v25, %s4527_s23  ;;  %v3923_v25 = vld [vmem:[%s4665_s18 + $0x3c] sm:$0xf]  ;;  %v1293_v33 = vrot.slane %v1292_v19, 4  ;;  %v1307_v39 = vrot.slane %v1306_v27, 4  ;;  %v1317_v50 = vrot.slane %v1316_v35, 4  ;;  %v532_v19 = vrot.slane %v530_v5, 5 }
  0x7f   : > { %377 = vst.msk [vmem:[#allocation2 + $0x28] sm:$0xf] %vm366_vm6, %v364_v22  ;;  %v3871_v22 = vld [vmem:[%s4665_s18 + $0x3c] sm:$0xf] }
  0x80   : > { %969 = vrot.lane.b32.xlu1 %v886_v28, %s4527_s23  ;;  %v497_v28 = vshrl.u32 %v391_v18, 16  ;;  %v1312_v58 = vsel %vm4700_vm5, %v1307_v39, %v1311_v21  ;;  %v1322_v1 = vsel %vm4700_vm5, %v1317_v50, %v1321_v36  ;;  %v365_v21 = vld [vmem:[%s4665_s18 + $0x40] sm:$0xf] }
  0x81   : > { %378 = vst.msk [vmem:[#allocation2 + $0x2c] sm:$0xf] %vm366_vm6, %v365_v21  ;;  %v3889_v21 = vld [vmem:[%s4665_s18 + $0x44] sm:$0x1] }
  0x82   : > { %971 = vrot.lane.b32.xlu0 %v900_v34, %s4527_s23  ;;  %v1297_v34 = vrot.slane %v1295_v20, 5  ;;  %v499_v42 = vrot.slane %v497_v28, 4  ;;  %v536_v20 = vrot.slane %v534_v6, 4  ;;  %v1482_v28 = vrot.slane %v3958_v10, 5 }
  0x84   : > { %973 = vrot.lane.b32.xlu1 %v910_v40, %s4527_s23  ;;  %v3955_v40 = vld [vmem:[%s4665_s18 + $0x38] sm:$0x1]  ;;  %v1298_v49 = vsel %vm4700_vm5, %v1293_v33, %v1297_v34  ;;  %v540_v33 = vshll.u32 %v396_v23, 16  ;;  %v606_v34 = vld [vmem:[%s4665_s18 + $0x34] sm:$0xf] }
  0x85   : > { %v1475_v62 = vrot.slane %v3955_v40, 5 }
  0x86   : > { %1094 = vrot.lane.b32.xlu0 %v1061_v48, %s4528_s24  ;;  %v394_v48 = vld [vmem:[%s4665_s18 + $0x3c] sm:$0xf]  ;;  %v542_v41 = vrot.slane %v540_v33, 5  ;;  %v3892_v33 = vld [vmem:[%s4665_s18 + $0x50] sm:$0x1] }
  0x87   : > { %v521_v60 = vshrl.u32 %v394_v48, 16  ;;  %v524_v61 = vshll.u32 %v394_v48, 16  ;;  %v1476_v18 = vsel %vm4673_vm4, %v1474_v2, %v1475_v62  ;;  %v912_v62 = vshrl.u32 %v3887_v52, 16 }
  0x88   : > { %1096 = vrot.lane.b32.xlu1 %v1064_v56, %s4528_s24 }
  0x89   : > { %v523_v11 = vrot.slane %v521_v60, 4  ;;  %v3888_v60 = vld [vmem:[%s4665_s18 + $0x40] sm:$0xf]  ;;  %v914_v10 = vrot.slane %v912_v62, 4 }
  0x8a   : > { %1098 = vrot.lane.b32.xlu0 %v1068_v59, %s4528_s24  ;;  %v503_v59 = vor.u32 %v502_v43, %v499_v42  ;;  %v662_v42 = vrot.slane %v606_v34, 5  ;;  %v609_v43 = vld [vmem:[%s4665_s18 + $0x40] sm:$0xf]  ;;  %v925_v6 = vshrl.u32 %v3888_v60, 16  ;;  %v3873_v34 = vld [vmem:[%s4665_s18 + $0x48] sm:$0xf] }
  0x8b   : > { %v669_v51 = vrot.slane %v609_v43, 5 }
  0x8c   : > { %1100 = vrot.lane.b32.xlu1 %v1071_v3, %s4528_s24  ;;  %v3957_v3 = vld [vmem:[%s4665_s18 + $0x40] sm:$0xf]  ;;  %v504_v9 = vrot.slane %v503_v59, 4  ;;  %v664_v54 = vrot.slane %v662_v42, 4 }
  0x8d   : > { %v1479_v15 = vrot.slane %v3957_v3, 5  ;;  %v3890_v3 = vld [vmem:[%s4665_s18 + $0x48] sm:$0xf] }
  0x8e   : > { %1168 = vrot.lane.b32.xlu0 %v3921_v12, %s4529_s26  ;;  %v526_v12 = vrot.slane %v524_v61, 5  ;;  %v939_v13 = vshll.u32 %v3890_v3, 16 }
  0x8f   : > { %v1481_v31 = vrot.slane %v1479_v15, 4  ;;  %v1480_v35 = vsel %vm4673_vm4, %v3968_v26, %v1479_v15 }
  0x90   : > { %1170 = vrot.lane.b32.xlu1 %v3922_v17, %s4529_s26  ;;  %v527_v27 = vor.u32 %v526_v12, %v523_v11  ;;  %v917_v11 = vrot.slane %v915_v63, 5  ;;  %v936_v12 = vshrl.u32 %v3890_v3, 16  ;;  %v3941_v63 = vld [vmem:[%s4665_s18 + $0x48] sm:$0xf]  ;;  %v3910_v3 = vld [vmem:[%s4665_s18 + $0x50] sm:$0x1] }
  0x91   : > { %v1483_v39 = vsel %vm4673_vm4, %v1481_v31, %v1482_v28 }
  0x92   : > { %1172 = vrot.lane.b32.xlu0 %v3923_v25, %s4529_s26  ;;  %v509_v25 = vsel %vm4700_vm5, %v504_v9, %v508_v46  ;;  %v528_v36 = vrot.slane %v527_v27, 4  ;;  %v607_v46 = vld [vmem:[%s4665_s18 + $0x38] sm:$0x1]  ;;  %v3891_v9 = vld [vmem:[%s4665_s18 + $0x4c] sm:$0xf]  ;;  %v918_v23 = vor.u32 %v917_v11, %v914_v10 }
  0x93   : > { %v665_v55 = vrot.slane %v607_v46, 5  ;;  %v3872_v27 = vld [vmem:[%s4665_s18 + $0x40] sm:$0xf] }
  0x94   : > { %1174 = vrot.lane.b32.xlu1 %v3924_v32, %s4529_s26  ;;  %v537_v32 = vor.u32 %v536_v20, %v532_v19  ;;  %v533_v47 = vsel %vm4700_vm5, %v528_v36, %v532_v19  ;;  %v949_v19 = vshrl.u32 %v3891_v9, 16 }
  0x95   : > { %v666_v5 = vsel %vm4673_vm4, %v664_v54, %v665_v55  ;;  %v3909_v54 = vld [vmem:[%s4665_s18 + $0x4c] sm:$0xf] }
  0x96   : > { %1379 = vrot.lane.b32.xlu0 %v1288_v38, %s5720_s22  ;;  %v605_v38 = vld [vmem:[%s4665_s18 + $0x30] sm:$0xe]  ;;  %v538_v40 = vrot.slane %v537_v32, 4  ;;  %v951_v31 = vrot.slane %v949_v19, 4  ;;  %v1081_v62 = vrot.slane %v3909_v54, 5 }
  0x97   : > { %v4942_v56 = vpop.permute.xlu0 %748  ;;  %v4944_v57 = vpop.permute.xlu1 %750  ;;  %v3861_v48 = vrot.slane %v605_v38, 9  ;;  %v3874_v38 = vld [vmem:[%s4665_s18 + $0x4c] sm:$0xf]  ;;  %v3945_v19 = vld [vmem:[%s4665_s18 + $0x58] sm:$0xf] }
  0x98   : > { %1381 = vrot.lane.b32.xlu1 %v1298_v49, %s5720_s22  ;;  %v608_v49 = vld [vmem:[%s4665_s18 + $0x3c] sm:$0xe]  ;;  %v543_v53 = vsel %vm4700_vm5, %v538_v40, %v542_v41  ;;  %v1083_v11 = vrot.slane %v1081_v62, 4 }
  0x99   : > { %v3862_v59 = vrot.slane %v608_v49, 9  ;;  %v663_v61 = vsel %vm4673_vm4, %v3861_v48, %v662_v42  ;;  %v955_v42 = vshll.u32 %v3892_v33, 16  ;;  %v3905_v49 = vld [vmem:[%s4665_s18 + $0x3c] sm:$0xe] }
  0x9a   : > { %1383 = vrot.lane.b32.xlu0 %v1312_v58, %s5720_s22  ;;  %v610_v58 = vld [vmem:[%s4665_s18 + $0x44] sm:$0x1] }
  0x9b   : > { %v675_v7 = vpop.permute.xlu0 %674  ;;  %v672_v2 = vrot.slane %v610_v58, 5  ;;  %v957_v52 = vrot.slane %v955_v42, 5  ;;  %v3907_v58 = vld [vmem:[%s4665_s18 + $0x44] sm:$0x1] }
  0x9c   : > { %1385 = vrot.lane.b32.xlu1 %v1322_v1, %s5720_s22  ;;  %v671_v1 = vrot.slane %v669_v51, 4 }
  0x9d   : > { %v677_v17 = vpop.permute.xlu1 %676 }
  0x9e   : > { %1506 = vrot.lane.b32.xlu0 %v1473_v8, %s4531_s21  ;;  %v670_v8 = vsel %vm4673_vm4, %v3862_v59, %v669_v51  ;;  %v673_v15 = vsel %vm4673_vm4, %v671_v1, %v672_v2  ;;  %v3915_v59 = vrot.slane %v3905_v49, 9  ;;  %v1077_v2 = vrot.slane %v3907_v58, 5  ;;  %v3928_v49 = vld [vmem:[%s4665_s18 + $0x58] sm:$0xf] }
  0x9f   : > { %v679_v24 = vpop.permute.xlu0 %678 }
  0xa0   : > { %1508 = vrot.lane.b32.xlu1 %v1476_v18, %s4531_s21  ;;  %v945_v18 = vshll.u32 %v3891_v9, 16  ;;  %v1327_v9 = vshll.u32 %v3941_v63, 16 }
  0xa1   : > { %v681_v29 = vpop.permute.xlu1 %680 }
  0xa2   : > { %560 = vrot.lane.b32.xlu0 %v509_v25, %s5721_s16  ;;  %v941_v25 = vrot.slane %v939_v13, 5  ;;  %v3944_v13 = vld [vmem:[%s4665_s18 + $0x54] sm:$0xf] }
  0xa4   : > { %562 = vrot.lane.b32.xlu1 %v519_v30, %s5721_s16  ;;  %v545_v37 = vpop.permute.xlu0 %544  ;;  %v947_v30 = vrot.slane %v945_v18, 5 }
  0xa5   : > { %581 = vst.msk [vmem:[#allocation2] sm:$0xf] %vm580_vm8, %v545_v37 }
  0xa6   : > { %711 = vst.msk [vmem:[#allocation2] sm:$0xf] %vm710_vm9, %v675_v7  ;;  %v549_v45 = vpop.permute.xlu1 %548  ;;  %1510 = vrot.lane.b32.xlu0 %v1480_v35, %s4531_s21  ;;  %v919_v35 = vrot.slane %v918_v23, 4  ;;  %v952_v41 = vor.u32 %v951_v31, %v947_v30  ;;  %v1351_v23 = vshll.u32 %v3944_v13, 16  ;;  %v3943_v31 = vld [vmem:[%s4665_s18 + $0x50] sm:$0x1] }
  0xa7   : > { %583 = vst.msk [vmem:[#allocation2 + $0x8] sm:$0xf] %vm580_vm8, %v549_v45  ;;  %v3906_v45 = vld [vmem:[%s4665_s18 + $0x40] sm:$0xf] }
  0xa8   : > { %785 = vst.msk [vmem:[#allocation2] sm:$0xf] %vm784_vm10, %v4942_v56  ;;  %1512 = vrot.lane.b32.xlu1 %v1483_v39, %s4531_s21  ;;  %v547_v50 = vpop.permute.xlu0 %546  ;;  %v953_v51 = vrot.slane %v952_v41, 4 }
  0xa9   : > { %713 = vst.msk [vmem:[#allocation2 + $0x8] sm:$0xf] %vm710_vm9, %v679_v24  ;;  %v938_v24 = vrot.slane %v936_v12, 4  ;;  %v1084_v12 = vrot.slane %v3910_v3, 5  ;;  %v3963_v3 = vld [vmem:[%s4665_s18 + $0x58] sm:$0xf] }
  0xaa   : > { %582 = vst.msk [vmem:[#allocation2 + $0x4] sm:$0xf] %vm580_vm8, %v547_v50  ;;  %v551_v56 = vpop.permute.xlu1 %550  ;;  %564 = vrot.lane.b32.xlu0 %v533_v47, %s5721_s16 }
  0xab   : > { %712 = vst.msk [vmem:[#allocation2 + $0x4] sm:$0xf] %vm710_vm9, %v677_v17  ;;  %v927_v17 = vrot.slane %v925_v6, 4  ;;  %v942_v36 = vor.u32 %v941_v25, %v938_v24  ;;  %v3942_v6 = vld [vmem:[%s4665_s18 + $0x4c] sm:$0xf]  ;;  %v1085_v25 = vsel %vm4673_vm4, %v1083_v11, %v1084_v12  ;;  %v1493_v11 = vrot.slane %v3963_v3, 5 }
  0xac   : > { %584 = vst.msk [vmem:[#allocation2 + $0xc] sm:$0xf] %vm580_vm8, %v551_v56  ;;  %566 = vrot.lane.b32.xlu1 %v543_v53, %s5721_s16  ;;  %v753_v0 = vpop.permute.xlu0 %752  ;;  %v1074_v53 = vrot.slane %v3906_v45, 5  ;;  %v3927_v45 = vld [vmem:[%s4665_s18 + $0x54] sm:$0xf]  ;;  %s5726_s16 = sshll.u32 %s4788_s17, 4 }
  0xad   : > { %786 = vst.msk [vmem:[#allocation2 + $0x4] sm:$0xf] %vm784_vm10, %v4944_v57  ;;  %787 = vst.msk [vmem:[#allocation2 + $0x8] sm:$0xf] %vm784_vm10, %v753_v0  ;;  %v921_v57 = vshll.u32 %v3888_v60, 16  ;;  %v943_v47 = vrot.slane %v942_v36, 4  ;;  %v958_v0 = vsel %vm4700_vm5, %v953_v51, %v957_v52 }
  0xae   : > { %714 = vst.msk [vmem:[#allocation2 + $0xc] sm:$0xf] %vm710_vm9, %v681_v29  ;;  %v755_v7 = vpop.permute.xlu1 %754  ;;  %690 = vrot.lane.b32.xlu0 %v663_v61, %s5722_s9  ;;  %v931_v29 = vshll.u32 %v3889_v21, 16  ;;  %v3908_v60 = vld [vmem:[%s4665_s18 + $0x48] sm:$0xe]  ;;  %v1076_v1 = vrot.slane %v1074_v53, 4 }
  0xaf   : > { %788 = vst.msk [vmem:[#allocation2 + $0xc] sm:$0xf] %vm784_vm10, %v755_v7  ;;  %v923_v16 = vrot.slane %v921_v57, 5  ;;  %v948_v56 = vsel %vm4700_vm5, %v943_v47, %v947_v30  ;;  %v3916_v57 = vrot.slane %v3908_v60, 9  ;;  %v1075_v7 = vsel %vm4673_vm4, %v3915_v59, %v1074_v53  ;;  %v3959_v60 = vld [vmem:[%s4665_s18 + $0x48] sm:$0xe] }
  0xb0   : > { %692 = vrot.lane.b32.xlu1 %v666_v5, %s5722_s9  ;;  %v960_v14 = vpop.permute.xlu0 %959  ;;  %v933_v40 = vrot.slane %v931_v29, 5  ;;  %v1329_v21 = vrot.slane %v1327_v9, 5  ;;  %v1361_v29 = vshrl.u32 %v3945_v19, 16 }
  0xb1   : > { %996 = vst.msk [vmem:[#allocation2] sm:$0xf] %vm995_vm11, %v960_v14  ;;  %v928_v28 = vor.u32 %v927_v17, %v923_v16  ;;  %v924_v46 = vsel %vm4700_vm5, %v919_v35, %v923_v16  ;;  %v1078_v14 = vsel %vm4673_vm4, %v1076_v1, %v1077_v2  ;;  %v1337_v16 = vshrl.u32 %v3942_v6, 16  ;;  %v3961_v2 = vld [vmem:[%s4665_s18 + $0x50] sm:$0x1] }
  0xb2   : > { %v962_v20 = vpop.permute.xlu1 %961  ;;  %694 = vrot.lane.b32.xlu0 %v670_v8, %s5722_s9  ;;  %v1324_v8 = vshrl.u32 %v3941_v63, 16  ;;  %v1082_v18 = vsel %vm4673_vm4, %v3916_v57, %v1081_v62  ;;  %v1353_v35 = vrot.slane %v1351_v23, 5  ;;  %v1363_v41 = vrot.slane %v1361_v29, 4 }
  0xb3   : > { %997 = vst.msk [vmem:[#allocation2 + $0x4] sm:$0xf] %vm995_vm11, %v962_v20  ;;  %v929_v39 = vrot.slane %v928_v28, 4  ;;  %v1357_v28 = vshll.u32 %v3945_v19, 16  ;;  %v3969_v57 = vrot.slane %v3959_v60, 9  ;;  %v1495_v19 = vrot.slane %v1493_v11, 4 }
  0xb4   : > { %696 = vrot.lane.b32.xlu1 %v673_v15, %s5722_s9  ;;  %v964_v26 = vpop.permute.xlu0 %963  ;;  %v1333_v15 = vshll.u32 %v3942_v6, 16  ;;  %v1326_v20 = vrot.slane %v1324_v8, 4  ;;  %s5271_s9 = scalar_lea.vmem [#allocation9], %s5726_s16 }
  0xb5   : > { %998 = vst.msk [vmem:[#allocation2 + $0x8] sm:$0xf] %vm995_vm11, %v964_v26  ;;  %v934_v50 = vsel %vm4700_vm5, %v929_v39, %v933_v40  ;;  %v1343_v39 = vshll.u32 %v3943_v31, 16  ;;  %v1359_v40 = vrot.slane %v1357_v28, 5 }
  0xb6   : > { %v966_v32 = vpop.permute.xlu1 %965  ;;  %764 = vrot.lane.b32.xlu0 %v3871_v22, %s5723_s15  ;;  %v1348_v22 = vshrl.u32 %v3944_v13, 16  ;;  %v1335_v26 = vrot.slane %v1333_v15, 5  ;;  %v1330_v33 = vor.u32 %v1329_v21, %v1326_v20 }
  0xb7   : > { %999 = vst.msk [vmem:[#allocation2 + $0xc] sm:$0xf] %vm995_vm11, %v966_v32  ;;  %v3925_v32 = vld [vmem:[%s4665_s18 + $0x48] sm:$0xf]  ;;  %v1345_v51 = vrot.slane %v1343_v39, 5  ;;  %v1364_v52 = vor.u32 %v1363_v41, %v1359_v40 }
  0xb8   : > { %766 = vrot.lane.b32.xlu1 %v3872_v27, %s5723_s15  ;;  %v1087_v37 = vpop.permute.xlu0 %1086  ;;  %v1339_v27 = vrot.slane %v1337_v16, 4 }
  0xb9   : > { %1123 = vst.msk [vmem:[#allocation2] sm:$0xf] %vm1122_vm12, %v1087_v37  ;;  %v3926_v37 = vld [vmem:[%s4665_s18 + $0x4c] sm:$0xf]  ;;  %v1365_v62 = vrot.slane %v1364_v52, 4 }
  0xba   : > { %v1089_v43 = vpop.permute.xlu1 %1088  ;;  %768 = vrot.lane.b32.xlu0 %v3873_v34, %s5723_s15  ;;  %v1350_v34 = vrot.slane %v1348_v22, 4 }
  0xbb   : > { %1124 = vst.msk [vmem:[#allocation2 + $0x4] sm:$0xf] %vm1122_vm12, %v1089_v43  ;;  %v3946_v43 = vld [vmem:[%s4665_s18 + $0x5c] sm:$0x1] }
  0xbc   : > { %770 = vrot.lane.b32.xlu1 %v3874_v38, %s5723_s15  ;;  %v1091_v48 = vpop.permute.xlu0 %1090  ;;  %v1340_v38 = vor.u32 %v1339_v27, %v1335_v26  ;;  %v1354_v47 = vor.u32 %v1353_v35, %v1350_v34  ;;  %v1367_v53 = vshll.u32 %v3946_v43, 16 }
  0xbd   : > { %1125 = vst.msk [vmem:[#allocation2 + $0x8] sm:$0xf] %vm1122_vm12, %v1091_v48 }
  0xbe   : > { %v1093_v55 = vpop.permute.xlu1 %1092  ;;  %975 = vrot.lane.b32.xlu0 %v924_v46, %s4527_s23  ;;  %v1331_v46 = vrot.slane %v1330_v33, 4  ;;  %v1369_v63 = vrot.slane %v1367_v53, 5 }
  0xbf   : > { %1126 = vst.msk [vmem:[#allocation2 + $0xc] sm:$0xf] %vm1122_vm12, %v1093_v55  ;;  %v3960_v55 = vld [vmem:[%s4665_s18 + $0x4c] sm:$0xf] }
  0xc0   : > { %977 = vrot.lane.b32.xlu1 %v934_v50, %s4527_s23  ;;  %v1161_v61 = vpop.permute.xlu0 %1160  ;;  %v1341_v50 = vrot.slane %v1340_v38, 4  ;;  %v1336_v58 = vsel %vm4700_vm5, %v1331_v46, %v1335_v26  ;;  %v1370_v8 = vsel %vm4700_vm5, %v1365_v62, %v1369_v63 }
  0xc1   : > { %1197 = vst.msk [vmem:[#allocation2] sm:$0xf] %vm1196_vm13, %v1161_v61 }
  0xc2   : > { %v1163_v5 = vpop.permute.xlu1 %1162  ;;  %979 = vrot.lane.b32.xlu0 %v948_v56, %s4527_s23  ;;  %v1355_v56 = vrot.slane %v1354_v47, 4  ;;  %v1346_v61 = vsel %vm4700_vm5, %v1341_v50, %v1345_v51 }
  0xc3   : > { %1198 = vst.msk [vmem:[#allocation2 + $0x4] sm:$0xf] %vm1196_vm13, %v1163_v5 }
  0xc4   : > { %981 = vrot.lane.b32.xlu1 %v958_v0, %s4527_s23  ;;  %v1165_v10 = vpop.permute.xlu0 %1164  ;;  %v1486_v0 = vrot.slane %v3960_v55, 5  ;;  %v1360_v5 = vsel %vm4700_vm5, %v1355_v56, %v1359_v40 }
  0xc5   : > { %1199 = vst.msk [vmem:[#allocation2 + $0x8] sm:$0xf] %vm1196_vm13, %v1165_v10  ;;  %v1489_v10 = vrot.slane %v3961_v2, 5  ;;  %v4532_v2 = vmov 0  }
  0xc6   : > { %v1167_v17 = vpop.permute.xlu1 %1166  ;;  %1102 = vrot.lane.b32.xlu0 %v1075_v7, %s4528_s24  ;;  %v3962_v7 = vld [vmem:[%s4665_s18 + $0x54] sm:$0xe]  ;;  %v1488_v9 = vrot.slane %v1486_v0, 4  ;;  %v1487_v15 = vsel %vm4673_vm4, %v3969_v57, %v1486_v0  ;;  %1764 = vst.msk [vmem:[#allocation3] sm:$0xf] %vm1763_vm1, %v4532_v2 }
  0xc7   : > { %1200 = vst.msk [vmem:[#allocation2 + $0xc] sm:$0xf] %vm1196_vm13, %v1167_v17  ;;  %v3970_v16 = vrot.slane %v3962_v7, 9 }
  0xc8   : > { %1104 = vrot.lane.b32.xlu1 %v1078_v14, %s4528_s24  ;;  %v1372_v24 = vpop.permute.xlu0 %1371  ;;  %v3964_v14 = vld [vmem:[%s4665_s18 + $0x5c] sm:$0x1]  ;;  %1765 = vst.msk [vmem:[#allocation3 + $0x10] sm:$0xf] %vm1763_vm1, %v4532_v2  ;;  %1766 = vst.msk [vmem:[#allocation3 + $0x20] sm:$0xf] %vm1763_vm1, %v4532_v2 }
  0xc9   : > { %1408 = vst.msk [vmem:[#allocation2] sm:$0xf] %vm1407_vm14, %v1372_v24  ;;  %v1496_v20 = vrot.slane %v3964_v14, 5  ;;  %v1494_v22 = vsel %vm4673_vm4, %v3970_v16, %v1493_v11 }
  0xca   : > { %v1374_v30 = vpop.permute.xlu1 %1373  ;;  %1106 = vrot.lane.b32.xlu0 %v1082_v18, %s4528_s24  ;;  %v1490_v18 = vsel %vm4673_vm4, %v1488_v9, %v1489_v10  ;;  %1767 = vst.msk [vmem:[#allocation3 + $0x30] sm:$0xf] %vm1763_vm1, %v4532_v2  ;;  %1768 = vst.msk [vmem:[#allocation3 + $0x40] sm:$0xf] %vm1763_vm1, %v4532_v2 }
  0xcb   : > { %1409 = vst.msk [vmem:[#allocation2 + $0x4] sm:$0xf] %vm1407_vm14, %v1374_v30  ;;  %v1497_v24 = vsel %vm4673_vm4, %v1495_v19, %v1496_v20 }
  0xcc   : > { %1108 = vrot.lane.b32.xlu1 %v1085_v25, %s4528_s24  ;;  %v1376_v36 = vpop.permute.xlu0 %1375  ;;  %1769 = vst.msk [vmem:[#allocation3 + $0x50] sm:$0xf] %vm1763_vm1, %v4532_v2  ;;  %1770 = vst.msk [vmem:[#allocation3 + $0xc] sm:$0xf] %vm1763_vm1, %v4532_v2 }
  0xcd   : > { %1410 = vst.msk [vmem:[#allocation2 + $0x8] sm:$0xf] %vm1407_vm14, %v1376_v36 }
  0xce   : > { %v1378_v42 = vpop.permute.xlu1 %1377  ;;  %1176 = vrot.lane.b32.xlu0 %v3925_v32, %s4529_s26  ;;  %1771 = vst.msk [vmem:[#allocation3 + $0x1c] sm:$0xf] %vm1763_vm1, %v4532_v2  ;;  %1772 = vst.msk [vmem:[#allocation3 + $0x2c] sm:$0xf] %vm1763_vm1, %v4532_v2 }
  0xcf   : > { %1411 = vst.msk [vmem:[#allocation2 + $0xc] sm:$0xf] %vm1407_vm14, %v1378_v42 }
  0xd0   : > { %1178 = vrot.lane.b32.xlu1 %v3926_v37, %s4529_s26  ;;  %v1499_v48 = vpop.permute.xlu0 %1498  ;;  %1773 = vst.msk [vmem:[#allocation3 + $0x3c] sm:$0xf] %vm1763_vm1, %v4532_v2  ;;  %1774 = vst.msk [vmem:[#allocation3 + $0x4c] sm:$0xf] %vm1763_vm1, %v4532_v2 }
  0xd1   : > { %1535 = vst.msk [vmem:[#allocation2] sm:$0xf] %vm1534_vm15, %v1499_v48 }
  0xd2   : > { %v1501_v54 = vpop.permute.xlu1 %1500  ;;  %1180 = vrot.lane.b32.xlu0 %v3927_v45, %s4529_s26  ;;  %1775 = vst.msk [vmem:[#allocation3 + $0x5c] sm:$0xf] %vm1763_vm1, %v4532_v2 }
  0xd3   : > { %1536 = vst.msk [vmem:[#allocation2 + $0x4] sm:$0xf] %vm1534_vm15, %v1501_v54 }
  0xd4   : > { %1182 = vrot.lane.b32.xlu1 %v3928_v49, %s4529_s26  ;;  %v553_v59 = vpop.permute.xlu0 %552 }
  0xd5   : > { %585 = vst.msk [vmem:[#allocation2 + $0x10] sm:$0xf] %vm580_vm8, %v553_v59 }
  0xd6   : > { %v555_v1 = vpop.permute.xlu1 %554  ;;  %1387 = vrot.lane.b32.xlu0 %v1336_v58, %s5720_s22 }
  0xd7   : > { %586 = vst.msk [vmem:[#allocation2 + $0x14] sm:$0xf] %vm580_vm8, %v555_v1 }
  0xd8   : > { %1389 = vrot.lane.b32.xlu1 %v1346_v61, %s5720_s22  ;;  %v1503_v6 = vpop.permute.xlu0 %1502 }
  0xd9   : > { %1537 = vst.msk [vmem:[#allocation2 + $0x8] sm:$0xf] %vm1534_vm15, %v1503_v6 }
  0xda   : > { %v1505_v12 = vpop.permute.xlu1 %1504  ;;  %1391 = vrot.lane.b32.xlu0 %v1360_v5, %s5720_s22  ;;  %v4381_v13 = vld [vmem:[#allocation2] sm:$0xff]  }
  0xdb   : > { %1538 = vst.msk [vmem:[#allocation2 + $0xc] sm:$0xf] %vm1534_vm15, %v1505_v12  ;;  %4173 = vmatprep.mubr.msk.bf16.mxu0 %vm1609_vm0, %v4381_v13 }
  0xdc   : > { %1393 = vrot.lane.b32.xlu1 %v1370_v8, %s5720_s22  ;;  %v557_v17 = vpop.permute.xlu0 %556 }
  0xdd   : > { %587 = vst.msk [vmem:[#allocation2 + $0x18] sm:$0xf] %vm580_vm8, %v557_v17 }
  0xde   : > { %v559_v21 = vpop.permute.xlu1 %558  ;;  %1514 = vrot.lane.b32.xlu0 %v1487_v15, %s4531_s21 }
  0xdf   : > { %588 = vst.msk [vmem:[#allocation2 + $0x1c] sm:$0xf] %vm580_vm8, %v559_v21 }
  0xe0   : > { %1516 = vrot.lane.b32.xlu1 %v1490_v18, %s4531_s21  ;;  %v683_v23 = vpop.permute.xlu0 %682 }
  0xe1   : > { %715 = vst.msk [vmem:[#allocation2 + $0x10] sm:$0xf] %vm710_vm9, %v683_v23 }
  0xe2   : > { %v685_v25 = vpop.permute.xlu1 %684  ;;  %1518 = vrot.lane.b32.xlu0 %v1494_v22, %s4531_s21  ;;  %v4383_v26 = vld [vmem:[#allocation2 + $0x8] sm:$0xff]  }
  0xe3   : > { %716 = vst.msk [vmem:[#allocation2 + $0x14] sm:$0xf] %vm710_vm9, %v685_v25  ;;  %4174 = vmatmul.mubr.msk.bf16.vlgmr.msra.gmra.mxu0 %vm1609_vm0, %v4383_v26 }
  0xe4   : > { %1520 = vrot.lane.b32.xlu1 %v1497_v24, %s4531_s21  ;;  %v687_v27 = vpop.permute.xlu0 %686  ;;  %s5725_s21 = sshll.u32 %s4788_s17, 3 }
  0xe5   : > { %717 = vst.msk [vmem:[#allocation2 + $0x18] sm:$0xf] %vm710_vm9, %v687_v27  ;;  %v5222_v27 = vld [vmem:[%s5724_s2] ss:$0 sm:$0xff]  ;;  %s5267_s22 = scalar_lea.vmem [#allocation7], %s5725_s21 }
  0xe6   : > { %v689_v28 = vpop.permute.xlu1 %688 }
  0xe7   : > { %718 = vst.msk [vmem:[#allocation2 + $0x1c] sm:$0xf] %vm710_vm9, %v689_v28 }
  0xe8   : > { %v757_v29 = vpop.permute.xlu0 %756 }
  0xe9   : > { %789 = vst.msk [vmem:[#allocation2 + $0x10] sm:$0xf] %vm784_vm10, %v757_v29  ;;  %v5227_v29 = vld [vmem:[%s5693_s3] ss:$0 sm:$0xff] }
  0xea   : > { %v759_v4 = vpop.permute.xlu1 %758 }
  0xeb   : > { %790 = vst.msk [vmem:[#allocation2 + $0x14] sm:$0xf] %vm784_vm10, %v759_v4 }
  0xec   : > { %v761_v30 = vpop.permute.xlu0 %760 }
  0xed   : > { %791 = vst.msk [vmem:[#allocation2 + $0x18] sm:$0xf] %vm784_vm10, %v761_v30 }
  0xee   : > { %v763_v31 = vpop.permute.xlu1 %762 }
  0xef   : > { %792 = vst.msk [vmem:[#allocation2 + $0x1c] sm:$0xf] %vm784_vm10, %v763_v31 }
  0xf0   : > { %v968_v32 = vpop.permute.xlu0 %967 }
  0xf1   : > { %1000 = vst.msk [vmem:[#allocation2 + $0x10] sm:$0xf] %vm995_vm11, %v968_v32 }
  0xf2   : > { %v970_v33 = vpop.permute.xlu1 %969 }
  0xf3   : > { %1001 = vst.msk [vmem:[#allocation2 + $0x14] sm:$0xf] %vm995_vm11, %v970_v33 }
  0xf4   : > { %v972_v34 = vpop.permute.xlu0 %971 }
  0xf5   : > { %1002 = vst.msk [vmem:[#allocation2 + $0x18] sm:$0xf] %vm995_vm11, %v972_v34 }
  0xf6   : > { %v974_v35 = vpop.permute.xlu1 %973 }
  0xf7   : > { %1003 = vst.msk [vmem:[#allocation2 + $0x1c] sm:$0xf] %vm995_vm11, %v974_v35 }
  0xf8   : > { %v1095_v36 = vpop.permute.xlu0 %1094 }
  0xf9   : > { %1127 = vst.msk [vmem:[#allocation2 + $0x10] sm:$0xf] %vm1122_vm12, %v1095_v36 }
  0xfa   : > { %v1097_v37 = vpop.permute.xlu1 %1096 }
  0xfb   : > { %1128 = vst.msk [vmem:[#allocation2 + $0x14] sm:$0xf] %vm1122_vm12, %v1097_v37 }
  0xfc   : > { %v1099_v38 = vpop.permute.xlu0 %1098 }
  0xfd   : > { %1129 = vst.msk [vmem:[#allocation2 + $0x18] sm:$0xf] %vm1122_vm12, %v1099_v38 }
  0xfe   : > { %v1101_v39 = vpop.permute.xlu1 %1100 }
  0xff   : > { %1130 = vst.msk [vmem:[#allocation2 + $0x1c] sm:$0xf] %vm1122_vm12, %v1101_v39 }
 0x100   : > { %v1169_v40 = vpop.permute.xlu0 %1168 }
 0x101   : > { %1201 = vst.msk [vmem:[#allocation2 + $0x10] sm:$0xf] %vm1196_vm13, %v1169_v40 }
 0x102   : > { %v1171_v41 = vpop.permute.xlu1 %1170 }
 0x103   : > { %1202 = vst.msk [vmem:[#allocation2 + $0x14] sm:$0xf] %vm1196_vm13, %v1171_v41 }
 0x104   : > { %v1173_v42 = vpop.permute.xlu0 %1172 }
 0x105   : > { %1203 = vst.msk [vmem:[#allocation2 + $0x18] sm:$0xf] %vm1196_vm13, %v1173_v42 }
 0x106   : > { %v1175_v43 = vpop.permute.xlu1 %1174 }
 0x107   : > { %1204 = vst.msk [vmem:[#allocation2 + $0x1c] sm:$0xf] %vm1196_vm13, %v1175_v43 }
 0x108   : > { %v1380_v45 = vpop.permute.xlu0 %1379 }
 0x109   : > { %1412 = vst.msk [vmem:[#allocation2 + $0x10] sm:$0xf] %vm1407_vm14, %v1380_v45 }
 0x10a   : > { %v1382_v46 = vpop.permute.xlu1 %1381 }
 0x10b   : > { %1413 = vst.msk [vmem:[#allocation2 + $0x14] sm:$0xf] %vm1407_vm14, %v1382_v46 }
 0x10c   : > { %v1384_v47 = vpop.permute.xlu0 %1383 }
 0x10d   : > { %1414 = vst.msk [vmem:[#allocation2 + $0x18] sm:$0xf] %vm1407_vm14, %v1384_v47 }
 0x10e   : > { %v1386_v48 = vpop.permute.xlu1 %1385 }
 0x10f   : > { %1415 = vst.msk [vmem:[#allocation2 + $0x1c] sm:$0xf] %vm1407_vm14, %v1386_v48 }
 0x110   : > { %v1507_v49 = vpop.permute.xlu0 %1506 }
 0x111   : > { %1539 = vst.msk [vmem:[#allocation2 + $0x10] sm:$0xf] %vm1534_vm15, %v1507_v49 }
 0x112   : > { %v1509_v50 = vpop.permute.xlu1 %1508 }
 0x113   : > { %1540 = vst.msk [vmem:[#allocation2 + $0x14] sm:$0xf] %vm1534_vm15, %v1509_v50 }
 0x114   : > { %v561_v51 = vpop.permute.xlu0 %560 }
 0x115   : > { %589 = vst.msk [vmem:[#allocation2 + $0x20] sm:$0xf] %vm580_vm8, %v561_v51 }
 0x116   : > { %v563_v52 = vpop.permute.xlu1 %562 }
 0x117   : > { %590 = vst.msk [vmem:[#allocation2 + $0x24] sm:$0xf] %vm580_vm8, %v563_v52 }
 0x118   : > { %v1511_v53 = vpop.permute.xlu0 %1510 }
 0x119   : > { %1541 = vst.msk [vmem:[#allocation2 + $0x18] sm:$0xf] %vm1534_vm15, %v1511_v53 }
 0x11a   : > { %v1513_v54 = vpop.permute.xlu1 %1512  ;;  %v4384_v55 = vld [vmem:[#allocation2 + $0x10] sm:$0xff]  }
 0x11b   : > { %1542 = vst.msk [vmem:[#allocation2 + $0x1c] sm:$0xf] %vm1534_vm15, %v1513_v54  ;;  %4177 = vmatprep.mubr.msk.bf16.mxu0 %vm1609_vm0, %v4384_v55 }
 0x11c   : > { %v565_v58 = vpop.permute.xlu0 %564 }
 0x11d   : > { %591 = vst.msk [vmem:[#allocation2 + $0x28] sm:$0xf] %vm580_vm8, %v565_v58 }
 0x11e   : > { %v567_v56 = vpop.permute.xlu1 %566 }
 0x11f   : > { %592 = vst.msk [vmem:[#allocation2 + $0x2c] sm:$0xf] %vm580_vm8, %v567_v56 }
 0x120   : > { %v691_v59 = vpop.permute.xlu0 %690 }
 0x121   : > { %719 = vst.msk [vmem:[#allocation2 + $0x20] sm:$0xf] %vm710_vm9, %v691_v59 }
 0x122   : > { %v693_v60 = vpop.permute.xlu1 %692  ;;  %v4385_v61 = vld [vmem:[#allocation2 + $0x18] sm:$0xff]  }
 0x123   : > { %720 = vst.msk [vmem:[#allocation2 + $0x24] sm:$0xf] %vm710_vm9, %v693_v60  ;;  %4178 = vmatmul.mubr.msk.bf16.gmra.mxu0 %vm1609_vm0, %v4385_v61 }
 0x124   : > { %v695_v62 = vpop.permute.xlu0 %694 }
 0x125   : > { %721 = vst.msk [vmem:[#allocation2 + $0x28] sm:$0xf] %vm710_vm9, %v695_v62 }
 0x126   : > { %v697_v63 = vpop.permute.xlu1 %696 }
 0x127   : > { %722 = vst.msk [vmem:[#allocation2 + $0x2c] sm:$0xf] %vm710_vm9, %v697_v63 }
 0x128   : > { %v765_v0 = vpop.permute.xlu0 %764 }
 0x129   : > { %793 = vst.msk [vmem:[#allocation2 + $0x20] sm:$0xf] %vm784_vm10, %v765_v0 }
 0x12a   : > { %v767_v1 = vpop.permute.xlu1 %766 }
 0x12b   : > { %794 = vst.msk [vmem:[#allocation2 + $0x24] sm:$0xf] %vm784_vm10, %v767_v1 }
 0x12c   : > { %v769_v3 = vpop.permute.xlu0 %768 }
 0x12d   : > { %795 = vst.msk [vmem:[#allocation2 + $0x28] sm:$0xf] %vm784_vm10, %v769_v3 }
 0x12e   : > { %v771_v5 = vpop.permute.xlu1 %770 }
 0x12f   : > { %796 = vst.msk [vmem:[#allocation2 + $0x2c] sm:$0xf] %vm784_vm10, %v771_v5 }
 0x130   : > { %v976_v57 = vpop.permute.xlu0 %975 }
 0x131   : > { %1004 = vst.msk [vmem:[#allocation2 + $0x20] sm:$0xf] %vm995_vm11, %v976_v57 }
 0x132   : > { %v978_v6 = vpop.permute.xlu1 %977 }
 0x133   : > { %1005 = vst.msk [vmem:[#allocation2 + $0x24] sm:$0xf] %vm995_vm11, %v978_v6 }
 0x134   : > { %v980_v7 = vpop.permute.xlu0 %979 }
 0x135   : > { %1006 = vst.msk [vmem:[#allocation2 + $0x28] sm:$0xf] %vm995_vm11, %v980_v7 }
 0x136   : > { %v982_v8 = vpop.permute.xlu1 %981 }
 0x137   : > { %1007 = vst.msk [vmem:[#allocation2 + $0x2c] sm:$0xf] %vm995_vm11, %v982_v8 }
 0x138   : > { %v1103_v9 = vpop.permute.xlu0 %1102 }
 0x139   : > { %1131 = vst.msk [vmem:[#allocation2 + $0x20] sm:$0xf] %vm1122_vm12, %v1103_v9 }
 0x13a   : > { %v1105_v10 = vpop.permute.xlu1 %1104 }
 0x13b   : > { %1132 = vst.msk [vmem:[#allocation2 + $0x24] sm:$0xf] %vm1122_vm12, %v1105_v10 }
 0x13c   : > { %v1107_v11 = vpop.permute.xlu0 %1106 }
 0x13d   : > { %1133 = vst.msk [vmem:[#allocation2 + $0x28] sm:$0xf] %vm1122_vm12, %v1107_v11 }
 0x13e   : > { %v1109_v12 = vpop.permute.xlu1 %1108 }
 0x13f   : > { %1134 = vst.msk [vmem:[#allocation2 + $0x2c] sm:$0xf] %vm1122_vm12, %v1109_v12 }
 0x140   : > { %v1177_v13 = vpop.permute.xlu0 %1176 }
 0x141   : > { %1205 = vst.msk [vmem:[#allocation2 + $0x20] sm:$0xf] %vm1196_vm13, %v1177_v13 }
 0x142   : > { %v1179_v14 = vpop.permute.xlu1 %1178 }
 0x143   : > { %1206 = vst.msk [vmem:[#allocation2 + $0x24] sm:$0xf] %vm1196_vm13, %v1179_v14 }
 0x144   : > { %v1181_v15 = vpop.permute.xlu0 %1180 }
 0x145   : > { %1207 = vst.msk [vmem:[#allocation2 + $0x28] sm:$0xf] %vm1196_vm13, %v1181_v15 }
 0x146   : > { %v1183_v16 = vpop.permute.xlu1 %1182 }
 0x147   : > { %1208 = vst.msk [vmem:[#allocation2 + $0x2c] sm:$0xf] %vm1196_vm13, %v1183_v16 }
 0x148   : > { %v1388_v17 = vpop.permute.xlu0 %1387 }
 0x149   : > { %1416 = vst.msk [vmem:[#allocation2 + $0x20] sm:$0xf] %vm1407_vm14, %v1388_v17 }
 0x14a   : > { %v1390_v18 = vpop.permute.xlu1 %1389 }
 0x14b   : > { %1417 = vst.msk [vmem:[#allocation2 + $0x24] sm:$0xf] %vm1407_vm14, %v1390_v18 }
 0x14c   : > { %v1392_v19 = vpop.permute.xlu0 %1391 }
 0x14d   : > { %1418 = vst.msk [vmem:[#allocation2 + $0x28] sm:$0xf] %vm1407_vm14, %v1392_v19 }
 0x14e   : > { %v1394_v20 = vpop.permute.xlu1 %1393 }
 0x14f   : > { %1419 = vst.msk [vmem:[#allocation2 + $0x2c] sm:$0xf] %vm1407_vm14, %v1394_v20 }
 0x150   : > { %v1515_v21 = vpop.permute.xlu0 %1514 }
 0x151   : > { %1543 = vst.msk [vmem:[#allocation2 + $0x20] sm:$0xf] %vm1534_vm15, %v1515_v21 }
 0x152   : > { %v1517_v22 = vpop.permute.xlu1 %1516 }
 0x153   : > { %1544 = vst.msk [vmem:[#allocation2 + $0x24] sm:$0xf] %vm1534_vm15, %v1517_v22 }
 0x154   : > { %v1519_v23 = vpop.permute.xlu0 %1518 }
 0x155   : > { %1545 = vst.msk [vmem:[#allocation2 + $0x28] sm:$0xf] %vm1534_vm15, %v1519_v23 }
 0x156   : > { %v1521_v24 = vpop.permute.xlu1 %1520 }
 0x157   : > { %1546 = vst.msk [vmem:[#allocation2 + $0x2c] sm:$0xf] %vm1534_vm15, %v1521_v24 }
 0x15a   : > { %v4386_v25 = vld [vmem:[#allocation2 + $0x20] sm:$0xff]  }
 0x15b   : > { %4181 = vmatprep.mubr.msk.bf16.mxu0 %vm1609_vm0, %v4386_v25 }
 0x15e   : > { %v4387_v26 = vld [vmem:[#allocation2 + $0x28] sm:$0xff]  }
 0x15f   : > { %4182 = vmatmul.mubr.msk.bf16.gmra.mxu0 %vm1609_vm0, %v4387_v26 }
 0x1a3   : > { %v4175_v28 = vpop.f32.mrf.mxu0 }
 0x1a4   : > { %v1722_v4 = vmul.f32 %v4175_v28, %v5222_v27 }
 0x1a5   : > { %v1666_v30 = vpop.f32.mrf.mxu0 }
 0x1a6   : > { %v1741_v31 = vadd.f32 %v5227_v29, %v1722_v4  ;;  %v1720_v32 = vmul.f32 %v5222_v27, %v1666_v30 }
 0x1a7   : > { %v4176_v33 = vpop.f32.mrf.mxu0 }
 0x1a8   : > { %v1753_v34 = vmax.f32 %v1741_v31, 0.0  ;;  %v1739_v35 = vadd.f32 %v5227_v29, %v1720_v32  ;;  %v1723_v36 = vmul.f32 %v4176_v33, %v5222_v27 }
 0x1a9   : > { %v1669_v37 = vpop.f32.mrf.mxu0 }
 0x1aa   : > { %v4101_v38 = vpack.c.bf16 %v1753_v34, %v1753_v34  ;;  %v1751_v39 = vmax.f32 %v1739_v35, 0.0  ;;  %v1742_v40 = vadd.f32 %v5227_v29, %v1723_v36  ;;  %v1721_v41 = vmul.f32 %v5222_v27, %v1669_v37 }
 0x1ac   : > { %1826 = vst.msk [vmem:[#allocation3 + $0x14] sm:$0xf] %vm1763_vm1, %v4101_v38  ;;  %v4099_v42 = vpack.c.bf16 %v1751_v39, %v1751_v39  ;;  %v1754_v43 = vmax.f32 %v1742_v40, 0.0  ;;  %v1740_v45 = vadd.f32 %v5227_v29, %v1721_v41 }
 0x1ae   : > { %1824 = vst.msk [vmem:[#allocation3 + $0x4] sm:$0xf] %vm1763_vm1, %v4099_v42  ;;  %v4102_v46 = vpack.c.bf16 %v1754_v43, %v1754_v43  ;;  %v1752_v47 = vmax.f32 %v1740_v45, 0.0 }
 0x1b0   : > { %1827 = vst.msk [vmem:[#allocation3 + $0x18] sm:$0xf] %vm1763_vm1, %v4102_v46  ;;  %v4100_v48 = vpack.c.bf16 %v1752_v47, %v1752_v47 }
 0x1b2   : > { %1825 = vst.msk [vmem:[#allocation3 + $0x8] sm:$0xf] %vm1763_vm1, %v4100_v48 }
 0x1e3   : > { %v4179_v49 = vpop.f32.mrf.mxu0 }
 0x1e4   : > { %v1726_v50 = vmul.f32 %v4179_v49, %v5222_v27 }
 0x1e5   : > { %v1682_v51 = vpop.f32.mrf.mxu0 }
 0x1e6   : > { %v1745_v52 = vadd.f32 %v5227_v29, %v1726_v50  ;;  %v1724_v53 = vmul.f32 %v5222_v27, %v1682_v51 }
 0x1e7   : > { %v4180_v54 = vpop.f32.mrf.mxu0 }
 0x1e8   : > { %v1757_v55 = vmax.f32 %v1745_v52, 0.0  ;;  %v1743_v58 = vadd.f32 %v5227_v29, %v1724_v53  ;;  %v1727_v56 = vmul.f32 %v4180_v54, %v5222_v27 }
 0x1e9   : > { %v1685_v59 = vpop.f32.mrf.mxu0 }
 0x1ea   : > { %v4105_v60 = vpack.c.bf16 %v1757_v55, %v1757_v55  ;;  %v1755_v61 = vmax.f32 %v1743_v58, 0.0  ;;  %v1746_v62 = vadd.f32 %v5227_v29, %v1727_v56  ;;  %v1725_v63 = vmul.f32 %v5222_v27, %v1685_v59 }
 0x1ec   : > { %1830 = vst.msk [vmem:[#allocation3 + $0x34] sm:$0xf] %vm1763_vm1, %v4105_v60  ;;  %v4103_v0 = vpack.c.bf16 %v1755_v61, %v1755_v61  ;;  %v1758_v1 = vmax.f32 %v1746_v62, 0.0  ;;  %v1744_v3 = vadd.f32 %v5227_v29, %v1725_v63 }
 0x1ee   : > { %1828 = vst.msk [vmem:[#allocation3 + $0x24] sm:$0xf] %vm1763_vm1, %v4103_v0  ;;  %v4106_v5 = vpack.c.bf16 %v1758_v1, %v1758_v1  ;;  %v1756_v57 = vmax.f32 %v1744_v3, 0.0 }
 0x1f0   : > { %1831 = vst.msk [vmem:[#allocation3 + $0x38] sm:$0xf] %vm1763_vm1, %v4106_v5  ;;  %v4104_v6 = vpack.c.bf16 %v1756_v57, %v1756_v57 }
 0x1f2   : > { %1829 = vst.msk [vmem:[#allocation3 + $0x28] sm:$0xf] %vm1763_vm1, %v4104_v6 }
 0x21f   : > { %v4183_v7 = vpop.f32.mrf.mxu0 }
 0x220   : > { %v1730_v8 = vmul.f32 %v4183_v7, %v5222_v27 }
 0x221   : > { %v1698_v9 = vpop.f32.mrf.mxu0 }
 0x222   : > { %v1749_v10 = vadd.f32 %v5227_v29, %v1730_v8  ;;  %v1728_v11 = vmul.f32 %v5222_v27, %v1698_v9 }
 0x223   : > { %v4184_v12 = vpop.f32.mrf.mxu0 }
 0x224   : > { %v1761_v13 = vmax.f32 %v1749_v10, 0.0  ;;  %v1747_v14 = vadd.f32 %v5227_v29, %v1728_v11  ;;  %v1731_v15 = vmul.f32 %v4184_v12, %v5222_v27 }
 0x225   : > { %v1701_v16 = vpop.f32.mrf.mxu0 }
 0x226   : > { %v4109_v17 = vpack.c.bf16 %v1761_v13, %v1761_v13  ;;  %v1759_v18 = vmax.f32 %v1747_v14, 0.0  ;;  %v1750_v19 = vadd.f32 %v5227_v29, %v1731_v15  ;;  %v1729_v20 = vmul.f32 %v5222_v27, %v1701_v16 }
 0x228   : > { %1834 = vst.msk [vmem:[#allocation3 + $0x54] sm:$0xf] %vm1763_vm1, %v4109_v17  ;;  %v4107_v21 = vpack.c.bf16 %v1759_v18, %v1759_v18  ;;  %v1762_v22 = vmax.f32 %v1750_v19, 0.0  ;;  %v1748_v23 = vadd.f32 %v5227_v29, %v1729_v20 }
 0x22a   : > { %1832 = vst.msk [vmem:[#allocation3 + $0x44] sm:$0xf] %vm1763_vm1, %v4107_v21  ;;  %v4110_v24 = vpack.c.bf16 %v1762_v22, %v1762_v22  ;;  %v1760_v25 = vmax.f32 %v1748_v23, 0.0  ;;  %1839 = sbr.rel (%p4000_p13) target bundleno = 562 (0x232), region = 52 }
 0x22c   : > { %1835 = vst.msk [vmem:[#allocation3 + $0x58] sm:$0xf] %vm1763_vm1, %v4110_v24  ;;  %v4108_v26 = vpack.c.bf16 %v1760_v25, %v1760_v25 }
 0x22e   : > { %1833 = vst.msk [vmem:[#allocation3 + $0x48] sm:$0xf] %vm1763_vm1, %v4108_v26 }
 0x22f   : > { %v4533_v27 = vmov 0  }
 0x230   : > { %1840 = vst.msk [vmem:[#allocation3] sm:$0xf] %vm1763_vm1, %v4533_v27  ;;  %1841 = vst.msk [vmem:[#allocation3 + $0x4] sm:$0xf] %vm1763_vm1, %v4533_v27 }
 0x231   : > { %1842 = vst.msk [vmem:[#allocation3 + $0x8] sm:$0xf] %vm1763_vm1, %v4533_v27  ;;  %1843 = vst.msk [vmem:[#allocation3 + $0xc] sm:$0xf] %vm1763_vm1, %v4533_v27 }
 0x232 PF: > { %p4001_p0 = scmp.ne.s32.totalorder %s4506_s30, 3 }
 0x234   : > { %1847 = sbr.rel (%p4001_p0) target bundleno = 572 (0x23c), region = 56 }
 0x239   : > { %v4534_v28 = vmov 0  }
 0x23a   : > { %1849 = vst.msk [vmem:[#allocation3 + $0x50] sm:$0xf] %vm1763_vm1, %v4534_v28  ;;  %1850 = vst.msk [vmem:[#allocation3 + $0x54] sm:$0xf] %vm1763_vm1, %v4534_v28 }
 0x23b   : > { %1851 = vst.msk [vmem:[#allocation3 + $0x58] sm:$0xf] %vm1763_vm1, %v4534_v28  ;;  %1852 = vst.msk [vmem:[#allocation3 + $0x5c] sm:$0xf] %vm1763_vm1, %v4534_v28 }
 0x23c PF: > { %v1956_v29 = vld [vmem:[%s5694_s4] sm:$0xf]  ;;  %vm1982_vm2 = vcmask 1043456   ;;  %v1853_v4 = vld [vmem:[#allocation3] sm:$0x8]  ;;  %vm1969_vm6 = vcmask 64512  }
 0x23d   : > { %4278 = vmatprep.subr.msk.bf16.mxu1 %vm1982_vm2, %v1956_v29  ;;  %v1984_v30 = vsel %vm1982_vm2, %v1956_v29, 0  ;;  %v1854_v31 = vld [vmem:[#allocation3 + $0x4] sm:$0xf]  ;;  %v1855_v32 = vld [vmem:[#allocation3 + $0x8] sm:$0xf]  ;;  %v1869_v33 = vshrl.u32 %v1853_v4, 16 }
 0x23e   : > { %4186 = vmatpush3.bf16.msra.mxu1 %v1984_v30  ;;  %vm1865_vm3 = vsmask.f32 256  ;;  %vm1866_vm4 = vsmask.f32 4368  ;;  %v1874_v34 = vshrl.u32 %v1854_v31, 16  ;;  %v1877_v35 = vshll.u32 %v1854_v31, 16 }
 0x23f   : > { %v1883_v36 = vshrl.u32 %v1855_v32, 16  ;;  %v1886_v37 = vshll.u32 %v1855_v32, 16  ;;  %v2067_v38 = vld [vmem:[%s5694_s4 + $0x4] sm:$0xf]  ;;  %v4002_v39 = vrot.slane %v1869_v33, 11  ;;  %vm5292_vm7 = vmor %vm1865_vm3, %vm1866_vm4  ;;  %s4088_s18 = sshll.u32 %s4506_s30, 2 }
 0x240   : > { %v1876_v40 = vrot.slane %v1874_v34, 7  ;;  %4279 = vmatprep.subr.msk.bf16.mxu1 %vm1982_vm2, %v2067_v38  ;;  %v1856_v41 = vld [vmem:[#allocation3 + $0x10] sm:$0x8]  ;;  %v1857_v42 = vld [vmem:[#allocation3 + $0x14] sm:$0xf]  ;;  %v2101_v19 = vsel %vm1982_vm2, %v2067_v38, 0 }
 0x241   : > { %v1885_v45 = vrot.slane %v1883_v36, 7  ;;  %v1858_v46 = vld [vmem:[#allocation3 + $0x18] sm:$0xf]  ;;  %v1891_v47 = vshrl.u32 %v1856_v41, 16  ;;  %v1896_v48 = vshrl.u32 %v1857_v42, 16  ;;  %v1899_v49 = vshll.u32 %v1857_v42, 16 }
 0x242   : > { %v1879_v50 = vor.u32 %v1877_v35, %v1876_v40  ;;  %v1881_v51 = vrot.slane %v1876_v40, 4  ;;  %v1905_v52 = vshrl.u32 %v1858_v46, 16  ;;  %v1908_v53 = vshll.u32 %v1858_v46, 16  ;;  %v1859_v54 = vld [vmem:[#allocation3 + $0x20] sm:$0x8]  ;;  %s4111_s30 = sshll.u32 %s4658_s13, 7 }
 0x243   : > { %v1888_v55 = vor.u32 %v1886_v37, %v1885_v45  ;;  %v4003_v58 = vrot.slane %v1891_v47, 11  ;;  %v1898_v56 = vrot.slane %v1896_v48, 7  ;;  %v1860_v59 = vld [vmem:[#allocation3 + $0x24] sm:$0xf]  ;;  %v1861_v60 = vld [vmem:[#allocation3 + $0x28] sm:$0xf]  ;;  %s5594_s21 = scalar_lea.hbm %s5697_s7, %s4111_s30 }
 0x244   : > { %v1880_v61 = vsel %vm5292_vm7, %v4002_v39, %v1879_v50  ;;  %v1907_v62 = vrot.slane %v1905_v52, 7  ;;  %v1913_v63 = vshrl.u32 %v1859_v54, 16  ;;  %v1918_v0 = vshrl.u32 %v1860_v59, 16  ;;  %v1862_v1 = vld [vmem:[#allocation3 + $0x30] sm:$0x8]  ;;  %s3715_s23 = sshll.u32 %s5267_s22, 4  ;;  %s5597_s23 = int_to_ptr.vmem [resolvable:$true] %s3715_s23 }
 0x245   : > { %v1889_v3 = vsel %vm5292_vm7, %v1881_v51, %v1888_v55  ;;  %v1901_v5 = vor.u32 %v1899_v49, %v1898_v56  ;;  %v1903_v57 = vrot.slane %v1898_v56, 4  ;;  %v1921_v6 = vshll.u32 %v1860_v59, 16  ;;  %v1863_v7 = vld [vmem:[#allocation3 + $0x34] sm:$0xf]  ;;  %v1864_v8 = vld [vmem:[#allocation3 + $0x38] sm:$0xf] }
 0x246   : > { %v4006_v9 = vcombine.low %v1880_v61, %v1889_v3  ;;  %v1910_v10 = vor.u32 %v1908_v53, %v1907_v62  ;;  %v4004_v11 = vrot.slane %v1913_v63, 11  ;;  %v1920_v12 = vrot.slane %v1918_v0, 7  ;;  %v2300_v17 = vld [vmem:[%s5694_s4 + $0x8] sm:$0xf]  ;;  %v2192_v35 = vld [vmem:[#allocation3 + $0x4] sm:$0xf] }
 0x247   : > { %v1902_v13 = vsel %vm5292_vm7, %v4003_v58, %v1901_v5  ;;  %v1927_v14 = vshrl.u32 %v1861_v60, 16  ;;  %v1930_v15 = vshll.u32 %v1861_v60, 16  ;;  %v1935_v16 = vshrl.u32 %v1862_v1, 16  ;;  %4280 = vmatprep.subr.msk.bf16.mxu0 %vm1982_vm2, %v2300_v17  ;;  %v2193_v36 = vld [vmem:[#allocation3 + $0x8] sm:$0xf]  ;;  %s4112_s16 = sshll.u32 %s4658_s13, 8 }
 0x248   : > { %4187 = vmatprep.mubr.msk.bf16.mxu1 %vm1969_vm6, %v4006_v9  ;;  %v1911_v18 = vsel %vm5292_vm7, %v1903_v57, %v1910_v10  ;;  %v1923_v20 = vor.u32 %v1921_v6, %v1920_v12  ;;  %v1940_v21 = vshrl.u32 %v1863_v7, 16  ;;  %v1925_v23 = vrot.slane %v1920_v12, 4  ;;  %v2194_v38 = vld [vmem:[#allocation3 + $0xc] sm:$0x1]  ;;  %v2195_v48 = vld [vmem:[#allocation3 + $0x14] sm:$0xf]  ;;  %s5605_s24 = scalar_lea.hbm %s5698_s8, %s4112_s16 }
 0x249   : > { %v4007_v22 = vcombine.low %v1902_v13, %v1911_v18  ;;  %v1929_v24 = vrot.slane %v1927_v14, 7  ;;  %v1943_v25 = vshll.u32 %v1863_v7, 16  ;;  %v4005_v26 = vrot.slane %v1935_v16, 11  ;;  %v2196_v49 = vld [vmem:[#allocation3 + $0x18] sm:$0xf]  ;;  %v4388_v58 = vld [vmem:[#allocation3 + $0x4] sm:$0xff]  }
 0x24a   : > { %v1942_v27 = vrot.slane %v1940_v21, 7  ;;  %v1949_v28 = vshrl.u32 %v1864_v8, 16  ;;  %v1952_v29 = vshll.u32 %v1864_v8, 16  ;;  %v1924_v4 = vsel %vm5292_vm7, %v4004_v11, %v1923_v20  ;;  %v2197_v54 = vld [vmem:[#allocation3 + $0x1c] sm:$0x1]  ;;  %s3695_s30 = scalar_lea.sflag [#allocation8], %s4788_s17 }
 0x24b   : > { %4188 = vmatmul.mubr.msk.bf16.vlgmr.msra.gmra.mxu1 %vm1969_vm6, %v4007_v22  ;;  %v1932_v30 = vor.u32 %v1930_v15, %v1929_v24  ;;  %v5314_v31 = vsel %vm1982_vm2, %v2300_v17, 0  ;;  %v2205_v39 = vshrl.u32 %v2192_v35, 16  ;;  %v2208_v40 = vshll.u32 %v2192_v35, 16  ;;  %v2198_v61 = vld [vmem:[#allocation3 + $0x24] sm:$0xf]  ;;  %v4389_v22 = vld [vmem:[#allocation3 + $0x14] sm:$0xff]  }
 0x24c   : > { %4196 = vmatpush3.bf16.msra.mxu1 %v2101_v19  ;;  %v1945_v32 = vor.u32 %v1943_v25, %v1942_v27  ;;  %v1947_v33 = vrot.slane %v1942_v27, 4  ;;  %v1951_v34 = vrot.slane %v1949_v28, 7  ;;  %4206 = vmatpush3.bf16.msra.mxu0 %v5314_v31  ;;  %v2214_v41 = vshll.u32 %v2193_v36, 16  ;;  %v2199_v7 = vld [vmem:[#allocation3 + $0x28] sm:$0xf]  ;;  %s4400_s13 = scalar_lea.vmem %s5597_s23, 128 }
 0x24d   : > { %v1933_v37 = vsel %vm5292_vm7, %v1925_v23, %v1932_v30  ;;  %4281 = vmatprep.subr.msk.bf16.mxu1 %vm1982_vm2, %v2300_v17  ;;  %v2218_v47 = vshrl.u32 %v2193_v36, 16  ;;  %v2207_v50 = vrot.slane %v2205_v39, 4  ;;  %v2210_v51 = vrot.slane %v2208_v40, 5  ;;  %v2200_v15 = vld [vmem:[#allocation3 + $0x2c] sm:$0x1]  ;;  %v4390_v28 = vld [vmem:[#allocation3 + $0x24] sm:$0xff]   ;;  %p4401_p1 = scmp.ne.s32.totalorder %s5597_s23, %s4400_s13 }
 0x24e   : > { %v4008_v42 = vcombine.low %v1924_v4, %v1933_v37  ;;  %v1946_v45 = vsel %vm5292_vm7, %v4005_v26, %v1945_v32  ;;  %v1954_v46 = vor.u32 %v1952_v29, %v1951_v34  ;;  %v2216_v52 = vrot.slane %v2214_v41, 5  ;;  %v2201_v21 = vld [vmem:[#allocation3 + $0x34] sm:$0xf]  ;;  %v2202_v27 = vld [vmem:[#allocation3 + $0x38] sm:$0xf]  ;;  %s4536_s26 = smov [#allocation7]  }
 0x24f   : > { %v2224_v53 = vshll.u32 %v2194_v38, 16  ;;  %v2220_v56 = vrot.slane %v2218_v47, 4  ;;  %v2229_v59 = vshrl.u32 %v2195_v48, 16  ;;  %v2232_v60 = vshll.u32 %v2195_v48, 16  ;;  %v2203_v34 = vld [vmem:[#allocation3 + $0x3c] sm:$0x1]  ;;  %p4402_p2 = pnand %p4401_p1, %p4638_p5 }
 0x250   : > { %4191 = vmatprep.mubr.msk.bf16.mxu1 %vm1969_vm6, %v4008_v42  ;;  %v1955_v55 = vsel %vm5292_vm7, %v1947_v33, %v1954_v46  ;;  %v2211_v63 = vor.u32 %v2210_v51, %v2207_v50  ;;  %v2238_v1 = vshll.u32 %v2196_v49, 16  ;;  %v2242_v6 = vshrl.u32 %v2196_v49, 16  ;;  %v2518_v33 = vld [vmem:[%s5694_s4 + $0xc] sm:$0xf]  ;;  %v2418_v39 = vld [vmem:[#allocation3 + $0x10] sm:$0x8] }
 0x251   : > { %v4009_v62 = vcombine.low %v1946_v45, %v1955_v55  ;;  %v2226_v0 = vrot.slane %v2224_v53, 5  ;;  %v2221_v3 = vor.u32 %v2220_v56, %v2216_v52  ;;  %v2231_v5 = vrot.slane %v2229_v59, 4  ;;  %v2419_v40 = vld [vmem:[#allocation3 + $0x14] sm:$0xf]  ;;  %v2420_v47 = vld [vmem:[#allocation3 + $0x18] sm:$0xf]  ;;  %p4403_p3 = pneg %p4402_p2 }
 0x252   : > { %v2234_v57 = vrot.slane %v2232_v60, 5  ;;  %v2212_v8 = vrot.slane %v2211_v63, 4  ;;  %v2240_v9 = vrot.slane %v2238_v1, 5  ;;  %v2248_v10 = vshll.u32 %v2197_v54, 16  ;;  %v4392_v53 = vld [vmem:[#allocation3 + $0x14] sm:$0xff]   ;;  %s4404_s1 = sshll.u32 %s4536_s26, 4  ;;  %s4405_s1 = int_to_ptr.vmem [resolvable:$false] %s4404_s1 }
 0x253   : > { %4192 = vmatmul.mubr.msk.bf16.gmra.mxu1 %vm1969_vm6, %v4009_v62  ;;  %v2253_v11 = vshrl.u32 %v2198_v61, 16  ;;  %v2222_v12 = vrot.slane %v2221_v3, 4  ;;  %v2244_v14 = vrot.slane %v2242_v6, 4  ;;  %v2256_v16 = vshll.u32 %v2198_v61, 16  ;;  %v2421_v63 = vld [vmem:[#allocation3 + $0x20] sm:$0x8]  ;;  %p4407_p4 = scmp.lt.s32.totalorder %s5597_s23, %s4405_s1 }
 0x254   : > { %4197 = vmatprep.mubr.msk.bf16.mxu1 %vm1969_vm6, %v4388_v58  ;;  %v2235_v13 = vor.u32 %v2234_v57, %v2231_v5  ;;  %v2217_v17 = vsel %vm4700_vm5, %v2212_v8, %v2216_v52  ;;  %v2250_v18 = vrot.slane %v2248_v10, 5  ;;  %v2262_v20 = vshll.u32 %v2199_v7, 16  ;;  %v2643_v52 = vld [vmem:[%s5694_s4 + $0x10] sm:$0xf]  ;;  %v4391_v8 = vld [vmem:[#allocation3 + $0x34] sm:$0xff]   ;;  %s4406_s2 = scalar_lea.vmem %s4405_s1, 256 }
 0x255   : > { %v2255_v19 = vrot.slane %v2253_v11, 4  ;;  %v2227_v23 = vsel %vm4700_vm5, %v2222_v12, %v2226_v0  ;;  %v2245_v25 = vor.u32 %v2244_v14, %v2240_v9  ;;  %v2258_v26 = vrot.slane %v2256_v16, 5  ;;  %4283 = vmatprep.subr.msk.bf16.mxu0 %vm1982_vm2, %v2643_v52  ;;  %p4408_p6 = scmp.lt.s32.totalorder %s4406_s2, %s4400_s13 }
 0x256   : > { %v2236_v24 = vrot.slane %v2235_v13, 4  ;;  %v4022_v29 = vcombine.low %v2217_v17, %v2227_v23  ;;  %v2264_v4 = vrot.slane %v2262_v20, 5  ;;  %v2266_v30 = vshrl.u32 %v2199_v7, 16  ;;  %v2422_v13 = vld [vmem:[#allocation3 + $0x24] sm:$0xf] }
 0x257   : > { %v2272_v32 = vshll.u32 %v2200_v15, 16  ;;  %v2246_v36 = vrot.slane %v2245_v25, 4  ;;  %v2259_v37 = vor.u32 %v2258_v26, %v2255_v19  ;;  %v2277_v38 = vshrl.u32 %v2201_v21, 16  ;;  %v5361_v23 = vld [vmem:[%s5694_s4 + $0x14] sm:$0xf]  ;;  %p4409_p8 = por %p4408_p6, %p4407_p4 }
 0x258   : > { %v2241_v35 = vsel %vm4700_vm5, %v2236_v24, %v2240_v9  ;;  %4207 = vmatprep.mubr.msk.bf16.mxu0 %vm1969_vm6, %v4022_v29  ;;  %v2268_v41 = vrot.slane %v2266_v30, 4  ;;  %v2280_v45 = vshll.u32 %v2201_v21, 16  ;;  %v2286_v46 = vshll.u32 %v2202_v27, 16  ;;  %v2424_v24 = vld [vmem:[#allocation3 + $0x30] sm:$0x8] }
 0x259   : > { %v2274_v42 = vrot.slane %v2272_v32, 5  ;;  %v2251_v48 = vsel %vm4700_vm5, %v2246_v36, %v2250_v18  ;;  %v2260_v49 = vrot.slane %v2259_v37, 4  ;;  %v2279_v50 = vrot.slane %v2277_v38, 4  ;;  %v2423_v18 = vld [vmem:[#allocation3 + $0x28] sm:$0xf]  ;;  %p4410_p9 = pnand %p4409_p8, %p4403_p3 }
 0x25a   : > { %v2290_v51 = vshrl.u32 %v2202_v27, 16  ;;  %v4023_v54 = vcombine.low %v2241_v35, %v2251_v48  ;;  %v2269_v55 = vor.u32 %v2268_v41, %v2264_v4  ;;  %v2282_v58 = vrot.slane %v2280_v45, 5  ;;  %v2425_v29 = vld [vmem:[#allocation3 + $0x34] sm:$0xf]  ;;  %v2427_v35 = vld [vmem:[#allocation3 + $0x40] sm:$0x8] }
 0x25b   : > { %4198 = vmatmul.mubr.msk.bf16.vlgmr.msra.gmra.mxu1 %vm1969_vm6, %v4389_v22  ;;  %v2288_v56 = vrot.slane %v2286_v46, 5  ;;  %v2265_v59 = vsel %vm4700_vm5, %v2260_v49, %v2264_v4  ;;  %v2296_v61 = vshll.u32 %v2203_v34, 16  ;;  %v5349_v62 = vsel %vm1982_vm2, %v2518_v33, 0  ;;  %v2426_v4 = vld [vmem:[#allocation3 + $0x38] sm:$0xf]  ;;  %v4393_v41 = vld [vmem:[#allocation3 + $0x24] sm:$0xff]  }
 0x25c   : > { %4276 = vmatpush3.bf16.msra.mxu1 %v5314_v31  ;;  %4201 = vmatprep.mubr.msk.bf16.mxu1 %vm1969_vm6, %v4390_v28  ;;  %v2292_v60 = vrot.slane %v2290_v51, 4  ;;  %v2270_v0 = vrot.slane %v2269_v55, 4  ;;  %v2283_v1 = vor.u32 %v2282_v58, %v2279_v50  ;;  %v2431_v3 = vshrl.u32 %v2418_v39, 16  ;;  %v2428_v36 = vld [vmem:[#allocation3 + $0x44] sm:$0xf]  ;;  %v4394_v49 = vld [vmem:[#allocation3 + $0x34] sm:$0xff]  }
 0x25d   : > { %4208 = vmatmul.mubr.msk.bf16.vlgmr.msra.gmra.mxu0 %vm1969_vm6, %v4023_v54  ;;  %4282 = vmatprep.subr.msk.bf16.mxu1 %vm1982_vm2, %v2518_v33  ;;  %v2436_v5 = vshrl.u32 %v2419_v40, 16  ;;  %v2298_v57 = vrot.slane %v2296_v61, 5  ;;  %v2439_v6 = vshll.u32 %v2419_v40, 16  ;;  %v2445_v7 = vshrl.u32 %v2420_v47, 16  ;;  %v3094_v55 = vld [vmem:[%s5694_s4 + $0x18] sm:$0xf] }
 0x25e   : > { %v2293_v31 = vor.u32 %v2292_v60, %v2288_v56  ;;  %4227 = vmatprep.mubr.msk.bf16.mxu0 %vm1969_vm6, %v4392_v53  ;;  %v2275_v9 = vsel %vm4700_vm5, %v2270_v0, %v2274_v42  ;;  %v2284_v10 = vrot.slane %v2283_v1, 4  ;;  %v4030_v11 = vrot.slane %v2431_v3, 11  ;;  %v2429_v42 = vld [vmem:[#allocation3 + $0x48] sm:$0xf] }
 0x25f   : > { %v2438_v12 = vrot.slane %v2436_v5, 7  ;;  %v4024_v14 = vcombine.low %v2265_v59, %v2275_v9  ;;  %v2447_v16 = vrot.slane %v2445_v7, 7  ;;  %v2448_v17 = vshll.u32 %v2420_v47, 16 }
 0x260   : > { %v2294_v15 = vrot.slane %v2293_v31, 4  ;;  %v2289_v19 = vsel %vm4700_vm5, %v2284_v10, %v2288_v56  ;;  %v2453_v22 = vshrl.u32 %v2421_v63, 16  ;;  %v2458_v27 = vshrl.u32 %v2422_v13, 16 }
 0x261   : > { %v2441_v20 = vor.u32 %v2439_v6, %v2438_v12  ;;  %v2443_v21 = vrot.slane %v2438_v12, 4  ;;  %v2450_v26 = vor.u32 %v2448_v17, %v2447_v16  ;;  %v2461_v28 = vshll.u32 %v2422_v13, 16  ;;  %v4395_v16 = vld [vmem:[#allocation3 + $0x44] sm:$0xff]  }
 0x262   : > { %v2299_v25 = vsel %vm4700_vm5, %v2294_v15, %v2298_v57  ;;  %v4031_v33 = vrot.slane %v2453_v22, 11  ;;  %v2467_v34 = vshrl.u32 %v2423_v18, 16  ;;  %v2460_v38 = vrot.slane %v2458_v27, 7  ;;  %v2768_v57 = vld [vmem:[#allocation3 + $0x14] sm:$0xf] }
 0x263   : > { %4202 = vmatmul.mubr.msk.bf16.gmra.mxu1 %vm1969_vm6, %v4391_v8  ;;  %v4025_v30 = vcombine.low %v2289_v19, %v2299_v25  ;;  %v2442_v32 = vsel %vm5292_vm7, %v4030_v11, %v2441_v20  ;;  %v2451_v37 = vsel %vm5292_vm7, %v2443_v21, %v2450_v26  ;;  %v2470_v39 = vshll.u32 %v2423_v18, 16  ;;  %v2770_v18 = vld [vmem:[#allocation3 + $0x1c] sm:$0x1]  ;;  %v2771_v25 = vld [vmem:[#allocation3 + $0x24] sm:$0xf] }
 0x264   : > { %4211 = vmatprep.mubr.msk.bf16.mxu1 %vm1969_vm6, %v4024_v14  ;;  %v2677_v40 = vsel %vm1982_vm2, %v2643_v52, 0  ;;  %v4034_v45 = vcombine.low %v2442_v32, %v2451_v37  ;;  %v2469_v46 = vrot.slane %v2467_v34, 7  ;;  %v5374_v47 = vsel %vm1982_vm2, %v5361_v23, 0  ;;  %v2769_v14 = vld [vmem:[#allocation3 + $0x18] sm:$0xf] }
 0x265   : > { %4226 = vmatpush3.bf16.msra.mxu0 %v2677_v40  ;;  %v2475_v48 = vshrl.u32 %v2424_v24, 16  ;;  %v2463_v50 = vor.u32 %v2461_v28, %v2460_v38  ;;  %v2465_v51 = vrot.slane %v2460_v38, 4  ;;  %v2480_v53 = vshrl.u32 %v2425_v29, 16  ;;  %v2773_v34 = vld [vmem:[#allocation3 + $0x2c] sm:$0x1] }
 0x266   : > { %v2483_v54 = vshll.u32 %v2425_v29, 16  ;;  %v2472_v52 = vor.u32 %v2470_v39, %v2469_v46  ;;  %v2489_v56 = vshrl.u32 %v2426_v4, 16  ;;  %v2492_v59 = vshll.u32 %v2426_v4, 16  ;;  %4285 = vmatprep.subr.msk.bf16.mxu0 %vm1982_vm2, %v3094_v55  ;;  %v2772_v4 = vld [vmem:[#allocation3 + $0x28] sm:$0xf] }
 0x267   : > { %v4032_v58 = vrot.slane %v2475_v48, 11  ;;  %v2464_v60 = vsel %vm5292_vm7, %v4031_v33, %v2463_v50  ;;  %v2482_v61 = vrot.slane %v2480_v53, 7  ;;  %v2497_v63 = vshrl.u32 %v2427_v35, 16  ;;  %v2774_v39 = vld [vmem:[#allocation3 + $0x34] sm:$0xf] }
 0x268   : > { %4228 = vmatmul.mubr.msk.bf16.vlgmr.msra.gmra.mxu0 %vm1969_vm6, %v4393_v41  ;;  %v2502_v0 = vshrl.u32 %v2428_v36, 16  ;;  %v2473_v1 = vsel %vm5292_vm7, %v2465_v51, %v2472_v52  ;;  %v2491_v3 = vrot.slane %v2489_v56, 7  ;;  %v2505_v5 = vshll.u32 %v2428_v36, 16  ;;  %v2775_v46 = vld [vmem:[#allocation3 + $0x38] sm:$0xf] }
 0x269   : > { %v2511_v31 = vshrl.u32 %v2429_v42, 16  ;;  %4231 = vmatprep.mubr.msk.bf16.mxu0 %vm1969_vm6, %v4394_v49  ;;  %v4035_v6 = vcombine.low %v2464_v60, %v2473_v1  ;;  %v2485_v7 = vor.u32 %v2483_v54, %v2482_v61  ;;  %v2487_v8 = vrot.slane %v2482_v61, 4  ;;  %v5404_v53 = vld [vmem:[%s5694_s4 + $0x1c] sm:$0xf] }
 0x26a   : > { %v4033_v9 = vrot.slane %v2497_v63, 11  ;;  %v2494_v10 = vor.u32 %v2492_v59, %v2491_v3  ;;  %v2504_v11 = vrot.slane %v2502_v0, 7  ;;  %v2514_v13 = vshll.u32 %v2429_v42, 16  ;;  %v2994_v0 = vld [vmem:[#allocation3 + $0x20] sm:$0x8] }
 0x26b   : > { %4212 = vmatmul.mubr.msk.bf16.vlgmr.msra.gmra.mxu1 %vm1969_vm6, %v4025_v30  ;;  %v2513_v12 = vrot.slane %v2511_v31, 7  ;;  %v2486_v15 = vsel %vm5292_vm7, %v4032_v58, %v2485_v7  ;;  %v3120_v17 = vsel %vm1982_vm2, %v3094_v55, 0  ;;  %v2781_v19 = vshrl.u32 %v2768_v57, 16  ;;  %v2776_v58 = vld [vmem:[#allocation3 + $0x3c] sm:$0x1] }
 0x26c   : > { %4216 = vmatpush3.bf16.msra.mxu1 %v5349_v62  ;;  %4217 = vmatprep.mubr.msk.bf16.mxu1 %vm1969_vm6, %v4034_v45  ;;  %v2784_v20 = vshll.u32 %v2768_v57, 16  ;;  %v2495_v21 = vsel %vm5292_vm7, %v2487_v8, %v2494_v10  ;;  %v2507_v22 = vor.u32 %v2505_v5, %v2504_v11  ;;  %v2509_v24 = vrot.slane %v2504_v11, 4  ;;  %v2995_v8 = vld [vmem:[#allocation3 + $0x24] sm:$0xf] }
 0x26d   : > { %4284 = vmatprep.subr.msk.bf16.mxu1 %vm1982_vm2, %v5361_v23  ;;  %v2516_v62 = vor.u32 %v2514_v13, %v2513_v12  ;;  %4246 = vmatpush3.bf16.msra.mxu0 %v3120_v17  ;;  %v4036_v26 = vcombine.low %v2486_v15, %v2495_v21  ;;  %v2783_v27 = vrot.slane %v2781_v19, 4  ;;  %v2790_v29 = vshll.u32 %v2769_v14, 16  ;;  %v2996_v17 = vld [vmem:[#allocation3 + $0x28] sm:$0xf] }
 0x26e   : > { %v2786_v28 = vrot.slane %v2784_v20, 5  ;;  %v2508_v30 = vsel %vm5292_vm7, %v4033_v9, %v2507_v22  ;;  %v2794_v23 = vshrl.u32 %v2769_v14, 16  ;;  %v2800_v33 = vshll.u32 %v2770_v18, 16  ;;  %v2777_v22 = vld [vmem:[#allocation3 + $0x44] sm:$0xf] }
 0x26f   : > { %v2517_v32 = vsel %vm5292_vm7, %v2509_v24, %v2516_v62  ;;  %v2792_v37 = vrot.slane %v2790_v29, 5  ;;  %v2805_v38 = vshrl.u32 %v2771_v25, 16  ;;  %v2808_v42 = vshll.u32 %v2771_v25, 16 }
 0x270   : > { %v4037_v35 = vcombine.low %v2508_v30, %v2517_v32  ;;  %4232 = vmatmul.mubr.msk.bf16.gmra.mxu0 %vm1969_vm6, %v4395_v16  ;;  %v2787_v36 = vor.u32 %v2786_v28, %v2783_v27  ;;  %v2796_v40 = vrot.slane %v2794_v23, 4  ;;  %v2802_v41 = vrot.slane %v2800_v33, 5  ;;  %v2778_v27 = vld [vmem:[#allocation3 + $0x48] sm:$0xf]  ;;  %v2779_v32 = vld [vmem:[#allocation3 + $0x4c] sm:$0x1] }
 0x271   : > { %v2814_v45 = vshll.u32 %v2772_v4, 16  ;;  %v2807_v49 = vrot.slane %v2805_v38, 4  ;;  %v2818_v50 = vshrl.u32 %v2772_v4, 16  ;;  %v2824_v51 = vshll.u32 %v2773_v34, 16  ;;  %v2997_v23 = vld [vmem:[#allocation3 + $0x30] sm:$0x8] }
 0x272   : > { %v2788_v48 = vrot.slane %v2787_v36, 4  ;;  %v2797_v54 = vor.u32 %v2796_v40, %v2792_v37  ;;  %v2810_v55 = vrot.slane %v2808_v42, 5  ;;  %v2829_v56 = vshrl.u32 %v2774_v39, 16  ;;  %v2998_v38 = vld [vmem:[#allocation3 + $0x34] sm:$0xf] }
 0x273   : > { %4218 = vmatmul.mubr.msk.bf16.vlgmr.msra.gmra.mxu1 %vm1969_vm6, %v4035_v6  ;;  %v2816_v52 = vrot.slane %v2814_v45, 5  ;;  %v2820_v60 = vrot.slane %v2818_v50, 4  ;;  %v2826_v61 = vrot.slane %v2824_v51, 5  ;;  %v2832_v63 = vshll.u32 %v2774_v39, 16  ;;  %v2999_v39 = vld [vmem:[#allocation3 + $0x38] sm:$0xf] }
 0x274   : > { %4236 = vmatpush3.bf16.msra.mxu1 %v5374_v47  ;;  %4221 = vmatprep.mubr.msk.bf16.mxu1 %vm1969_vm6, %v4036_v26  ;;  %v2793_v59 = vsel %vm4700_vm5, %v2788_v48, %v2792_v37  ;;  %v2798_v1 = vrot.slane %v2797_v54, 4  ;;  %v2811_v3 = vor.u32 %v2810_v55, %v2807_v49  ;;  %v2831_v5 = vrot.slane %v2829_v56, 4 }
 0x275   : > { %v2838_v31 = vshll.u32 %v2775_v46, 16  ;;  %4286 = vmatprep.subr.msk.bf16.mxu1 %vm1982_vm2, %v5404_v53  ;;  %v2821_v57 = vor.u32 %v2820_v60, %v2816_v52  ;;  %v2834_v6 = vrot.slane %v2832_v63, 5  ;;  %v2842_v7 = vshrl.u32 %v2775_v46, 16 }
 0x276   : > { %v2848_v47 = vshll.u32 %v2776_v58, 16  ;;  %v2803_v9 = vsel %vm4700_vm5, %v2798_v1, %v2802_v41  ;;  %v2812_v10 = vrot.slane %v2811_v3, 4  ;;  %v3007_v12 = vshrl.u32 %v2994_v0, 16  ;;  %v3000_v58 = vld [vmem:[#allocation3 + $0x40] sm:$0x8] }
 0x277   : > { %v2840_v11 = vrot.slane %v2838_v31, 5  ;;  %v4050_v13 = vcombine.low %v2793_v59, %v2803_v9  ;;  %v2822_v14 = vrot.slane %v2821_v57, 4  ;;  %v2835_v15 = vor.u32 %v2834_v6, %v2831_v5 }
 0x278   : > { %v2844_v16 = vrot.slane %v2842_v7, 4  ;;  %v2817_v18 = vsel %vm4700_vm5, %v2812_v10, %v2816_v52  ;;  %v2850_v19 = vrot.slane %v2848_v47, 5  ;;  %v4058_v20 = vrot.slane %v3007_v12, 11  ;;  %v3001_v7 = vld [vmem:[#allocation3 + $0x44] sm:$0xf] }
 0x279   : > { %v3012_v21 = vshrl.u32 %v2995_v8, 16  ;;  %v2827_v24 = vsel %vm4700_vm5, %v2822_v14, %v2826_v61  ;;  %v2836_v62 = vrot.slane %v2835_v15, 4  ;;  %v3015_v26 = vshll.u32 %v2995_v8, 16 }
 0x27a   : > { %v2845_v25 = vor.u32 %v2844_v16, %v2840_v11  ;;  %v4051_v28 = vcombine.low %v2817_v18, %v2827_v24  ;;  %v3021_v4 = vshrl.u32 %v2996_v17, 16  ;;  %v3024_v30 = vshll.u32 %v2996_v17, 16 }
 0x27b   : > { %4222 = vmatmul.mubr.msk.bf16.gmra.mxu1 %vm1969_vm6, %v4037_v35  ;;  %v3014_v29 = vrot.slane %v3012_v21, 7  ;;  %v2841_v33 = vsel %vm4700_vm5, %v2836_v62, %v2840_v11  ;;  %v2853_v36 = vshrl.u32 %v2777_v22, 16  ;;  %v2856_v37 = vshll.u32 %v2777_v22, 16  ;;  %v5426_v35 = vld [vmem:[%s5694_s4 + $0x20] sm:$0xf] }
 0x27c   : > { %4237 = vmatprep.mubr.msk.bf16.mxu1 %vm1969_vm6, %v4050_v13  ;;  %v2846_v34 = vrot.slane %v2845_v25, 4  ;;  %v3023_v42 = vrot.slane %v3021_v4, 7  ;;  %v2862_v45 = vshll.u32 %v2778_v27, 16  ;;  %4287 = vmatprep.subr.msk.bf16.mxu0 %vm1982_vm2, %v5426_v35  ;;  %v2866_v50 = vshrl.u32 %v2778_v27, 16  ;;  %v3002_v11 = vld [vmem:[#allocation3 + $0x48] sm:$0xf] }
 0x27d   : > { %v3017_v40 = vor.u32 %v3015_v26, %v3014_v29  ;;  %v3019_v41 = vrot.slane %v3014_v29, 4  ;;  %v2855_v48 = vrot.slane %v2853_v36, 4  ;;  %v2858_v49 = vrot.slane %v2856_v37, 5  ;;  %v3004_v25 = vld [vmem:[#allocation3 + $0x54] sm:$0xf] }
 0x27e   : > { %v2851_v46 = vsel %vm4700_vm5, %v2846_v34, %v2850_v19  ;;  %v3026_v55 = vor.u32 %v3024_v30, %v3023_v42  ;;  %v2864_v52 = vrot.slane %v2862_v45, 5  ;;  %v2868_v59 = vrot.slane %v2866_v50, 4  ;;  %v3005_v29 = vld [vmem:[#allocation3 + $0x58] sm:$0xf]  ;;  %v3344_v34 = vld [vmem:[#allocation3 + $0x24] sm:$0xf] }
 0x27f   : > { %v4052_v51 = vcombine.low %v2841_v33, %v2851_v46  ;;  %v3018_v54 = vsel %vm5292_vm7, %v4058_v20, %v3017_v40  ;;  %v2859_v56 = vor.u32 %v2858_v49, %v2855_v48  ;;  %v2872_v60 = vshll.u32 %v2779_v32, 16  ;;  %v3003_v20 = vld [vmem:[#allocation3 + $0x50] sm:$0x8]  ;;  %v4396_v33 = vld [vmem:[#allocation3 + $0x24] sm:$0xff]  }
 0x280   : > { %v3029_v61 = vshrl.u32 %v2997_v23, 16  ;;  %v3027_v63 = vsel %vm5292_vm7, %v3019_v41, %v3026_v55  ;;  %v3034_v0 = vshrl.u32 %v2998_v38, 16  ;;  %v3037_v1 = vshll.u32 %v2998_v38, 16  ;;  %v3345_v40 = vld [vmem:[#allocation3 + $0x28] sm:$0xf] }
 0x281   : > { %v3043_v3 = vshrl.u32 %v2999_v39, 16  ;;  %v4062_v5 = vcombine.low %v3018_v54, %v3027_v63  ;;  %v2860_v31 = vrot.slane %v2859_v56, 4  ;;  %v2869_v57 = vor.u32 %v2868_v59, %v2864_v52  ;;  %v3347_v59 = vld [vmem:[#allocation3 + $0x34] sm:$0xf] }
 0x282   : > { %v2874_v6 = vrot.slane %v2872_v60, 5  ;;  %v4059_v47 = vrot.slane %v3029_v61, 11  ;;  %v3036_v8 = vrot.slane %v3034_v0, 7  ;;  %v3046_v10 = vshll.u32 %v2999_v39, 16 }
 0x283   : > { %4238 = vmatmul.mubr.msk.bf16.vlgmr.msra.gmra.mxu1 %vm1969_vm6, %v4051_v28  ;;  %v3045_v9 = vrot.slane %v3043_v3, 7  ;;  %4247 = vmatprep.mubr.msk.bf16.mxu0 %vm1969_vm6, %v4062_v5  ;;  %v2865_v12 = vsel %vm4700_vm5, %v2860_v31, %v2864_v52  ;;  %v2870_v13 = vrot.slane %v2869_v57, 4  ;;  %v3253_v14 = vsel %vm1982_vm2, %v5404_v53, 0 }
 0x284   : > { %4241 = vmatprep.mubr.msk.bf16.mxu1 %vm1969_vm6, %v4052_v51  ;;  %v3051_v15 = vshrl.u32 %v3000_v58, 16  ;;  %v3039_v16 = vor.u32 %v3037_v1, %v3036_v8  ;;  %v3041_v17 = vrot.slane %v3036_v8, 4  ;;  %4256 = vmatpush3.bf16.msra.mxu1 %v3253_v14  ;;  %v3056_v19 = vshrl.u32 %v3001_v7, 16  ;;  %v3346_v51 = vld [vmem:[#allocation3 + $0x2c] sm:$0x1] }
 0x285   : > { %v3048_v18 = vor.u32 %v3046_v10, %v3045_v9  ;;  %v2875_v21 = vsel %vm4700_vm5, %v2870_v13, %v2874_v6  ;;  %v3059_v24 = vshll.u32 %v3001_v7, 16  ;;  %v3065_v62 = vshrl.u32 %v3002_v11, 16  ;;  %v3348_v1 = vld [vmem:[#allocation3 + $0x38] sm:$0xf]  ;;  %v4398_v7 = vld [vmem:[#allocation3 + $0x44] sm:$0xff]  }
 0x286   : > { %v4060_v22 = vrot.slane %v3051_v15, 11  ;;  %v4053_v26 = vcombine.low %v2865_v12, %v2875_v21  ;;  %v3040_v27 = vsel %vm5292_vm7, %v4059_v47, %v3039_v16  ;;  %v3058_v28 = vrot.slane %v3056_v19, 7  ;;  %v4397_v6 = vld [vmem:[#allocation3 + $0x34] sm:$0xff]   ;;  %v3349_v13 = vld [vmem:[#allocation3 + $0x3c] sm:$0x1] }
 0x287   : > { %v3049_v53 = vsel %vm5292_vm7, %v3041_v17, %v3048_v18  ;;  %v3067_v30 = vrot.slane %v3065_v62, 7  ;;  %v3068_v32 = vshll.u32 %v3002_v11, 16  ;;  %v3073_v23 = vshrl.u32 %v3003_v20, 16  ;;  %v3350_v15 = vld [vmem:[#allocation3 + $0x44] sm:$0xf] }
 0x288   : > { %v4063_v4 = vcombine.low %v3040_v27, %v3049_v53  ;;  %v3061_v36 = vor.u32 %v3059_v24, %v3058_v28  ;;  %v3063_v37 = vrot.slane %v3058_v28, 4  ;;  %v3078_v38 = vshrl.u32 %v3004_v25, 16  ;;  %v3351_v20 = vld [vmem:[#allocation3 + $0x48] sm:$0xf] }
 0x289   : > { %v3081_v39 = vshll.u32 %v3004_v25, 16  ;;  %v3070_v41 = vor.u32 %v3068_v32, %v3067_v30  ;;  %v4061_v42 = vrot.slane %v3073_v23, 11  ;;  %v3087_v45 = vshrl.u32 %v3005_v29, 16 }
 0x28a   : > { %4248 = vmatmul.mubr.msk.bf16.vlgmr.msra.gmra.mxu0 %vm1969_vm6, %v4063_v4  ;;  %v3090_v46 = vshll.u32 %v3005_v29, 16  ;;  %v3062_v48 = vsel %vm5292_vm7, %v4060_v22, %v3061_v36  ;;  %v3080_v49 = vrot.slane %v3078_v38, 7  ;;  %v3478_v50 = vsel %vm1982_vm2, %v5426_v35, 0  ;;  %v3352_v4 = vld [vmem:[#allocation3 + $0x4c] sm:$0x1] }
 0x28b   : > { %4242 = vmatmul.mubr.msk.bf16.gmra.mxu1 %vm1969_vm6, %v4053_v26  ;;  %v3357_v54 = vshrl.u32 %v3344_v34, 16  ;;  %v3071_v55 = vsel %vm5292_vm7, %v3063_v37, %v3070_v41  ;;  %v3089_v52 = vrot.slane %v3087_v45, 7  ;;  %4266 = vmatpush3.bf16.msra.mxu0 %v3478_v50  ;;  %v3360_v58 = vshll.u32 %v3344_v34, 16  ;;  %v3353_v36 = vld [vmem:[#allocation3 + $0x54] sm:$0xf] }
 0x28c   : > { %4257 = vmatprep.mubr.msk.bf16.mxu1 %vm1969_vm6, %v4396_v33  ;;  %v3366_v56 = vshll.u32 %v3345_v40, 16  ;;  %v4064_v60 = vcombine.low %v3062_v48, %v3071_v55  ;;  %v3083_v61 = vor.u32 %v3081_v39, %v3080_v49  ;;  %v3085_v63 = vrot.slane %v3080_v49, 4  ;;  %v3354_v41 = vld [vmem:[#allocation3 + $0x58] sm:$0xf] }
 0x28d   : > { %v3359_v0 = vrot.slane %v3357_v54, 4  ;;  %v3092_v3 = vor.u32 %v3090_v46, %v3089_v52  ;;  %v3362_v5 = vrot.slane %v3360_v58, 5  ;;  %v3370_v31 = vshrl.u32 %v3345_v40, 16 }
 0x28e   : > { %v3368_v35 = vrot.slane %v3366_v56, 5  ;;  %4251 = vmatprep.mubr.msk.bf16.mxu0 %vm1969_vm6, %v4064_v60  ;;  %v3084_v57 = vsel %vm5292_vm7, %v4061_v42, %v3083_v61  ;;  %v3376_v47 = vshll.u32 %v3346_v51, 16  ;;  %v3381_v8 = vshrl.u32 %v3347_v59, 16  ;;  %v4399_v42 = vld [vmem:[#allocation3 + $0x54] sm:$0xff]   ;;  %v3355_v56 = vld [vmem:[#allocation3 + $0x5c] sm:$0x1] }
 0x28f   : > { %v3384_v9 = vshll.u32 %v3347_v59, 16  ;;  %v3093_v10 = vsel %vm5292_vm7, %v3085_v63, %v3092_v3  ;;  %v3363_v11 = vor.u32 %v3362_v5, %v3359_v0  ;;  %v3372_v12 = vrot.slane %v3370_v31, 4 }
 0x290   : > { %v3390_v14 = vshll.u32 %v3348_v1, 16  ;;  %v4065_v16 = vcombine.low %v3084_v57, %v3093_v10  ;;  %v3378_v17 = vrot.slane %v3376_v47, 5  ;;  %v3383_v18 = vrot.slane %v3381_v8, 4 }
 0x291   : > { %v3386_v19 = vrot.slane %v3384_v9, 5  ;;  %v3364_v21 = vrot.slane %v3363_v11, 4  ;;  %v3373_v22 = vor.u32 %v3372_v12, %v3368_v35  ;;  %v3394_v62 = vshrl.u32 %v3348_v1, 16 }
 0x292   : > { %v3392_v24 = vrot.slane %v3390_v14, 5  ;;  %4252 = vmatmul.mubr.msk.bf16.gmra.mxu0 %vm1969_vm6, %v4065_v16  ;;  %v3400_v25 = vshll.u32 %v3349_v13, 16  ;;  %v3405_v26 = vshrl.u32 %v3350_v15, 16  ;;  %v3408_v27 = vshll.u32 %v3350_v15, 16 }
 0x293   : > { %4258 = vmatmul.mubr.msk.bf16.vlgmr.msra.gmra.mxu1 %vm1969_vm6, %v4397_v6  ;;  %v3387_v43 = vor.u32 %v3386_v19, %v3383_v18  ;;  %v3369_v53 = vsel %vm4700_vm5, %v3364_v21, %v3368_v35  ;;  %v3374_v28 = vrot.slane %v3373_v22, 4  ;;  %v3396_v29 = vrot.slane %v3394_v62, 4 }
 0x294   : > { %4261 = vmatprep.mubr.msk.bf16.mxu1 %vm1969_vm6, %v4398_v7  ;;  %v3414_v30 = vshll.u32 %v3351_v20, 16  ;;  %v3402_v23 = vrot.slane %v3400_v25, 5  ;;  %v3407_v33 = vrot.slane %v3405_v26, 4  ;;  %v3410_v34 = vrot.slane %v3408_v27, 5 }
 0x295   : > { %v3388_v32 = vrot.slane %v3387_v43, 4  ;;  %v3379_v37 = vsel %vm4700_vm5, %v3374_v28, %v3378_v17  ;;  %v3397_v38 = vor.u32 %v3396_v29, %v3392_v24  ;;  %v3418_v40 = vshrl.u32 %v3351_v20, 16 }
 0x296   : > { %v3416_v39 = vrot.slane %v3414_v30, 5  ;;  %v4078_v45 = vcombine.low %v3369_v53, %v3379_v37  ;;  %v3411_v48 = vor.u32 %v3410_v34, %v3407_v33  ;;  %v3424_v49 = vshll.u32 %v3352_v4, 16 }
 0x297   : > { %v3393_v46 = vsel %vm4700_vm5, %v3388_v32, %v3392_v24  ;;  %v3398_v50 = vrot.slane %v3397_v38, 4  ;;  %v3420_v51 = vrot.slane %v3418_v40, 4  ;;  %v3429_v54 = vshrl.u32 %v3353_v36, 16 }
 0x298   : > { %v3432_v55 = vshll.u32 %v3353_v36, 16  ;;  %4267 = vmatprep.mubr.msk.bf16.mxu0 %vm1969_vm6, %v4078_v45  ;;  %v3412_v52 = vrot.slane %v3411_v48, 4  ;;  %v3426_v58 = vrot.slane %v3424_v49, 5  ;;  %v3438_v59 = vshll.u32 %v3354_v41, 16 }
 0x299   : > { %v3442_v60 = vshrl.u32 %v3354_v41, 16  ;;  %v3403_v61 = vsel %vm4700_vm5, %v3398_v50, %v3402_v23  ;;  %v3421_v63 = vor.u32 %v3420_v51, %v3416_v39  ;;  %v3431_v0 = vrot.slane %v3429_v54, 4 }
 0x29a   : > { %v3434_v1 = vrot.slane %v3432_v55, 5  ;;  %v4079_v3 = vcombine.low %v3393_v46, %v3403_v61  ;;  %v3440_v5 = vrot.slane %v3438_v59, 5  ;;  %v3417_v31 = vsel %vm4700_vm5, %v3412_v52, %v3416_v39 }
 0x29b   : > { %4262 = vmatmul.mubr.msk.bf16.gmra.mxu1 %vm1969_vm6, %v4399_v42  ;;  %v3444_v35 = vrot.slane %v3442_v60, 4  ;;  %v3422_v57 = vrot.slane %v3421_v63, 4  ;;  %v3448_v7 = vshll.u32 %v3355_v56, 16 }
 0x29c   : > { %v3435_v6 = vor.u32 %v3434_v1, %v3431_v0  ;;  %4268 = vmatmul.mubr.msk.bf16.vlgmr.msra.gmra.mxu0 %vm1969_vm6, %v4079_v3 }
 0x29d   : > { %v3445_v47 = vor.u32 %v3444_v35, %v3440_v5  ;;  %v3427_v8 = vsel %vm4700_vm5, %v3422_v57, %v3426_v58  ;;  %v3450_v10 = vrot.slane %v3448_v7, 5 }
 0x29e   : > { %v3436_v9 = vrot.slane %v3435_v6, 4  ;;  %v4080_v11 = vcombine.low %v3417_v31, %v3427_v8 }
 0x29f   : > { %v3446_v12 = vrot.slane %v3445_v47, 4 }
 0x2a0   : > { %v3441_v13 = vsel %vm4700_vm5, %v3436_v9, %v3440_v5  ;;  %4271 = vmatprep.mubr.msk.bf16.mxu0 %vm1969_vm6, %v4080_v11 }
 0x2a1   : > { %v3451_v14 = vsel %vm4700_vm5, %v3446_v12, %v3450_v10 }
 0x2a2   : > { %v4081_v15 = vcombine.low %v3441_v13, %v3451_v14 }
 0x2a4   : > { %4272 = vmatmul.mubr.msk.bf16.gmra.mxu0 %vm1969_vm6, %v4081_v15 }
 0x30b   : > { %v4189_v16 = vpop.f32.mrf.mxu1 }
 0x30c   : > { %2053 = vst.msk [vmem:[#allocation4 + $0x10] sm:$0xff] %vm1969_vm6, %v4189_v16 }
 0x30d   : > { %v2020_v17 = vpop.f32.mrf.mxu1 }
 0x30e   : > { %2051 = vst.msk [vmem:[#allocation4] sm:$0xff] %vm1969_vm6, %v2020_v17 }
 0x30f   : > { %v4190_v18 = vpop.f32.mrf.mxu1 }
 0x310   : > { %2054 = vst.msk [vmem:[#allocation4 + $0x18] sm:$0xff] %vm1969_vm6, %v4190_v18 }
 0x311   : > { %v2023_v19 = vpop.f32.mrf.mxu1 }
 0x312   : > { %2052 = vst.msk [vmem:[#allocation4 + $0x8] sm:$0xff] %vm1969_vm6, %v2023_v19 }
 0x313   : > { %v4193_v20 = vpop.f32.mrf.mxu1  ;;  %v2170_v62 = vld [vmem:[#allocation4 + $0x10] sm:$0xff] }
 0x314   : > { %2057 = vst.msk [vmem:[#allocation4 + $0x30] sm:$0xff] %vm1969_vm6, %v4193_v20 }
 0x315   : > { %v2036_v44 = vpop.f32.mrf.mxu1  ;;  %v2168_v26 = vld [vmem:[#allocation4] sm:$0xff] }
 0x316   : > { %2055 = vst.msk [vmem:[#allocation4 + $0x20] sm:$0xff] %vm1969_vm6, %v2036_v44 }
 0x317   : > { %v4194_v21 = vpop.f32.mrf.mxu1  ;;  %v2171_v29 = vld [vmem:[#allocation4 + $0x18] sm:$0xff] }
 0x318   : > { %2058 = vst.msk [vmem:[#allocation4 + $0x38] sm:$0xff] %vm1969_vm6, %v4194_v21 }
 0x319   : > { %v2039_v22 = vpop.f32.mrf.mxu1  ;;  %v2169_v32 = vld [vmem:[#allocation4 + $0x8] sm:$0xff] }
 0x31a   : > { %2056 = vst.msk [vmem:[#allocation4 + $0x28] sm:$0xff] %vm1969_vm6, %v2039_v22 }
 0x31b   : > { %v4199_v24 = vpop.f32.mrf.mxu1  ;;  %v2174_v36 = vld [vmem:[#allocation4 + $0x30] sm:$0xff] }
 0x31c   : > { %v2178_v43 = vadd.f32 %v4199_v24, %v2170_v62 }
 0x31d   : > { %v2137_v25 = vpop.f32.mrf.mxu1  ;;  %v4209_v27 = vpop.f32.mrf.mxu0  ;;  %v2172_v39 = vld [vmem:[#allocation4 + $0x20] sm:$0xff] }
 0x31e   : > { %2186 = vst.msk [vmem:[#allocation4 + $0x10] sm:$0xff] %vm1969_vm6, %v2178_v43  ;;  %v2176_v53 = vadd.f32 %v2168_v26, %v2137_v25 }
 0x31f   : > { %v4200_v28 = vpop.f32.mrf.mxu1  ;;  %v2362_v23 = vpop.f32.mrf.mxu0  ;;  %v2175_v48 = vld [vmem:[#allocation4 + $0x38] sm:$0xff] }
 0x320   : > { %2184 = vst.msk [vmem:[#allocation4] sm:$0xff] %vm1969_vm6, %v2176_v53  ;;  %v2179_v4 = vadd.f32 %v4200_v28, %v2171_v29 }
 0x321   : > { %v2140_v30 = vpop.f32.mrf.mxu1  ;;  %v4210_v41 = vpop.f32.mrf.mxu0  ;;  %v2173_v55 = vld [vmem:[#allocation4 + $0x28] sm:$0xff] }
 0x322   : > { %2187 = vst.msk [vmem:[#allocation4 + $0x18] sm:$0xff] %vm1969_vm6, %v2179_v4  ;;  %v2177_v33 = vadd.f32 %v2169_v32, %v2140_v30 }
 0x323   : > { %v4203_v34 = vpop.f32.mrf.mxu1  ;;  %v2365_v58 = vpop.f32.mrf.mxu0 }
 0x324   : > { %2185 = vst.msk [vmem:[#allocation4 + $0x8] sm:$0xff] %vm1969_vm6, %v2177_v33  ;;  %v2182_v37 = vadd.f32 %v4203_v34, %v2174_v36 }
 0x325   : > { %v2153_v38 = vpop.f32.mrf.mxu1  ;;  %v2395_v40 = vld [vmem:[#allocation4 + $0x10] sm:$0xff] }
 0x326   : > { %2190 = vst.msk [vmem:[#allocation4 + $0x30] sm:$0xff] %vm1969_vm6, %v2182_v37  ;;  %v2180_v42 = vadd.f32 %v2172_v39, %v2153_v38  ;;  %v2403_v45 = vadd.f32 %v4209_v27, %v2395_v40 }
 0x327   : > { %v4204_v46 = vpop.f32.mrf.mxu1  ;;  %v2393_v49 = vld [vmem:[#allocation4] sm:$0xff] }
 0x328   : > { %2188 = vst.msk [vmem:[#allocation4 + $0x20] sm:$0xff] %vm1969_vm6, %v2180_v42  ;;  %2411 = vst.msk [vmem:[#allocation4 + $0x10] sm:$0xff] %vm1969_vm6, %v2403_v45  ;;  %v2183_v50 = vadd.f32 %v4204_v46, %v2175_v48  ;;  %v2401_v51 = vadd.f32 %v2393_v49, %v2362_v23  ;;  %v4229_v0 = vpop.f32.mrf.mxu0 }
 0x329   : > { %v2156_v54 = vpop.f32.mrf.mxu1  ;;  %v2396_v52 = vld [vmem:[#allocation4 + $0x18] sm:$0xff] }
 0x32a   : > { %2191 = vst.msk [vmem:[#allocation4 + $0x38] sm:$0xff] %vm1969_vm6, %v2183_v50  ;;  %2409 = vst.msk [vmem:[#allocation4] sm:$0xff] %vm1969_vm6, %v2401_v51  ;;  %v2181_v56 = vadd.f32 %v2173_v55, %v2156_v54  ;;  %v2404_v59 = vadd.f32 %v4210_v41, %v2396_v52  ;;  %v2713_v6 = vpop.f32.mrf.mxu0 }
 0x32b   : > { %v2394_v60 = vld [vmem:[#allocation4 + $0x8] sm:$0xff]  ;;  %v4213_v61 = vpop.f32.mrf.mxu1 }
 0x32c   : > { %2189 = vst.msk [vmem:[#allocation4 + $0x28] sm:$0xff] %vm1969_vm6, %v2181_v56  ;;  %2412 = vst.msk [vmem:[#allocation4 + $0x18] sm:$0xff] %vm1969_vm6, %v2404_v59  ;;  %v2402_v63 = vadd.f32 %v2394_v60, %v2365_v58  ;;  %v4230_v14 = vpop.f32.mrf.mxu0 }
 0x32d   : > { %v2399_v1 = vld [vmem:[#allocation4 + $0x30] sm:$0xff]  ;;  %v2378_v3 = vpop.f32.mrf.mxu1 }
 0x32e   : > { %2410 = vst.msk [vmem:[#allocation4 + $0x8] sm:$0xff] %vm1969_vm6, %v2402_v63  ;;  %v2407_v5 = vadd.f32 %v4213_v61, %v2399_v1  ;;  %v2716_v44 = vpop.f32.mrf.mxu0 }
 0x32f   : > { %v2397_v35 = vld [vmem:[#allocation4 + $0x20] sm:$0xff]  ;;  %v4214_v31 = vpop.f32.mrf.mxu1  ;;  %v2613_v11 = vld [vmem:[#allocation4 + $0x10] sm:$0xff] }
 0x330   : > { %2415 = vst.msk [vmem:[#allocation4 + $0x30] sm:$0xff] %vm1969_vm6, %v2407_v5  ;;  %v2405_v57 = vadd.f32 %v2397_v35, %v2378_v3  ;;  %v4233_v26 = vpop.f32.mrf.mxu0 }
 0x331   : > { %v2400_v7 = vld [vmem:[#allocation4 + $0x38] sm:$0xff]  ;;  %v2381_v47 = vpop.f32.mrf.mxu1  ;;  %v2611_v16 = vld [vmem:[#allocation4] sm:$0xff] }
 0x332   : > { %2413 = vst.msk [vmem:[#allocation4 + $0x20] sm:$0xff] %vm1969_vm6, %v2405_v57  ;;  %v2408_v8 = vadd.f32 %v4214_v31, %v2400_v7  ;;  %v2729_v36 = vpop.f32.mrf.mxu0 }
 0x333   : > { %v2398_v9 = vld [vmem:[#allocation4 + $0x28] sm:$0xff]  ;;  %v4219_v10 = vpop.f32.mrf.mxu1  ;;  %v2614_v19 = vld [vmem:[#allocation4 + $0x18] sm:$0xff] }
 0x334   : > { %2416 = vst.msk [vmem:[#allocation4 + $0x38] sm:$0xff] %vm1969_vm6, %v2408_v8  ;;  %v2406_v12 = vadd.f32 %v2398_v9, %v2381_v47  ;;  %v2621_v13 = vadd.f32 %v4219_v10, %v2613_v11  ;;  %v4234_v48 = vpop.f32.mrf.mxu0 }
 0x335   : > { %v2580_v15 = vpop.f32.mrf.mxu1  ;;  %v2612_v22 = vld [vmem:[#allocation4 + $0x8] sm:$0xff] }
 0x336   : > { %2414 = vst.msk [vmem:[#allocation4 + $0x28] sm:$0xff] %vm1969_vm6, %v2406_v12  ;;  %2629 = vst.msk [vmem:[#allocation4 + $0x10] sm:$0xff] %vm1969_vm6, %v2621_v13  ;;  %v2619_v17 = vadd.f32 %v2611_v16, %v2580_v15  ;;  %v2732_v59 = vpop.f32.mrf.mxu0 }
 0x337   : > { %v4220_v18 = vpop.f32.mrf.mxu1  ;;  %v2617_v43 = vld [vmem:[#allocation4 + $0x30] sm:$0xff] }
 0x338   : > { %2627 = vst.msk [vmem:[#allocation4] sm:$0xff] %vm1969_vm6, %v2619_v17  ;;  %v2622_v20 = vadd.f32 %v4220_v18, %v2614_v19 }
 0x339   : > { %v2583_v21 = vpop.f32.mrf.mxu1  ;;  %v2615_v28 = vld [vmem:[#allocation4 + $0x20] sm:$0xff] }
 0x33a   : > { %2630 = vst.msk [vmem:[#allocation4 + $0x18] sm:$0xff] %vm1969_vm6, %v2622_v20  ;;  %v2620_v24 = vadd.f32 %v2612_v22, %v2583_v21 }
 0x33b   : > { %v4223_v62 = vpop.f32.mrf.mxu1  ;;  %v2618_v23 = vld [vmem:[#allocation4 + $0x38] sm:$0xff] }
 0x33c   : > { %2628 = vst.msk [vmem:[#allocation4 + $0x8] sm:$0xff] %vm1969_vm6, %v2620_v24  ;;  %v2625_v25 = vadd.f32 %v4223_v62, %v2617_v43 }
 0x33d   : > { %v2746_v27 = vld [vmem:[#allocation4 + $0x10] sm:$0xff]  ;;  %v2596_v53 = vpop.f32.mrf.mxu1  ;;  %v2616_v39 = vld [vmem:[#allocation4 + $0x28] sm:$0xff] }
 0x33e   : > { %v2754_v29 = vadd.f32 %v4229_v0, %v2746_v27  ;;  %2633 = vst.msk [vmem:[#allocation4 + $0x30] sm:$0xff] %vm1969_vm6, %v2625_v25  ;;  %v2623_v4 = vadd.f32 %v2615_v28, %v2596_v53 }
 0x33f   : > { %v2744_v30 = vld [vmem:[#allocation4] sm:$0xff]  ;;  %v4224_v32 = vpop.f32.mrf.mxu1 }
 0x340   : > { %2762 = vst.msk [vmem:[#allocation4 + $0x10] sm:$0xff] %vm1969_vm6, %v2754_v29  ;;  %v2752_v33 = vadd.f32 %v2744_v30, %v2713_v6  ;;  %2631 = vst.msk [vmem:[#allocation4 + $0x20] sm:$0xff] %vm1969_vm6, %v2623_v4  ;;  %v2626_v34 = vadd.f32 %v4224_v32, %v2618_v23 }
 0x341   : > { %v2747_v37 = vld [vmem:[#allocation4 + $0x18] sm:$0xff]  ;;  %v2599_v38 = vpop.f32.mrf.mxu1 }
 0x342   : > { %2760 = vst.msk [vmem:[#allocation4] sm:$0xff] %vm1969_vm6, %v2752_v33  ;;  %v2755_v40 = vadd.f32 %v4230_v14, %v2747_v37  ;;  %2634 = vst.msk [vmem:[#allocation4 + $0x38] sm:$0xff] %vm1969_vm6, %v2626_v34  ;;  %v2624_v41 = vadd.f32 %v2616_v39, %v2599_v38 }
 0x343   : > { %v2745_v42 = vld [vmem:[#allocation4 + $0x8] sm:$0xff]  ;;  %v4239_v45 = vpop.f32.mrf.mxu1 }
 0x344   : > { %2763 = vst.msk [vmem:[#allocation4 + $0x18] sm:$0xff] %vm1969_vm6, %v2755_v40  ;;  %v2753_v46 = vadd.f32 %v2745_v42, %v2716_v44  ;;  %2632 = vst.msk [vmem:[#allocation4 + $0x28] sm:$0xff] %vm1969_vm6, %v2624_v41 }
 0x345   : > { %v2750_v49 = vld [vmem:[#allocation4 + $0x30] sm:$0xff]  ;;  %v2938_v50 = vpop.f32.mrf.mxu1 }
 0x346   : > { %2761 = vst.msk [vmem:[#allocation4 + $0x8] sm:$0xff] %vm1969_vm6, %v2753_v46  ;;  %v2758_v51 = vadd.f32 %v4233_v26, %v2750_v49 }
 0x347   : > { %v2748_v54 = vld [vmem:[#allocation4 + $0x20] sm:$0xff]  ;;  %v2971_v55 = vld [vmem:[#allocation4 + $0x10] sm:$0xff]  ;;  %v4240_v52 = vpop.f32.mrf.mxu1 }
 0x348   : > { %2766 = vst.msk [vmem:[#allocation4 + $0x30] sm:$0xff] %vm1969_vm6, %v2758_v51  ;;  %v2756_v58 = vadd.f32 %v2748_v54, %v2729_v36  ;;  %v2979_v56 = vadd.f32 %v4239_v45, %v2971_v55 }
 0x349   : > { %v2751_v60 = vld [vmem:[#allocation4 + $0x38] sm:$0xff]  ;;  %v2969_v61 = vld [vmem:[#allocation4] sm:$0xff]  ;;  %v2941_v63 = vpop.f32.mrf.mxu1 }
 0x34a   : > { %2764 = vst.msk [vmem:[#allocation4 + $0x20] sm:$0xff] %vm1969_vm6, %v2756_v58  ;;  %v2759_v0 = vadd.f32 %v4234_v48, %v2751_v60  ;;  %2987 = vst.msk [vmem:[#allocation4 + $0x10] sm:$0xff] %vm1969_vm6, %v2979_v56  ;;  %v2977_v1 = vadd.f32 %v2969_v61, %v2938_v50  ;;  %v4249_v3 = vpop.f32.mrf.mxu0 }
 0x34b   : > { %v2749_v5 = vld [vmem:[#allocation4 + $0x28] sm:$0xff]  ;;  %v2972_v35 = vld [vmem:[#allocation4 + $0x18] sm:$0xff]  ;;  %v4243_v31 = vpop.f32.mrf.mxu1 }
 0x34c   : > { %2767 = vst.msk [vmem:[#allocation4 + $0x38] sm:$0xff] %vm1969_vm6, %v2759_v0  ;;  %v2757_v57 = vadd.f32 %v2749_v5, %v2732_v59  ;;  %2985 = vst.msk [vmem:[#allocation4] sm:$0xff] %vm1969_vm6, %v2977_v1  ;;  %v2980_v6 = vadd.f32 %v4240_v52, %v2972_v35  ;;  %v3156_v7 = vpop.f32.mrf.mxu0 }
 0x34d   : > { %v2970_v47 = vld [vmem:[#allocation4 + $0x8] sm:$0xff]  ;;  %v2954_v8 = vpop.f32.mrf.mxu1 }
 0x34e   : > { %2765 = vst.msk [vmem:[#allocation4 + $0x28] sm:$0xff] %vm1969_vm6, %v2757_v57  ;;  %2988 = vst.msk [vmem:[#allocation4 + $0x18] sm:$0xff] %vm1969_vm6, %v2980_v6  ;;  %v2978_v9 = vadd.f32 %v2970_v47, %v2941_v63  ;;  %v4250_v10 = vpop.f32.mrf.mxu0 }
 0x34f   : > { %v2975_v11 = vld [vmem:[#allocation4 + $0x30] sm:$0xff]  ;;  %v4244_v12 = vpop.f32.mrf.mxu1 }
 0x350   : > { %2986 = vst.msk [vmem:[#allocation4 + $0x8] sm:$0xff] %vm1969_vm6, %v2978_v9  ;;  %v2983_v13 = vadd.f32 %v4243_v31, %v2975_v11  ;;  %v3159_v14 = vpop.f32.mrf.mxu0 }
 0x351   : > { %v3189_v15 = vld [vmem:[#allocation4 + $0x10] sm:$0xff]  ;;  %v2973_v16 = vld [vmem:[#allocation4 + $0x20] sm:$0xff]  ;;  %v2957_v17 = vpop.f32.mrf.mxu1 }
 0x352   : > { %2991 = vst.msk [vmem:[#allocation4 + $0x30] sm:$0xff] %vm1969_vm6, %v2983_v13  ;;  %v3197_v18 = vadd.f32 %v4249_v3, %v3189_v15  ;;  %v2981_v19 = vadd.f32 %v2973_v16, %v2954_v8  ;;  %v4253_v21 = vpop.f32.mrf.mxu0 }
 0x353   : > { %v3187_v20 = vld [vmem:[#allocation4] sm:$0xff]  ;;  %v2976_v44 = vld [vmem:[#allocation4 + $0x38] sm:$0xff]  ;;  %v4259_v22 = vpop.f32.mrf.mxu1 }
 0x354   : > { %3205 = vst.msk [vmem:[#allocation4 + $0x10] sm:$0xff] %vm1969_vm6, %v3197_v18  ;;  %2989 = vst.msk [vmem:[#allocation4 + $0x20] sm:$0xff] %vm1969_vm6, %v2981_v19  ;;  %v3195_v24 = vadd.f32 %v3187_v20, %v3156_v7  ;;  %v2984_v62 = vadd.f32 %v4244_v12, %v2976_v44  ;;  %v3172_v26 = vpop.f32.mrf.mxu0  ;;  %v4087_v44 = vld [vmem:[%s5696_s6] ss:$0 sm:$0xff] }
 0x355   : > { %v3190_v43 = vld [vmem:[#allocation4 + $0x18] sm:$0xff]  ;;  %v2974_v25 = vld [vmem:[#allocation4 + $0x28] sm:$0xff]  ;;  %v3289_v27 = vpop.f32.mrf.mxu1 }
 0x356   : > { %3203 = vst.msk [vmem:[#allocation4] sm:$0xff] %vm1969_vm6, %v3195_v24  ;;  %2992 = vst.msk [vmem:[#allocation4 + $0x38] sm:$0xff] %vm1969_vm6, %v2984_v62  ;;  %v3198_v53 = vadd.f32 %v4250_v10, %v3190_v43  ;;  %v2982_v28 = vadd.f32 %v2974_v25, %v2957_v17  ;;  %v4254_v4 = vpop.f32.mrf.mxu0  ;;  %v4086_v17 = vld [vmem:[%s5695_s5] ss:$0 sm:$0xff] }
 0x357   : > { %v3188_v29 = vld [vmem:[#allocation4 + $0x8] sm:$0xff]  ;;  %v4260_v30 = vpop.f32.mrf.mxu1 }
 0x358   : > { %3206 = vst.msk [vmem:[#allocation4 + $0x18] sm:$0xff] %vm1969_vm6, %v3198_v53  ;;  %2990 = vst.msk [vmem:[#allocation4 + $0x28] sm:$0xff] %vm1969_vm6, %v2982_v28  ;;  %v3196_v32 = vadd.f32 %v3188_v29, %v3159_v14  ;;  %v3175_v38 = vpop.f32.mrf.mxu0  ;;  %v3638_v29 = vlaneseq }
 0x359   : > { %v3193_v23 = vld [vmem:[#allocation4 + $0x30] sm:$0xff]  ;;  %v3292_v33 = vpop.f32.mrf.mxu1 }
 0x35a   : > { %3204 = vst.msk [vmem:[#allocation4 + $0x8] sm:$0xff] %vm1969_vm6, %v3196_v32  ;;  %v3201_v34 = vadd.f32 %v4253_v21, %v3193_v23 }
 0x35b   : > { %v3191_v36 = vld [vmem:[#allocation4 + $0x20] sm:$0xff]  ;;  %v3322_v37 = vld [vmem:[#allocation4 + $0x10] sm:$0xff]  ;;  %v4263_v45 = vpop.f32.mrf.mxu1 }
 0x35c   : > { %3209 = vst.msk [vmem:[#allocation4 + $0x30] sm:$0xff] %vm1969_vm6, %v3201_v34  ;;  %v3199_v39 = vadd.f32 %v3191_v36, %v3172_v26  ;;  %v3330_v40 = vadd.f32 %v4259_v22, %v3322_v37  ;;  %v4269_v46 = vpop.f32.mrf.mxu0 }
 0x35d   : > { %v3194_v41 = vld [vmem:[#allocation4 + $0x38] sm:$0xff]  ;;  %v3320_v42 = vld [vmem:[#allocation4] sm:$0xff]  ;;  %v3305_v56 = vpop.f32.mrf.mxu1 }
 0x35e   : > { %3207 = vst.msk [vmem:[#allocation4 + $0x20] sm:$0xff] %vm1969_vm6, %v3199_v39  ;;  %3338 = vst.msk [vmem:[#allocation4 + $0x10] sm:$0xff] %vm1969_vm6, %v3330_v40  ;;  %v3202_v48 = vadd.f32 %v4254_v4, %v3194_v41  ;;  %v3328_v49 = vadd.f32 %v3320_v42, %v3289_v27  ;;  %v3514_v54 = vpop.f32.mrf.mxu0  ;;  %v3639_v40 = vshrl.u32 %v3638_v29, 7  ;;  %v4535_v29 = vmov 2  }
 0x35f   : > { %v3192_v50 = vld [vmem:[#allocation4 + $0x28] sm:$0xff]  ;;  %v3323_v51 = vld [vmem:[#allocation4 + $0x18] sm:$0xff]  ;;  %v4264_v5 = vpop.f32.mrf.mxu1 }
 0x360   : > { %3210 = vst.msk [vmem:[#allocation4 + $0x38] sm:$0xff] %vm1969_vm6, %v3202_v48  ;;  %3336 = vst.msk [vmem:[#allocation4] sm:$0xff] %vm1969_vm6, %v3328_v49  ;;  %v3200_v55 = vadd.f32 %v3192_v50, %v3175_v38  ;;  %v3331_v52 = vadd.f32 %v4260_v30, %v3323_v51  ;;  %v4270_v59 = vpop.f32.mrf.mxu0 }
 0x361   : > { %v3321_v58 = vld [vmem:[#allocation4 + $0x8] sm:$0xff]  ;;  %v3308_v9 = vpop.f32.mrf.mxu1 }
 0x362   : > { %3208 = vst.msk [vmem:[#allocation4 + $0x28] sm:$0xff] %vm1969_vm6, %v3200_v55  ;;  %3339 = vst.msk [vmem:[#allocation4 + $0x18] sm:$0xff] %vm1969_vm6, %v3331_v52  ;;  %v3329_v60 = vadd.f32 %v3321_v58, %v3292_v33  ;;  %v3517_v63 = vpop.f32.mrf.mxu0 }
 0x363   : > { %v3326_v61 = vld [vmem:[#allocation4 + $0x30] sm:$0xff] }
 0x364   : > { %3337 = vst.msk [vmem:[#allocation4 + $0x8] sm:$0xff] %vm1969_vm6, %v3329_v60  ;;  %v3334_v0 = vadd.f32 %v4263_v45, %v3326_v61  ;;  %v4273_v7 = vpop.f32.mrf.mxu0 }
 0x365   : > { %v3324_v1 = vld [vmem:[#allocation4 + $0x20] sm:$0xff]  ;;  %v3547_v3 = vld [vmem:[#allocation4 + $0x10] sm:$0xff] }
 0x366   : > { %3342 = vst.msk [vmem:[#allocation4 + $0x30] sm:$0xff] %vm1969_vm6, %v3334_v0  ;;  %v3332_v35 = vadd.f32 %v3324_v1, %v3305_v56  ;;  %v3555_v31 = vadd.f32 %v4269_v46, %v3547_v3  ;;  %v3530_v15 = vpop.f32.mrf.mxu0 }
 0x367   : > { %v3327_v57 = vld [vmem:[#allocation4 + $0x38] sm:$0xff]  ;;  %v3545_v6 = vld [vmem:[#allocation4] sm:$0xff] }
 0x368   : > { %3340 = vst.msk [vmem:[#allocation4 + $0x20] sm:$0xff] %vm1969_vm6, %v3332_v35  ;;  %3563 = vst.msk [vmem:[#allocation4 + $0x10] sm:$0xff] %vm1969_vm6, %v3555_v31  ;;  %v3335_v47 = vadd.f32 %v4264_v5, %v3327_v57  ;;  %v3553_v8 = vadd.f32 %v3545_v6, %v3514_v54  ;;  %v4274_v22 = vpop.f32.mrf.mxu0  ;;  %v3652_v54 = vmul.u32 2, %v3639_v40 }
 0x369   : > { %v3325_v10 = vld [vmem:[#allocation4 + $0x28] sm:$0xff]  ;;  %v3548_v11 = vld [vmem:[#allocation4 + $0x18] sm:$0xff] }
 0x36a   : > { %3343 = vst.msk [vmem:[#allocation4 + $0x38] sm:$0xff] %vm1969_vm6, %v3335_v47  ;;  %3561 = vst.msk [vmem:[#allocation4] sm:$0xff] %vm1969_vm6, %v3553_v8  ;;  %v3333_v12 = vadd.f32 %v3325_v10, %v3308_v9  ;;  %v3556_v13 = vadd.f32 %v4270_v59, %v3548_v11  ;;  %v3533_v4 = vpop.f32.mrf.mxu0  ;;  %v3653_v0 = vadd.s32 1, %v3652_v54 }
 0x36b   : > { %v3546_v14 = vld [vmem:[#allocation4 + $0x8] sm:$0xff] }
 0x36c   : > { %3341 = vst.msk [vmem:[#allocation4 + $0x28] sm:$0xff] %vm1969_vm6, %v3333_v12  ;;  %3564 = vst.msk [vmem:[#allocation4 + $0x18] sm:$0xff] %vm1969_vm6, %v3556_v13  ;;  %v3554_v16 = vadd.f32 %v3546_v14, %v3517_v63 }
 0x36d   : > { %v3551_v18 = vld [vmem:[#allocation4 + $0x30] sm:$0xff] }
 0x36e   : > { %3562 = vst.msk [vmem:[#allocation4 + $0x8] sm:$0xff] %vm1969_vm6, %v3554_v16  ;;  %v3559_v19 = vadd.f32 %v4273_v7, %v3551_v18 }
 0x36f   : > { %v3571_v20 = vld [vmem:[#allocation4 + $0x10] sm:$0xff]  ;;  %v3549_v21 = vld [vmem:[#allocation4 + $0x20] sm:$0xff] }
 0x370   : > { %v3586_v24 = vmul.f32 %v4086_v17, %v3571_v20  ;;  %3567 = vst.msk [vmem:[#allocation4 + $0x30] sm:$0xff] %vm1969_vm6, %v3559_v19  ;;  %v3557_v62 = vadd.f32 %v3549_v21, %v3530_v15  ;;  %v3683_v20 = vstv %s4088_s18 }
 0x371   : > { %v3569_v43 = vld [vmem:[#allocation4] sm:$0xff]  ;;  %v3552_v25 = vld [vmem:[#allocation4 + $0x38] sm:$0xff] }
 0x372   : > { %v3601_v26 = vadd.f32 %v4087_v44, %v3586_v24  ;;  %v3584_v27 = vmul.f32 %v4086_v17, %v3569_v43  ;;  %3565 = vst.msk [vmem:[#allocation4 + $0x20] sm:$0xff] %vm1969_vm6, %v3557_v62  ;;  %v3560_v53 = vadd.f32 %v4274_v22, %v3552_v25 }
 0x373   : > { %v3572_v28 = vld [vmem:[#allocation4 + $0x18] sm:$0xff]  ;;  %v3550_v30 = vld [vmem:[#allocation4 + $0x28] sm:$0xff] }
 0x374   : > { %v3609_v32 = vmax.f32 %v3601_v26, 0.0  ;;  %v3599_v23 = vadd.f32 %v4087_v44, %v3584_v27  ;;  %v3587_v33 = vmul.f32 %v4086_v17, %v3572_v28  ;;  %3568 = vst.msk [vmem:[#allocation4 + $0x38] sm:$0xff] %vm1969_vm6, %v3560_v53  ;;  %v3558_v34 = vadd.f32 %v3550_v30, %v3533_v4 }
 0x375   : > { %v3570_v36 = vld [vmem:[#allocation4 + $0x8] sm:$0xff] }
 0x376   : > { %3617 = vst.msk [vmem:[#allocation4 + $0x10] sm:$0xff] %vm1969_vm6, %v3609_v32  ;;  %v3607_v37 = vmax.f32 %v3599_v23, 0.0  ;;  %v3602_v38 = vadd.f32 %v4087_v44, %v3587_v33  ;;  %v3585_v39 = vmul.f32 %v4086_v17, %v3570_v36  ;;  %3566 = vst.msk [vmem:[#allocation4 + $0x28] sm:$0xff] %vm1969_vm6, %v3558_v34 }
 0x377   : > { %v3575_v41 = vld [vmem:[#allocation4 + $0x30] sm:$0xff] }
 0x378   : > { %3615 = vst.msk [vmem:[#allocation4] sm:$0xff] %vm1969_vm6, %v3607_v37  ;;  %v3610_v42 = vmax.f32 %v3602_v38, 0.0  ;;  %v3600_v45 = vadd.f32 %v4087_v44, %v3585_v39  ;;  %v3590_v46 = vmul.f32 %v4086_v17, %v3575_v41 }
 0x379   : > { %v3573_v48 = vld [vmem:[#allocation4 + $0x20] sm:$0xff] }
 0x37a   : > { %3618 = vst.msk [vmem:[#allocation4 + $0x18] sm:$0xff] %vm1969_vm6, %v3610_v42  ;;  %v3608_v49 = vmax.f32 %v3600_v45, 0.0  ;;  %v3605_v50 = vadd.f32 %v4087_v44, %v3590_v46  ;;  %v3588_v51 = vmul.f32 %v4086_v17, %v3573_v48 }
 0x37b   : > { %v3576_v55 = vld [vmem:[#allocation4 + $0x38] sm:$0xff] }
 0x37c   : > { %3616 = vst.msk [vmem:[#allocation4 + $0x8] sm:$0xff] %vm1969_vm6, %v3608_v49  ;;  %v3613_v52 = vmax.f32 %v3605_v50, 0.0  ;;  %v3603_v58 = vadd.f32 %v4087_v44, %v3588_v51  ;;  %v3591_v56 = vmul.f32 %v4086_v17, %v3576_v55 }
 0x37d   : > { %v3574_v59 = vld [vmem:[#allocation4 + $0x28] sm:$0xff] }
 0x37e   : > { %3621 = vst.msk [vmem:[#allocation4 + $0x30] sm:$0xff] %vm1969_vm6, %v3613_v52  ;;  %v3611_v60 = vmax.f32 %v3603_v58, 0.0  ;;  %v3606_v61 = vadd.f32 %v4087_v44, %v3591_v56  ;;  %v3589_v63 = vmul.f32 %v4086_v17, %v3574_v59 }
 0x380   : > { %3619 = vst.msk [vmem:[#allocation4 + $0x20] sm:$0xff] %vm1969_vm6, %v3611_v60  ;;  %v3614_v1 = vmax.f32 %v3606_v61, 0.0  ;;  %v3604_v3 = vadd.f32 %v4087_v44, %v3589_v63 }
 0x381   : > { %v3625_v5 = vld [vmem:[#allocation4 + $0x10] ss:$2 sm:$0xff]  ;;  %v3633_v35 = vld [vmem:[#allocation4 + $0x11] ss:$2 sm:$0xff] }
 0x382   : > { %vm3641_vm5 = vcmp.gt.f32.partialorder %v3633_v35, %v3625_v5  ;;  %3622 = vst.msk [vmem:[#allocation4 + $0x38] sm:$0xff] %vm1969_vm6, %v3614_v1  ;;  %v3612_v31 = vmax.f32 %v3604_v3, 0.0 }
 0x383   : > { %v3645_v57 = vsel %vm3641_vm5, %v3633_v35, %v3625_v5  ;;  %v3655_v6 = vsel %vm3641_vm5, %v3653_v0, %v3652_v54  ;;  %v3623_v7 = vld [vmem:[#allocation4] ss:$2 sm:$0xff]  ;;  %v3631_v47 = vld [vmem:[#allocation4 + $0x1] ss:$2 sm:$0xff] }
 0x384   : > { %3649 = vst.msk [vmem:[#allocation5 + $0x8] sm:$0xff] %vm1969_vm6, %v3645_v57  ;;  %3659 = vst.msk [vmem:[#allocation6 + $0x8] sm:$0xff] %vm1969_vm6, %v3655_v6  ;;  %vm3640_vm8 = vcmp.gt.f32.partialorder %v3631_v47, %v3623_v7 }
 0x385   : > { %3620 = vst.msk [vmem:[#allocation4 + $0x28] sm:$0xff] %vm1969_vm6, %v3612_v31  ;;  %v3644_v8 = vsel %vm3640_vm8, %v3631_v47, %v3623_v7  ;;  %v3654_v9 = vsel %vm3640_vm8, %v3653_v0, %v3652_v54 }
 0x386   : > { %3648 = vst.msk [vmem:[#allocation5] sm:$0xff] %vm1969_vm6, %v3644_v8  ;;  %3658 = vst.msk [vmem:[#allocation6] sm:$0xff] %vm1969_vm6, %v3654_v9 }
 0x389   : > { %v3629_v10 = vld [vmem:[#allocation4 + $0x30] ss:$2 sm:$0xff]  ;;  %v3637_v11 = vld [vmem:[#allocation4 + $0x31] ss:$2 sm:$0xff] }
 0x38a   : > { %vm3643_vm9 = vcmp.gt.f32.partialorder %v3637_v11, %v3629_v10 }
 0x38b   : > { %v3647_v12 = vsel %vm3643_vm9, %v3637_v11, %v3629_v10  ;;  %v3657_v13 = vsel %vm3643_vm9, %v3653_v0, %v3652_v54  ;;  %v3665_v19 = vld [vmem:[#allocation5 + $0x8] sm:$0xff] }
 0x38c   : > { %v3627_v14 = vld [vmem:[#allocation4 + $0x20] ss:$2 sm:$0xff]  ;;  %v3635_v15 = vld [vmem:[#allocation4 + $0x21] ss:$2 sm:$0xff]  ;;  %3651 = vst.msk [vmem:[#allocation5 + $0x18] sm:$0xff] %vm1969_vm6, %v3647_v12  ;;  %3661 = vst.msk [vmem:[#allocation6 + $0x18] sm:$0xff] %vm1969_vm6, %v3657_v13 }
 0x38d   : > { %vm3642_vm10 = vcmp.gt.f32.partialorder %v3635_v15, %v3627_v14  ;;  %v3662_v18 = vld [vmem:[#allocation5] sm:$0xff]  ;;  %v3670_v43 = vld [vmem:[#allocation6 + $0x8] sm:$0xff] }
 0x38e   : > { %v3646_v16 = vsel %vm3642_vm10, %v3635_v15, %v3627_v14  ;;  %v3656_v17 = vsel %vm3642_vm10, %v3653_v0, %v3652_v54  ;;  %vm3672_vm11 = vcmp.gt.f32.partialorder %v3665_v19, %v3662_v18  ;;  %v3667_v24 = vld [vmem:[#allocation6] sm:$0xff] }
 0x38f   : > { %3650 = vst.msk [vmem:[#allocation5 + $0x10] sm:$0xff] %vm1969_vm6, %v3646_v16  ;;  %3660 = vst.msk [vmem:[#allocation6 + $0x10] sm:$0xff] %vm1969_vm6, %v3656_v17  ;;  %v3674_v44 = vsel %vm3672_vm11, %v3665_v19, %v3662_v18  ;;  %v3680_v21 = vsel %vm3672_vm11, 1, %v4532_v2  ;;  %v3686_v26 = vsel %vm3672_vm11, %v3670_v43, %v3667_v24 }
 0x390   : > { %v3676_v22 = vpack.c.bf16 %v3674_v44, %v3674_v44  ;;  %v3684_v62 = vadd.s32 %v3683_v20, %v3680_v21 }
 0x392   : > { %3678 = vst.msk [vmem:[%s5267_s22] sm:$0xf] %vm1763_vm1, %v3676_v22  ;;  %v3688_v25 = vmul.u32 16, %v3684_v62 }
 0x393   : > { %v3666_v28 = vld [vmem:[#allocation5 + $0x18] sm:$0xff] }
 0x394   : > { %v3690_v27 = vadd.s32 %v3688_v25, %v3686_v26  ;;  %v3671_v33 = vld [vmem:[#allocation6 + $0x18] sm:$0xff] }
 0x396   : > { %v3663_v53 = vld [vmem:[#allocation5 + $0x10] sm:$0xff]  ;;  %3692 = vst.msk [vmem:[%s5271_s9] sm:$0xff] %vm1969_vm6, %v3690_v27 }
 0x397   : > { %vm3673_vm12 = vcmp.gt.f32.partialorder %v3666_v28, %v3663_v53  ;;  %v3668_v32 = vld [vmem:[#allocation6 + $0x10] sm:$0xff] }
 0x398   : > { %v3675_v2 = vsel %vm3673_vm12, %v3666_v28, %v3663_v53  ;;  %v3681_v4 = vsel %vm3673_vm12, 3, %v4535_v29 }
 0x399   : > { %v3677_v30 = vpack.c.bf16 %v3675_v2, %v3675_v2  ;;  %v3685_v23 = vadd.s32 %v3683_v20, %v3681_v4 }
 0x39b   : > { %3679 = vst.msk [vmem:[%s5267_s22 + $0x4] sm:$0xf] %vm1763_vm1, %v3677_v30  ;;  %v3689_v34 = vmul.u32 16, %v3685_v23 }
 0x39c   : > { %4413 = shalt.err (!%p4410_p9)
}
 0x39d   : > { %s4414_s0 = scalar_lea.hbm %s5594_s21, 128  ;;  %s4418_s18 = scalar_lea.hbm %s5697_s7, 1024 }
 0x39e   : > { %p4415_p10 = scmp.ne.s32.totalorder %s5594_s21, %s4414_s0  ;;  %p4419_p13 = scmp.lt.s32.totalorder %s5594_s21, %s5697_s7 }
 0x39f   : > { %p4420_p0 = scmp.lt.s32.totalorder %s4418_s18, %s4414_s0 }
 0x3a0   : > { %p4416_p11 = pnand %p4415_p10, %p4638_p5 }
 0x3a1   : > { %p4421_p1 = por %p4420_p0, %p4419_p13 }
 0x3a2   : > { %p4417_p12 = pneg %p4416_p11 }
 0x3a4   : > { %p4422_p2 = pnand %p4421_p1, %p4417_p12 }
 0x3a6   : > { %4425 = shalt.err (!%p4422_p2)
}
 0x3a7   : > { %s4537_s1 = smov 64   ;;  %s5729_s2 = smov 4   ;;  %v3687_v36 = vsel %vm3673_vm12, %v3671_v33, %v3668_v32 }
 0x3a8   : > { %4289 = dma.vmem_to_hbm [thread:$0]  (%p4638_p5), %s5597_s23, 128, %s5594_s21, %s3695_s30, %s4537_s1, %s4537_s1, %s5729_s2   ;;  %v3691_v37 = vadd.s32 %v3689_v34, %v3687_v36 }
 0x3a9   : > { %s5730_s15 = sshll.u32 %s5271_s9, 4  ;;  %s3700_s13 = scalar_lea.sflag [#allocation10], %s4788_s17  ;;  %s5634_s15 = int_to_ptr.vmem [resolvable:$true] %s5730_s15 }
 0x3aa   : > { %3693 = vst.msk [vmem:[%s5271_s9 + $0x8] sm:$0xff] %vm1969_vm6, %v3691_v37  ;;  %s4426_s0 = scalar_lea.vmem %s5634_s15, 256  ;;  %s4538_s22 = smov [#allocation9]  }
 0x3ab   : > { %p4427_p3 = scmp.ne.s32.totalorder %s5634_s15, %s4426_s0  ;;  %s4430_s16 = sshll.u32 %s4538_s22, 4  ;;  %s4431_s16 = int_to_ptr.vmem [resolvable:$false] %s4430_s16 }
 0x3ac   : > { %s4432_s23 = scalar_lea.vmem %s4431_s16, 512  ;;  %p4433_p8 = scmp.lt.s32.totalorder %s5634_s15, %s4431_s16 }
 0x3ad   : > { %p4428_p4 = pnand %p4427_p3, %p4638_p5  ;;  %p4434_p9 = scmp.lt.s32.totalorder %s4432_s23, %s4426_s0 }
 0x3af   : > { %p4429_p6 = pneg %p4428_p4  ;;  %p4435_p10 = por %p4434_p9, %p4433_p8 }
 0x3b1   : > { %p4436_p11 = pnand %p4435_p10, %p4429_p6 }
 0x3b3   : > { %4439 = shalt.err (!%p4436_p11)
}
 0x3b4   : > { %s4440_s9 = scalar_lea.hbm %s5605_s24, 256  ;;  %s4444_s18 = scalar_lea.hbm %s5698_s8, 2048 }
 0x3b5   : > { %p4441_p12 = scmp.ne.s32.totalorder %s5605_s24, %s4440_s9  ;;  %p4445_p1 = scmp.lt.s32.totalorder %s5605_s24, %s5698_s8 }
 0x3b6   : > { %p4446_p2 = scmp.lt.s32.totalorder %s4444_s18, %s4440_s9 }
 0x3b7   : > { %p4442_p13 = pnand %p4441_p12, %p4638_p5 }
 0x3b8   : > { %p4447_p3 = por %p4446_p2, %p4445_p1 }
 0x3b9   : > { %p4443_p0 = pneg %p4442_p13 }
 0x3bb   : > { %p4448_p4 = pnand %p4447_p3, %p4443_p0 }
 0x3bd   : > { %4451 = shalt.err (!%p4448_p4)
}
 0x3be   : > { %s4539_s2 = smov 128   ;;  %s5731_s0 = smov 8  }
 0x3bf   : > { %4290 = dma.vmem_to_hbm [thread:$0]  (%p4638_p5), %s5634_s15, 256, %s5605_s24, %s3700_s13, %s4539_s2, %s4539_s2, %s5731_s0  }
 0x3c0 PF: > { %p4300_p6 = scmp.ge.s32.totalorder %s4522_s12, 2  ;;  %s3748_s22 = sand.u32 1, %s4494_s27  }
 0x3c1   : > { %s3749_s16 = scalar_lea.sflag [#allocation8], %s3748_s22 }
 0x3c2   : > { %p4294_p8 = pnand %p4300_p6, %p4644_p7 }
 0x3c4   : > { %p4295_p9 = pneg %p4294_p8 }
 0x3c6   : > { %4485 = dma.done.wait (%p4295_p9), %s3749_s16, 128  }
 0x3c7   : > { %4487 = vsyncadd (%p4295_p9), %s3749_s16, 4294967168  ;;  %s3758_s23 = scalar_lea.sflag [#allocation10], %s3748_s22 }
 0x3c8   : > { %4489 = dma.done.wait (%p4295_p9), %s3758_s23, 256  }
 0x3c9   : > { %4491 = vsyncadd (%p4295_p9), %s3758_s23, 4294967040  ;;  %s25_s12 = sadd.s32 1, %s4522_s12   ;;  %s5732_s19 = sld [smem:[#allocation13_spill]] }
 0x3ca   : > { %p22_p10 = scmp.ge.s32.totalorder %s25_s12, 10   ;;  %s5733_s27 = smov %s4498_s28 }
 0x3cb   : > { %s5734_s28 = smov %s4502_s29  ;;  %s5735_s29 = smov %s4654_s25 }
 0x3cc   : > { %s5736_s30 = smov %s4514_s10  ;;  %s5737_s9 = smov %s4518_s11 }
 0x3cd   : > { %s5738_s10 = smov %s5741_s14  ;;  %24 = sbr.rel (!%p22_p10) target bundleno = 11 (0xb), region = 122 }
 0x3cf   : > { %s5739_s11 = smov %s5732_s19 }
 0x3d2   :  { %3763 = vsyncpa [#allocation8], 1 }
 0x3d3   :  { %3765 = vsyncpa [#allocation8 + $0x1], 1 }
 0x3d4   :  { %3766 = vsyncpa [#allocation10], 1 }
 0x3d5   :  { %3768 = vsyncpa [#allocation10 + $0x1], 1 }

</bundles_post_ra>
